<compile_context>
chip_gen: v5e
topology: v5e:2x2
jax: 0.10.0
libtpu: 0.0.40
codegen_flags: <defaults>
</compile_context>

<pallas_src>
import functools

import jax
import jax.numpy as jnp
from jax.experimental import pallas as pl
from jax.experimental.pallas import tpu as pltpu


def _round_up(x, m):
    return ((x + m - 1) // m) * m


def fcnet_kernel(x_ref,
                 w1_ref, b1_ref,
                 w2_ref, b2_ref,
                 w3_ref, b3_ref,
                 w4_ref, b4_ref,
                 o_ref):
    # fc1: bf16 MXU operands, f32 accumulation; fused bias+ReLU+downcast
    h = jnp.dot(x_ref[...].astype(jnp.bfloat16), w1_ref[...],
                preferred_element_type=jnp.float32)
    h = jnp.maximum(h + b1_ref[...], 0.0).astype(jnp.bfloat16)
    # fc2
    h = jnp.dot(h, w2_ref[...], preferred_element_type=jnp.float32)
    h = jnp.maximum(h + b2_ref[...], 0.0).astype(jnp.bfloat16)
    # fc3
    h = jnp.dot(h, w3_ref[...], preferred_element_type=jnp.float32)
    h = jnp.maximum(h + b3_ref[...], 0.0).astype(jnp.bfloat16)
    # fc4 (no activation)
    o_ref[...] = (jnp.dot(h, w4_ref[...], preferred_element_type=jnp.float32)
                  + b4_ref[...]).astype(o_ref.dtype)


def _auto_tile_b(B):
    """Pick a batch tile: big enough to amortize per-step overhead, capped so
    the grid has >=2 steps when possible (keeps both v7x TensorCores busy)."""
    B8 = _round_up(B, 8)
    if B8 >= 4096:
        t = 1024
    elif B8 >= 1024:
        t = 512
    else:
        t = 256
    if B8 >= 16:
        # Guarantee at least a 2-step "parallel" batch grid.
        t = min(t, _round_up(pl.cdiv(B8, 2), 8))
    return max(8, min(t, B8))


@functools.partial(jax.jit, static_argnames=("tile_b",))
def fcnet_forward(x, params, *, tile_b=None):
    """x: [B, input_size] float32.
    params: dict name -> (w [in,out] bf16, b [1,out] f32)."""
    B, D = x.shape
    (w1, b1), (w2, b2), (w3, b3), (w4, b4) = (
        params["fc1"], params["fc2"], params["fc3"], params["fc4"])
    out_dim = w4.shape[1]

    if tile_b is None:
        tile_b = _auto_tile_b(B)
    else:
        tile_b = max(8, min(_round_up(tile_b, 8), _round_up(B, 8)))

    # Pad the batch to a multiple of tile_b -> every tile is full, stores stay
    # unmasked, and the grid is evenly balanced across TensorCores.
    B_pad = _round_up(B, tile_b)
    if B_pad != B:
        x = jnp.pad(x, ((0, B_pad - B), (0, 0)))

    grid = (B_pad // tile_b,)

    def full(shape):
        # Whole-array block, same block every grid step (weights stay resident).
        return pl.BlockSpec(shape, lambda i: tuple(0 for _ in shape))

    weight_bytes = sum(w.size * w.dtype.itemsize + b.size * b.dtype.itemsize
                       for (w, b) in (params["fc1"], params["fc2"],
                                      params["fc3"], params["fc4"]))
    flops = 2 * B_pad * (D * 256 + 256 * 512 + 512 * 256 + 256 * 128)
    bytes_accessed = (B_pad * D * 4          # x in
                      + weight_bytes         # resident weights/biases
                      + B_pad * out_dim * 4) # output

    # v5e's default scoped-VMEM limit is 16 MiB; only very large batch tiles
    # need more (weights ~0.6 MiB, f32+bf16 intermediates ~6 B/elem * 512).
    vmem_limit = None
    if tile_b > 512:
        est = (2 * tile_b * D * 4 + 2 * tile_b * out_dim * 4
               + 2 * weight_bytes + tile_b * 512 * 6 * 2)
        vmem_limit = int(min(max(32 << 20, 2 * est), 48 << 20))

    out = pl.pallas_call(
        fcnet_kernel,
        out_shape=jax.ShapeDtypeStruct((B_pad, out_dim), jnp.float32),
        grid_spec=pltpu.PrefetchScalarGridSpec(
            num_scalar_prefetch=0,
            grid=grid,
            in_specs=[
                pl.BlockSpec((tile_b, D), lambda i: (i, 0)),
                full(w1.shape), full(b1.shape),
                full(w2.shape), full(b2.shape),
                full(w3.shape), full(b3.shape),
                full(w4.shape), full(b4.shape),
            ],
            out_specs=pl.BlockSpec((tile_b, out_dim), lambda i: (i, 0)),
        ),
        compiler_params=pltpu.CompilerParams(
            dimension_semantics=("parallel",),
            vmem_limit_bytes=vmem_limit),
        cost_estimate=pl.CostEstimate(
            flops=flops, transcendentals=0, bytes_accessed=bytes_accessed),
    )(x, w1, b1, w2, b2, w3, b3, w4, b4)

    return out[:B] if B_pad != B else out


def init_params(key, input_size):
    """Deterministic init mimicking PyTorch nn.Linear default
    (uniform(-1/sqrt(fan_in), 1/sqrt(fan_in))). Weights are stored pre-cast
    to bf16 (the MXU operand dtype) so no per-call cast is needed."""
    dims = [(input_size, 256), (256, 512), (512, 256), (256, 128)]
    names = ["fc1", "fc2", "fc3", "fc4"]
    params = {}
    for name, (fan_in, fan_out) in zip(names, dims):
        key, kw, kb = jax.random.split(key, 3)
        bound = 1.0 / jnp.sqrt(float(fan_in))
        # stored as [in, out] (i.e. W_torch.T), bf16 once at init time
        w = jax.random.uniform(kw, (fan_in, fan_out), jnp.float32,
                               minval=-bound, maxval=bound).astype(jnp.bfloat16)
        b = jax.random.uniform(kb, (1, fan_out), jnp.float32,
                               minval=-bound, maxval=bound)
        params[name] = (w, b)
    return params


def reference_forward(x, params):
    """Pure-JAX reference using the same bf16-operand / f32-accumulate /
    bf16-intermediate numerics as the kernel (so tolerances stay tight)."""
    h = x.astype(jnp.bfloat16)
    for name, act in [("fc1", True), ("fc2", True), ("fc3", True),
                      ("fc4", False)]:
        w, b = params[name]
        h = jnp.dot(h, w, preferred_element_type=jnp.float32) + b
        if act:
            h = jnp.maximum(h, 0.0).astype(jnp.bfloat16)
    return h


if __name__ == "__main__":
    key = jax.random.PRNGKey(0)
    k_data, k_param = jax.random.split(key)

    # Modest synthetic sizes; batch=512 auto-picks tile_b=256 -> a 2-step
    # "parallel" grid so both v7x TensorCores get work.
    batch = 512
    input_size = 64  # x.shape[1] in the original script

    x = jax.random.normal(k_data, (batch, input_size), jnp.float32) * 10.0
    # The original script applies `x = x - 100` to the data before the model.
    x = x - 100.0

    params = init_params(k_param, input_size)

    out = fcnet_forward(x, params)
    out = jax.block_until_ready(out)

    ref = reference_forward(x, params)
    assert out.shape == (batch, 128), out.shape
    assert jnp.allclose(out, ref, atol=1e-2, rtol=1e-2), \
        float(jnp.max(jnp.abs(out - ref)))

    print("KERNEL_OK")
</pallas_src>

<mosaic_0001>
module attributes {stable_mosaic.version = 11 : i64} {
  func.func @fcnet_kernel(%arg0: i32, %arg1: memref<256x64xf32, #tpu.memory_space<vmem>>, %arg2: memref<64x256xbf16, #tpu.memory_space<vmem>>, %arg3: memref<1x256xf32, #tpu.memory_space<vmem>>, %arg4: memref<256x512xbf16, #tpu.memory_space<vmem>>, %arg5: memref<1x512xf32, #tpu.memory_space<vmem>>, %arg6: memref<512x256xbf16, #tpu.memory_space<vmem>>, %arg7: memref<1x256xf32, #tpu.memory_space<vmem>>, %arg8: memref<256x128xbf16, #tpu.memory_space<vmem>>, %arg9: memref<1x128xf32, #tpu.memory_space<vmem>>, %arg10: memref<256x128xf32, #tpu.memory_space<vmem>>) attributes {dimension_semantics = [#tpu.dimension_semantics<parallel>], iteration_bounds = array<i64: 2>, scalar_prefetch = 0 : i64, scratch_operands = 0 : i64, tpu.core_type = #tpu.core_type<tc>, window_params = [{transform_indices = @transform_0, window_bounds = array<i64: 256, 64>}, {pipeline_mode = #tpu.pipeline_mode<synchronous>, transform_indices = @transform_1, window_bounds = array<i64: 64, 256>}, {pipeline_mode = #tpu.pipeline_mode<synchronous>, transform_indices = @transform_2, window_bounds = array<i64: 1, 256>}, {pipeline_mode = #tpu.pipeline_mode<synchronous>, transform_indices = @transform_3, window_bounds = array<i64: 256, 512>}, {pipeline_mode = #tpu.pipeline_mode<synchronous>, transform_indices = @transform_4, window_bounds = array<i64: 1, 512>}, {pipeline_mode = #tpu.pipeline_mode<synchronous>, transform_indices = @transform_5, window_bounds = array<i64: 512, 256>}, {pipeline_mode = #tpu.pipeline_mode<synchronous>, transform_indices = @transform_6, window_bounds = array<i64: 1, 256>}, {pipeline_mode = #tpu.pipeline_mode<synchronous>, transform_indices = @transform_7, window_bounds = array<i64: 256, 128>}, {pipeline_mode = #tpu.pipeline_mode<synchronous>, transform_indices = @transform_8, window_bounds = array<i64: 1, 128>}, {transform_indices = @transform_9, window_bounds = array<i64: 256, 128>}]} {
    %c0 = arith.constant 0 : index
    %c0_0 = arith.constant 0 : index
    %0 = vector.load %arg1[%c0, %c0_0] : memref<256x64xf32, #tpu.memory_space<vmem>>, vector<256x64xf32>
    %1 = arith.truncf %0 : vector<256x64xf32> to vector<256x64xbf16>
    %c0_1 = arith.constant 0 : index
    %c0_2 = arith.constant 0 : index
    %2 = vector.load %arg2[%c0_1, %c0_2] : memref<64x256xbf16, #tpu.memory_space<vmem>>, vector<64x256xbf16>
    %cst = arith.constant dense<0.000000e+00> : vector<256x256xf32>
    %3 = tpu.matmul %1, %2, %cst {dimension_numbers = #tpu.dot_dimension_numbers<[1], [0], [0], [1], [0, 0, 1, 1], [], []>} : vector<256x64xbf16>, vector<64x256xbf16>, vector<256x256xf32> -> vector<256x256xf32>
    %c0_3 = arith.constant 0 : index
    %c0_4 = arith.constant 0 : index
    %4 = vector.load %arg3[%c0_3, %c0_4] : memref<1x256xf32, #tpu.memory_space<vmem>>, vector<1x256xf32>
    %5 = vector.broadcast %4 : vector<1x256xf32> to vector<256x256xf32>
    %6 = arith.addf %3, %5 : vector<256x256xf32>
    %cst_5 = arith.constant 0.000000e+00 : f32
    %7 = vector.broadcast %cst_5 : f32 to vector<256x256xf32>
    %8 = arith.maximumf %6, %7 : vector<256x256xf32>
    %9 = arith.truncf %8 : vector<256x256xf32> to vector<256x256xbf16>
    %c0_6 = arith.constant 0 : index
    %c0_7 = arith.constant 0 : index
    %10 = vector.load %arg4[%c0_6, %c0_7] : memref<256x512xbf16, #tpu.memory_space<vmem>>, vector<256x512xbf16>
    %cst_8 = arith.constant dense<0.000000e+00> : vector<256x512xf32>
    %11 = tpu.matmul %9, %10, %cst_8 {dimension_numbers = #tpu.dot_dimension_numbers<[1], [0], [0], [1], [0, 0, 1, 1], [], []>} : vector<256x256xbf16>, vector<256x512xbf16>, vector<256x512xf32> -> vector<256x512xf32>
    %c0_9 = arith.constant 0 : index
    %c0_10 = arith.constant 0 : index
    %12 = vector.load %arg5[%c0_9, %c0_10] : memref<1x512xf32, #tpu.memory_space<vmem>>, vector<1x512xf32>
    %13 = vector.broadcast %12 : vector<1x512xf32> to vector<256x512xf32>
    %14 = arith.addf %11, %13 : vector<256x512xf32>
    %cst_11 = arith.constant 0.000000e+00 : f32
    %15 = vector.broadcast %cst_11 : f32 to vector<256x512xf32>
    %16 = arith.maximumf %14, %15 : vector<256x512xf32>
    %17 = arith.truncf %16 : vector<256x512xf32> to vector<256x512xbf16>
    %c0_12 = arith.constant 0 : index
    %c0_13 = arith.constant 0 : index
    %18 = vector.load %arg6[%c0_12, %c0_13] : memref<512x256xbf16, #tpu.memory_space<vmem>>, vector<512x256xbf16>
    %cst_14 = arith.constant dense<0.000000e+00> : vector<256x256xf32>
    %19 = tpu.matmul %17, %18, %cst_14 {dimension_numbers = #tpu.dot_dimension_numbers<[1], [0], [0], [1], [0, 0, 1, 1], [], []>} : vector<256x512xbf16>, vector<512x256xbf16>, vector<256x256xf32> -> vector<256x256xf32>
    %c0_15 = arith.constant 0 : index
    %c0_16 = arith.constant 0 : index
    %20 = vector.load %arg7[%c0_15, %c0_16] : memref<1x256xf32, #tpu.memory_space<vmem>>, vector<1x256xf32>
    %21 = vector.broadcast %20 : vector<1x256xf32> to vector<256x256xf32>
    %22 = arith.addf %19, %21 : vector<256x256xf32>
    %cst_17 = arith.constant 0.000000e+00 : f32
    %23 = vector.broadcast %cst_17 : f32 to vector<256x256xf32>
    %24 = arith.maximumf %22, %23 : vector<256x256xf32>
    %25 = arith.truncf %24 : vector<256x256xf32> to vector<256x256xbf16>
    %c0_18 = arith.constant 0 : index
    %c0_19 = arith.constant 0 : index
    %26 = vector.load %arg8[%c0_18, %c0_19] : memref<256x128xbf16, #tpu.memory_space<vmem>>, vector<256x128xbf16>
    %cst_20 = arith.constant dense<0.000000e+00> : vector<256x128xf32>
    %27 = tpu.matmul %25, %26, %cst_20 {dimension_numbers = #tpu.dot_dimension_numbers<[1], [0], [0], [1], [0, 0, 1, 1], [], []>} : vector<256x256xbf16>, vector<256x128xbf16>, vector<256x128xf32> -> vector<256x128xf32>
    %c0_21 = arith.constant 0 : index
    %c0_22 = arith.constant 0 : index
    %28 = vector.load %arg9[%c0_21, %c0_22] : memref<1x128xf32, #tpu.memory_space<vmem>>, vector<1x128xf32>
    %29 = vector.broadcast %28 : vector<1x128xf32> to vector<256x128xf32>
    %30 = arith.addf %27, %29 : vector<256x128xf32>
    %c0_23 = arith.constant 0 : index
    %c0_24 = arith.constant 0 : index
    %31 = vector.load %arg10[%c0_23, %c0_24] : memref<256x128xf32, #tpu.memory_space<vmem>>, vector<256x128xf32>
    tpu.vector_store %arg10[%c0_23, %c0_24], %30 {strides = array<i32>} : memref<256x128xf32, #tpu.memory_space<vmem>>, vector<256x128xf32>,
    return
  }
  func.func @transform_0(%arg0: i32) -> (i32, i32) {
    %c0_i32 = arith.constant 0 : i32
    %c0_i32_0 = arith.constant 0 : i32
    return %arg0, %c0_i32 : i32, i32
  }
  func.func @transform_1(%arg0: i32) -> (i32, i32) {
    %c0_i32 = arith.constant 0 : i32
    %c0_i32_0 = arith.constant 0 : i32
    %c0_i32_1 = arith.constant 0 : i32
    return %c0_i32, %c0_i32_0 : i32, i32
  }
  func.func @transform_2(%arg0: i32) -> (i32, i32) {
    %c0_i32 = arith.constant 0 : i32
    %c0_i32_0 = arith.constant 0 : i32
    %c0_i32_1 = arith.constant 0 : i32
    return %c0_i32, %c0_i32_0 : i32, i32
  }
  func.func @transform_3(%arg0: i32) -> (i32, i32) {
    %c0_i32 = arith.constant 0 : i32
    %c0_i32_0 = arith.constant 0 : i32
    %c0_i32_1 = arith.constant 0 : i32
    return %c0_i32, %c0_i32_0 : i32, i32
  }
  func.func @transform_4(%arg0: i32) -> (i32, i32) {
    %c0_i32 = arith.constant 0 : i32
    %c0_i32_0 = arith.constant 0 : i32
    %c0_i32_1 = arith.constant 0 : i32
    return %c0_i32, %c0_i32_0 : i32, i32
  }
  func.func @transform_5(%arg0: i32) -> (i32, i32) {
    %c0_i32 = arith.constant 0 : i32
    %c0_i32_0 = arith.constant 0 : i32
    %c0_i32_1 = arith.constant 0 : i32
    return %c0_i32, %c0_i32_0 : i32, i32
  }
  func.func @transform_6(%arg0: i32) -> (i32, i32) {
    %c0_i32 = arith.constant 0 : i32
    %c0_i32_0 = arith.constant 0 : i32
    %c0_i32_1 = arith.constant 0 : i32
    return %c0_i32, %c0_i32_0 : i32, i32
  }
  func.func @transform_7(%arg0: i32) -> (i32, i32) {
    %c0_i32 = arith.constant 0 : i32
    %c0_i32_0 = arith.constant 0 : i32
    %c0_i32_1 = arith.constant 0 : i32
    return %c0_i32, %c0_i32_0 : i32, i32
  }
  func.func @transform_8(%arg0: i32) -> (i32, i32) {
    %c0_i32 = arith.constant 0 : i32
    %c0_i32_0 = arith.constant 0 : i32
    %c0_i32_1 = arith.constant 0 : i32
    return %c0_i32, %c0_i32_0 : i32, i32
  }
  func.func @transform_9(%arg0: i32) -> (i32, i32) {
    %c0_i32 = arith.constant 0 : i32
    %c0_i32_0 = arith.constant 0 : i32
    return %arg0, %c0_i32 : i32, i32
  }
}

</mosaic_0001>

<bundles_post_ra>
// kernel: fcnet_forward.1
= control target key start
LH: loop header
LB: loop body
LE: loop exit
PB: predicated region body
PF: predicated region fallthrough
CT: control target
= control target key end

     0   :  { %14 = vsyncpa [#allocation3], 0  ;;  %s6421_s0 = inlined_call_operand.vmem [shape: f32[512,64], index: 0, kind: input, shape index: {}]   ;;  %s6422_s1 = inlined_call_operand.vmem [shape: bf16[64,256], index: 1, kind: input, shape index: {}]   ;;  %s6423_s2 = inlined_call_operand.vmem [shape: f32[1,256], index: 2, kind: input, shape index: {}]   ;;  %s6424_s3 = inlined_call_operand.vmem [shape: bf16[256,512], index: 3, kind: input, shape index: {}]   ;;  %s6425_s4 = inlined_call_operand.vmem [shape: f32[1,512], index: 4, kind: input, shape index: {}]   ;;  %s6426_s5 = inlined_call_operand.hbm [shape: bf16[512,256], index: 5, kind: input, shape index: {}]   ;;  %s6427_s6 = inlined_call_operand.vmem [shape: f32[1,256], index: 6, kind: input, shape index: {}]   ;;  %s6428_s7 = inlined_call_operand.vmem [shape: bf16[256,128], index: 7, kind: input, shape index: {}]   ;;  %s6429_s8 = inlined_call_operand.vmem [shape: f32[1,128], index: 8, kind: input, shape index: {}]   ;;  %s6430_s9 = inlined_call_operand.hbm [shape: f32[512,128], index: 9, kind: output, shape index: {}]  }
   0x1   :  { %15 = vsyncpa [#allocation4], 0 }
   0x2   :  { %17 = vsyncpa [#allocation4 + $0x1], 0  ;;  %s4721_s30 = smov 0   ;;  %s4723_s10 = smov 0  }
   0x3   :  { %s4725_s11 = smov 0   ;;  %s4727_s12 = smov 0  }
   0x4 LB: > { %s4742_s13 = sadd.s32 4294967295, %s4664_s12   ;;  %s3705_s14 = sadd.s32 4294967294, %s4664_s12   ;;  %s4664_s12 = sphi %s4727_s12, %s6556_s12   ;;  %s4660_s11 = sphi %s4725_s11, %s6555_s11   ;;  %s4656_s10 = sphi %s4723_s10, %s6554_s10   ;;  %s4652_s30 = sphi %s4721_s30, %s6553_s30  }
   0x5   : > { %s4746_s15 = sadd.s32 1, %s4664_s12   ;;  %s224_s16 = sadd.s32 1, %s4660_s11 }
   0x6   : > { %s221_s17 = ssub.s32 %s4664_s12, %s4746_s15  ;;  %p234_p0 = scmp.ne.s32.totalorder %s4660_s11, %s4656_s10 }
   0x7   : > { %p222_p1 = scmp.eq.s32.totalorder %s221_s17, 0  ;;  %p235_p2 = scmp.eq.s32.totalorder %s4742_s13, 1 }
   0x8   : > { %p240_p3 = scmp.ne.s32.totalorder %s4656_s10, %s4652_s30  ;;  %p241_p4 = scmp.eq.s32.totalorder %s3705_s14, 1 }
   0x9   : > { %s4757_s18 = scalar_select %p222_p1, %s4660_s11, %s224_s16  }
   0xa   : > { %p4759_p5 = por %p235_p2, %p234_p0  ;;  %p4763_p6 = por %p241_p4, %p240_p3 }
   0xb   : > { %p3706_p7 = scmp.ge.s32.totalorder %s4664_s12, 1  ;;  %p248_p8 = scmp.lt.s32.totalorder %s4664_s12, 3 }
   0xc   : > { %p4526_p9 = scmp.eq.s32.totalorder %s4742_s13, 0  ;;  %s271_s23 = sshll.u32 %s6426_s5, 4  ;;  %s272_s23 = int_to_ptr.hbm [resolvable:$true] %s271_s23 }
   0xd   : > { %p249_p10 = pnand %p3706_p7, %p248_p8  ;;  %s4666_s24 = smov [#allocation2]  }
   0xe   : > { %s273_s25 = sshll.u32 %s4666_s24, 4  ;;  %s4667_s26 = smov 128   ;;  %s274_s25 = int_to_ptr.vmem [resolvable:$true] %s273_s25 }
   0xf   : > { %p4518_p11 = pneg %p249_p10  ;;  %s4668_s27 = smov 8  }
  0x10   : > { %307 = sbr.rel (%p249_p10) target bundleno = 1593 (0x639), region = 56 }
  0x11   : > { %p4519_p12 = pnand %p4526_p9, %p4518_p11 }
  0x13   : > { %4521 = dma.hbm_to_vmem [thread:$0]  (!%p4519_p12), %s272_s23, 8192, %s274_s25, [#allocation3], %s4667_s26, %s4667_s26, %s4668_s27  }
  0x15   : > { %4643 = dma.done.wait (%p4526_p9), [#allocation3], 8192  }
  0x16   : > { %4645 = vsyncadd (%p4526_p9), [#allocation3], 4294959104  ;;  %s3712_s28 = sshll.u32 %s4742_s13, 5  ;;  %v3740_v0 = vld [vmem:[%s6422_s1 + $0x30] sm:$0xf]  ;;  %vm454_vm0 = vcmask 523264  }
  0x17   : > { %p345_p13 = scmp.lt.s32.totalorder %s3712_s28, 63  ;;  %v4366_v1 = vld [vmem:[%s6422_s1 + $0x34] sm:$0xf0]  ;;  %v4365_v2 = vld [vmem:[%s6422_s1 + $0x34] sm:$0xf]  ;;  %s341_s14 = sand.u32 1, %s4656_s10  }
  0x18   : > { %v3741_v3 = vor.u32 %v4366_v1, %v3740_v0  ;;  %v3742_v4 = vld [vmem:[%s6422_s1 + $0x38] sm:$0xf0]  ;;  %v3732_v5 = vld [vmem:[%s6422_s1 + $0x20] sm:$0xf]  ;;  %v4364_v6 = vld [vmem:[%s6422_s1 + $0x24] sm:$0xf0] }
  0x19   : > { %s6558_s28 = smov (!%p345_p13, %s3712_s28), 63  ;;  %v3745_v7 = vor.u32 %v4365_v2, %v3742_v4  ;;  %v4363_v8 = vld [vmem:[%s6422_s1 + $0x24] sm:$0xf]  ;;  %v3734_v9 = vld [vmem:[%s6422_s1 + $0x28] sm:$0xf0]  ;;  %v3733_v10 = vor.u32 %v4364_v6, %v3732_v5  ;;  %s3711_s22 = sshll.u32 %s341_s14, 8 }
  0x1a   : > { %507 = vmatpush.bf16.msra.mxu0 %v3741_v3  ;;  %v3737_v11 = vor.u32 %v4363_v8, %v3734_v9  ;;  %v3724_v12 = vld [vmem:[%s6422_s1 + $0x10] sm:$0xf]  ;;  %v4362_v13 = vld [vmem:[%s6422_s1 + $0x14] sm:$0xf0]  ;;  %v4361_v14 = vld [vmem:[%s6422_s1 + $0x14] sm:$0xf] }
  0x1b   : > { %596 = vmatpush.bf16.msra.mxu1 %v3745_v7  ;;  %v3726_v15 = vld [vmem:[%s6422_s1 + $0x18] sm:$0xf0]  ;;  %s3713_s16 = sshll.u32 %s6558_s28, 3  ;;  %v3725_v16 = vor.u32 %v4362_v13, %v3724_v12  ;;  %v3716_v17 = vld [vmem:[%s6422_s1] sm:$0xf]  ;;  %s6302_s23 = scalar_lea.vmem [#allocation5], %s3711_s22 }
  0x1c   : > { %v3729_v18 = vor.u32 %v4361_v14, %v3726_v15  ;;  %v4360_v19 = vld [vmem:[%s6422_s1 + $0x4] sm:$0xf0]  ;;  %v4359_v20 = vld [vmem:[%s6422_s1 + $0x4] sm:$0xf]  ;;  %s4828_s28 = scalar_lea.vmem %s6421_s0, %s3713_s16  ;;  %v3718_v21 = vld [vmem:[%s6422_s1 + $0x8] sm:$0xf0] }
  0x1d   : > { %v4395_v22 = vld [vmem:[%s6424_s3 + $0xe4] sm:$0xf]  ;;  %v3894_v23 = vld [vmem:[%s6424_s3 + $0xf0] sm:$0xf0]  ;;  %v3717_v26 = vor.u32 %v4360_v19, %v3716_v17  ;;  %v353_v28 = vld [vmem:[%s4828_s28 + $0x8] sm:$0xff]  ;;  %v3721_v29 = vor.u32 %v4359_v20, %v3718_v21  ;;  %s4511_s24 = sshll.u32 %s4742_s13, 8 }
  0x1e   : > { %508 = vmatpush.bf16.msra.mxu0 %v3733_v10  ;;  %v4427_v24 = vld [vmem:[%s6424_s3 + $0x1e4] sm:$0xf]  ;;  %v4022_v25 = vld [vmem:[%s6424_s3 + $0x1f0] sm:$0xf0]  ;;  %v3897_v30 = vor.u32 %v4395_v22, %v3894_v23  ;;  %v355_v40 = vld [vmem:[%s4828_s28 + $0x18] sm:$0xff]  ;;  %s3627_s26 = scalar_lea.hbm %s6430_s9, %s4511_s24  ;;  %s3628_s27 = sshll.u32 %s6302_s23, 4  ;;  %s3629_s27 = int_to_ptr.vmem [resolvable:$true] %s3628_s27 }
  0x1f   : > { %597 = vmatpush.bf16.msra.mxu1 %v3737_v11  ;;  %v352_v27 = vld [vmem:[%s4828_s28] sm:$0xff]  ;;  %v4025_v31 = vor.u32 %v4427_v24, %v4022_v25  ;;  %v3878_v34 = vld [vmem:[%s6424_s3 + $0xd0] sm:$0xf0]  ;;  %v357_v43 = vld [vmem:[%s4828_s28 + $0x28] sm:$0xff]  ;;  %s3616_s13 = scalar_lea.sflag [#allocation4], %s341_s14  ;;  %s4618_s24 = scalar_lea.hbm %s6430_s9, 512 }
  0x20   : > { %v384_v32 = vpack.c.bf16 %v353_v28, %v352_v27  ;;  %v4391_v33 = vld [vmem:[%s6424_s3 + $0xc4] sm:$0xf]  ;;  %v4006_v37 = vld [vmem:[%s6424_s3 + $0x1d0] sm:$0xf0]  ;;  %v359_v52 = vld [vmem:[%s4828_s28 + $0x38] sm:$0xff] }
  0x21   : > { %v4423_v35 = vld [vmem:[%s6424_s3 + $0x1c4] sm:$0xf]  ;;  %v3881_v36 = vor.u32 %v4391_v33, %v3878_v34  ;;  %v354_v39 = vld [vmem:[%s4828_s28 + $0x10] sm:$0xff]  ;;  %v361_v55 = vld [vmem:[%s4828_s28 + $0x48] sm:$0xff] }
  0x22   : > { %509 = vmatpush.bf16.msra.mxu0 %v3725_v16  ;;  %v4009_v38 = vor.u32 %v4423_v35, %v4006_v37  ;;  %v385_v41 = vpack.c.bf16 %v355_v40, %v354_v39  ;;  %v356_v42 = vld [vmem:[%s4828_s28 + $0x20] sm:$0xff]  ;;  %v3862_v46 = vld [vmem:[%s6424_s3 + $0xb0] sm:$0xf0]  ;;  %v4397_v63 = vld [vmem:[%s6424_s3 + $0xec] sm:$0xf0] }
  0x23   : > { %598 = vmatpush.bf16.msra.mxu1 %v3729_v18  ;;  %v386_v44 = vpack.c.bf16 %v357_v43, %v356_v42  ;;  %v4387_v45 = vld [vmem:[%s6424_s3 + $0xa4] sm:$0xf]  ;;  %v3990_v49 = vld [vmem:[%s6424_s3 + $0x1b0] sm:$0xf0]  ;;  %v3892_v62 = vld [vmem:[%s6424_s3 + $0xe0] sm:$0xf] }
  0x24   : > { %v4419_v47 = vld [vmem:[%s6424_s3 + $0x1a4] sm:$0xf]  ;;  %v3865_v48 = vor.u32 %v4387_v45, %v3862_v46  ;;  %v358_v51 = vld [vmem:[%s4828_s28 + $0x30] sm:$0xff]  ;;  %v3893_v1 = vor.u32 %v4397_v63, %v3892_v62  ;;  %v4020_v2 = vld [vmem:[%s6424_s3 + $0x1e0] sm:$0xf] }
  0x25   : > { %v3993_v50 = vor.u32 %v4419_v47, %v3990_v49  ;;  %v387_v53 = vpack.c.bf16 %v359_v52, %v358_v51  ;;  %v360_v54 = vld [vmem:[%s4828_s28 + $0x40] sm:$0xff]  ;;  %v3846_v58 = vld [vmem:[%s6424_s3 + $0x90] sm:$0xf0]  ;;  %v4429_v3 = vld [vmem:[%s6424_s3 + $0x1ec] sm:$0xf0] }
  0x26   : > { %510 = vmatpush.bf16.msra.mxu0 %v3717_v26  ;;  %v388_v56 = vpack.c.bf16 %v361_v55, %v360_v54  ;;  %v4383_v57 = vld [vmem:[%s6424_s3 + $0x84] sm:$0xf]  ;;  %v3974_v61 = vld [vmem:[%s6424_s3 + $0x190] sm:$0xf0]  ;;  %v4021_v4 = vor.u32 %v4429_v3, %v4020_v2  ;;  %1171 = vmatpush.bf16.msra.mxu2 %v3893_v1  ;;  %v363_v6 = vld [vmem:[%s4828_s28 + $0x58] sm:$0xff] }
  0x27   : > { %599 = vmatpush.bf16.msra.mxu1 %v3721_v29  ;;  %v4415_v59 = vld [vmem:[%s6424_s3 + $0x184] sm:$0xf]  ;;  %v3849_v60 = vor.u32 %v4383_v57, %v3846_v58  ;;  %v362_v5 = vld [vmem:[%s4828_s28 + $0x50] sm:$0xff]  ;;  %v3876_v8 = vld [vmem:[%s6424_s3 + $0xc0] sm:$0xf] }
  0x28   : > { %v3977_v0 = vor.u32 %v4415_v59, %v3974_v61  ;;  %1260 = vmatpush.bf16.msra.mxu3 %v4021_v4  ;;  %v389_v7 = vpack.c.bf16 %v363_v6, %v362_v5  ;;  %v4393_v9 = vld [vmem:[%s6424_s3 + $0xcc] sm:$0xf0]  ;;  %v4004_v10 = vld [vmem:[%s6424_s3 + $0x1c0] sm:$0xf]  ;;  %v365_v27 = vld [vmem:[%s4828_s28 + $0x68] sm:$0xff] }
  0x29   : > { %3746 = vmatmul.msk.bf16.vlgmr.msra.gmra.mxu0 %vm454_vm0, %v384_v32  ;;  %v3877_v11 = vor.u32 %v4393_v9, %v3876_v8  ;;  %v4425_v12 = vld [vmem:[%s6424_s3 + $0x1cc] sm:$0xf0]  ;;  %v3860_v14 = vld [vmem:[%s6424_s3 + $0xa0] sm:$0xf]  ;;  %v4379_v40 = vld [vmem:[%s6424_s3 + $0x64] sm:$0xf] }
  0x2a   : > { %1349 = vmatpush.bf16.msrb.mxu0 %v3897_v30  ;;  %3762 = vmatmul.msk.bf16.vlgmr.msra.gmra.mxu1 %vm454_vm0, %v384_v32  ;;  %v4005_v13 = vor.u32 %v4425_v12, %v4004_v10  ;;  %v4389_v15 = vld [vmem:[%s6424_s3 + $0xac] sm:$0xf0]  ;;  %v3988_v16 = vld [vmem:[%s6424_s3 + $0x1a0] sm:$0xf]  ;;  %v4411_v43 = vld [vmem:[%s6424_s3 + $0x164] sm:$0xf] }
  0x2b   : > { %1438 = vmatpush.bf16.msrb.mxu1 %v4025_v31  ;;  %1172 = vmatpush.bf16.msra.mxu2 %v3877_v11  ;;  %v3861_v17 = vor.u32 %v4389_v15, %v3860_v14  ;;  %v4421_v18 = vld [vmem:[%s6424_s3 + $0x1ac] sm:$0xf0]  ;;  %v3844_v20 = vld [vmem:[%s6424_s3 + $0x80] sm:$0xf]  ;;  %v3958_v45 = vld [vmem:[%s6424_s3 + $0x170] sm:$0xf0] }
  0x2c   : > { %1261 = vmatpush.bf16.msra.mxu3 %v4005_v13  ;;  %v3989_v19 = vor.u32 %v4421_v18, %v3988_v16  ;;  %v4385_v21 = vld [vmem:[%s6424_s3 + $0x8c] sm:$0xf0]  ;;  %v3972_v22 = vld [vmem:[%s6424_s3 + $0x180] sm:$0xf]  ;;  %v3961_v46 = vor.u32 %v4411_v43, %v3958_v45  ;;  %v367_v59 = vld [vmem:[%s4828_s28 + $0x78] sm:$0xff] }
  0x2d   : > { %v4417_v23 = vld [vmem:[%s6424_s3 + $0x18c] sm:$0xf0]  ;;  %v3845_v24 = vor.u32 %v4385_v21, %v3844_v20  ;;  %v364_v26 = vld [vmem:[%s4828_s28 + $0x60] sm:$0xff]  ;;  %v3900_v62 = vld [vmem:[%s6424_s3 + $0xe8] sm:$0xf] }
  0x2e   : > { %1350 = vmatpush.bf16.msrb.mxu0 %v3881_v36  ;;  %v3973_v25 = vor.u32 %v4417_v23, %v3972_v22  ;;  %v3828_v28 = vld [vmem:[%s6424_s3 + $0x60] sm:$0xf]  ;;  %v4381_v29 = vld [vmem:[%s6424_s3 + $0x6c] sm:$0xf0]  ;;  %v390_v31 = vpack.c.bf16 %v365_v27, %v364_v26  ;;  %v4398_v63 = vld [vmem:[%s6424_s3 + $0xf4] sm:$0xf0] }
  0x2f   : > { %1439 = vmatpush.bf16.msrb.mxu1 %v4009_v38  ;;  %1173 = vmatpush.bf16.msra.mxu2 %v3861_v17  ;;  %v3956_v30 = vld [vmem:[%s6424_s3 + $0x160] sm:$0xf]  ;;  %v3829_v32 = vor.u32 %v4381_v29, %v3828_v28  ;;  %v4413_v33 = vld [vmem:[%s6424_s3 + $0x16c] sm:$0xf0]  ;;  %v4028_v1 = vld [vmem:[%s6424_s3 + $0x1e8] sm:$0xf] }
  0x30   : > { %1262 = vmatpush.bf16.msra.mxu3 %v3989_v19  ;;  %v3957_v34 = vor.u32 %v4413_v33, %v3956_v30  ;;  %v3812_v35 = vld [vmem:[%s6424_s3 + $0x40] sm:$0xf]  ;;  %v4377_v36 = vld [vmem:[%s6424_s3 + $0x4c] sm:$0xf0]  ;;  %v4430_v2 = vld [vmem:[%s6424_s3 + $0x1f4] sm:$0xf0] }
  0x31   : > { %v3813_v37 = vor.u32 %v4377_v36, %v3812_v35  ;;  %v3940_v38 = vld [vmem:[%s6424_s3 + $0x140] sm:$0xf]  ;;  %v4409_v39 = vld [vmem:[%s6424_s3 + $0x14c] sm:$0xf0]  ;;  %v4029_v3 = vor.u32 %v4430_v2, %v4028_v1  ;;  %v369_v5 = vld [vmem:[%s4828_s28 + $0x88] sm:$0xff] }
  0x32   : > { %1351 = vmatpush.bf16.msrb.mxu0 %v3865_v48  ;;  %v3941_v42 = vor.u32 %v4409_v39, %v3940_v38  ;;  %v3796_v47 = vld [vmem:[%s6424_s3 + $0x20] sm:$0xf]  ;;  %v4373_v48 = vld [vmem:[%s6424_s3 + $0x2c] sm:$0xf0]  ;;  %v4375_v12 = vld [vmem:[%s6424_s3 + $0x44] sm:$0xf] }
  0x33   : > { %1440 = vmatpush.bf16.msrb.mxu1 %v3993_v50  ;;  %1174 = vmatpush.bf16.msra.mxu2 %v3845_v24  ;;  %v3924_v49 = vld [vmem:[%s6424_s3 + $0x120] sm:$0xf]  ;;  %v3797_v50 = vor.u32 %v4373_v48, %v3796_v47  ;;  %v4405_v51 = vld [vmem:[%s6424_s3 + $0x12c] sm:$0xf0]  ;;  %v3814_v13 = vld [vmem:[%s6424_s3 + $0x50] sm:$0xf0] }
  0x34   : > { %1263 = vmatpush.bf16.msra.mxu3 %v3973_v25  ;;  %v3925_v52 = vor.u32 %v4405_v51, %v3924_v49  ;;  %v4369_v54 = vld [vmem:[%s6424_s3 + $0xc] sm:$0xf0]  ;;  %v3908_v55 = vld [vmem:[%s6424_s3 + $0x100] sm:$0xf]  ;;  %v3817_v14 = vor.u32 %v4375_v12, %v3814_v13  ;;  %v4407_v15 = vld [vmem:[%s6424_s3 + $0x144] sm:$0xf] }
  0x35   : > { %v4401_v57 = vld [vmem:[%s6424_s3 + $0x10c] sm:$0xf0]  ;;  %v368_v4 = vld [vmem:[%s4828_s28 + $0x80] sm:$0xff]  ;;  %v3942_v16 = vld [vmem:[%s6424_s3 + $0x150] sm:$0xf0] }
  0x36   : > { %1352 = vmatpush.bf16.msrb.mxu0 %v3849_v60  ;;  %v366_v58 = vld [vmem:[%s4828_s28 + $0x70] sm:$0xff]  ;;  %v3909_v60 = vor.u32 %v4401_v57, %v3908_v55  ;;  %v392_v6 = vpack.c.bf16 %v369_v5, %v368_v4  ;;  %v3945_v17 = vor.u32 %v4407_v15, %v3942_v16  ;;  %v371_v29 = vld [vmem:[%s4828_s28 + $0x98] sm:$0xff]  ;;  %v4012_v38 = vld [vmem:[%s6424_s3 + $0x1c8] sm:$0xf] }
  0x37   : > { %1441 = vmatpush.bf16.msrb.mxu1 %v3977_v0  ;;  %1175 = vmatpush.bf16.msra.mxu2 %v3829_v32  ;;  %v391_v61 = vpack.c.bf16 %v367_v59, %v366_v58  ;;  %v3901_v0 = vor.u32 %v4398_v63, %v3900_v62  ;;  %v370_v28 = vld [vmem:[%s4828_s28 + $0x90] sm:$0xff]  ;;  %v4394_v35 = vld [vmem:[%s6424_s3 + $0xd4] sm:$0xf0]  ;;  %v372_v51 = vld [vmem:[%s4828_s28 + $0xa0] sm:$0xff] }
  0x38   : > { %1264 = vmatpush.bf16.msra.mxu3 %v3957_v34  ;;  %v393_v32 = vpack.c.bf16 %v371_v29, %v370_v28  ;;  %v3884_v34 = vld [vmem:[%s6424_s3 + $0xc8] sm:$0xf]  ;;  %v4426_v39 = vld [vmem:[%s6424_s3 + $0x1d4] sm:$0xf0]  ;;  %v4371_v58 = vld [vmem:[%s6424_s3 + $0x24] sm:$0xf] }
  0x39   : > { %3747 = vmatmul.msk.bf16.gmra.mxu0 %vm454_vm0, %v385_v41  ;;  %v3798_v59 = vld [vmem:[%s6424_s3 + $0x30] sm:$0xf0]  ;;  %v375_v13 = vld [vmem:[%s4828_s28 + $0xb8] sm:$0xff] }
  0x3a   : > { %3763 = vmatmul.msk.bf16.gmra.mxu1 %vm454_vm0, %v385_v41  ;;  %v3830_v41 = vld [vmem:[%s6424_s3 + $0x70] sm:$0xf0] }
  0x3b   : > { %1176 = vmatpush.bf16.msra.mxu2 %v3813_v37  ;;  %1442 = vmatpush.bf16.msrb.mxu1 %v3961_v46  ;;  %v3885_v37 = vor.u32 %v4394_v35, %v3884_v34  ;;  %v3926_v62 = vld [vmem:[%s6424_s3 + $0x130] sm:$0xf0] }
  0x3c   : > { %1265 = vmatpush.bf16.msra.mxu3 %v3941_v42  ;;  %v374_v12 = vld [vmem:[%s4828_s28 + $0xb0] sm:$0xff] }
  0x3d   : > { %v395_v16 = vpack.c.bf16 %v375_v13, %v374_v12 }
  0x3f   : > { %1177 = vmatpush.bf16.msra.mxu2 %v3797_v50  ;;  %1443 = vmatpush.bf16.msrb.mxu1 %v3945_v17 }
  0x40   : > { %1266 = vmatpush.bf16.msra.mxu3 %v3925_v52  ;;  %v373_v52 = vld [vmem:[%s4828_s28 + $0xa8] sm:$0xff] }
  0x41   : > { %v394_v55 = vpack.c.bf16 %v373_v52, %v372_v51 }
  0x44   : > { %1267 = vmatpush.bf16.msra.mxu3 %v3909_v60  ;;  %v3801_v60 = vor.u32 %v4371_v58, %v3798_v59 }
  0x48   : > { %1616 = vmatpush.bf16.msrb.mxu3 %v4029_v3 }
  0x49   : > { %3748 = vmatmul.msk.bf16.gmra.mxu0 %vm454_vm0, %v386_v44 }
  0x4a   : > { %3764 = vmatmul.msk.bf16.gmra.mxu1 %vm454_vm0, %v386_v44  ;;  %v3833_v44 = vor.u32 %v4379_v40, %v3830_v41  ;;  %v4013_v40 = vor.u32 %v4426_v39, %v4012_v38  ;;  %v377_v38 = vld [vmem:[%s4828_s28 + $0xc8] sm:$0xff] }
  0x4c   : > { %1353 = vmatpush.bf16.msrb.mxu0 %v3833_v44  ;;  %1617 = vmatpush.bf16.msrb.mxu3 %v4013_v40 }
  0x50   : > { %1354 = vmatpush.bf16.msrb.mxu0 %v3817_v14 }
  0x54   : > { %1355 = vmatpush.bf16.msrb.mxu0 %v3801_v60 }
  0x59   : > { %3749 = vmatmul.msk.bf16.gmra.mxu0 %vm454_vm0, %v387_v53 }
  0x5a   : > { %3765 = vmatmul.msk.bf16.gmra.mxu1 %vm454_vm0, %v387_v53  ;;  %v3780_v53 = vld [vmem:[%s6424_s3] sm:$0xf] }
  0x69   : > { %3750 = vmatmul.msk.bf16.gmra.mxu0 %vm454_vm0, %v388_v56 }
  0x6a   : > { %3766 = vmatmul.msk.bf16.gmra.mxu1 %vm454_vm0, %v388_v56  ;;  %v3781_v56 = vor.u32 %v4369_v54, %v3780_v53 }
  0x6c   : > { %1178 = vmatpush.bf16.msra.mxu2 %v3781_v56 }
  0x70   : > { %1527 = vmatpush.bf16.msrb.mxu2 %v3901_v0 }
  0x74   : > { %1528 = vmatpush.bf16.msrb.mxu2 %v3885_v37  ;;  %v376_v37 = vld [vmem:[%s4828_s28 + $0xc0] sm:$0xff] }
  0x79   : > { %3751 = vmatmul.msk.bf16.gmra.mxu0 %vm454_vm0, %v389_v7 }
  0x7a   : > { %3767 = vmatmul.msk.bf16.gmra.mxu1 %vm454_vm0, %v389_v7  ;;  %v408_v7 = vld [vmem:[%s6423_s2] sm:$0x3] }
  0x7b   : > { %v5038_v10 = vperm.slane %v408_v7, 0  ;;  %v5041_v11 = vperm.slane %v408_v7, 1 }
  0x89   : > { %3752 = vmatmul.msk.bf16.gmra.mxu0 %vm454_vm0, %v390_v31 }
  0x8a   : > { %3768 = vmatmul.msk.bf16.gmra.mxu1 %vm454_vm0, %v390_v31 }
  0x99   : > { %3753 = vmatmul.msk.bf16.gmra.mxu0 %vm454_vm0, %v391_v61 }
  0x9a   : > { %3769 = vmatmul.msk.bf16.gmra.mxu1 %vm454_vm0, %v391_v61  ;;  %v4403_v61 = vld [vmem:[%s6424_s3 + $0x124] sm:$0xf] }
  0x9b   : > { %v3929_v63 = vor.u32 %v4403_v61, %v3926_v62  ;;  %v378_v62 = vld [vmem:[%s4828_s28 + $0xd0] sm:$0xff] }
  0x9d   : > { %1444 = vmatpush.bf16.msrb.mxu1 %v3929_v63  ;;  %v379_v63 = vld [vmem:[%s4828_s28 + $0xd8] sm:$0xff] }
  0xa6   : > { %v512_v8 = vpop.f32.mrf.mxu0 }
  0xa7   : > { %v601_v9 = vpop.f32.mrf.mxu1  ;;  %v513_v18 = vadd.f32 %v512_v8, %v5038_v10 }
  0xa8   : > { %v602_v19 = vadd.f32 %v601_v9, %v5041_v11 }
  0xa9   : > { %3754 = vmatmul.msk.bf16.gmra.mxu0 %vm454_vm0, %v392_v6  ;;  %v681_v24 = vmax.f32 %v513_v18, 0.0  ;;  %v3868_v18 = vld [vmem:[%s6424_s3 + $0xa8] sm:$0xf] }
  0xaa   : > { %3770 = vmatmul.msk.bf16.gmra.mxu1 %vm454_vm0, %v392_v6  ;;  %v682_v26 = vmax.f32 %v602_v19, 0.0  ;;  %v4390_v19 = vld [vmem:[%s6424_s3 + $0xb4] sm:$0xf0] }
  0xae   : > { %v514_v20 = vpop.f32.mrf.mxu0 }
  0xaf   : > { %v515_v21 = vadd.f32 %v514_v20, %v5038_v10  ;;  %v603_v22 = vpop.f32.mrf.mxu1 }
  0xb0   : > { %v604_v23 = vadd.f32 %v603_v22, %v5041_v11  ;;  %v3996_v22 = vld [vmem:[%s6424_s3 + $0x1a8] sm:$0xf] }
  0xb1   : > { %v683_v25 = vmax.f32 %v515_v21, 0.0  ;;  %v3869_v21 = vor.u32 %v4390_v19, %v3868_v18 }
  0xb2   : > { %v684_v27 = vmax.f32 %v604_v23, 0.0  ;;  %v4422_v23 = vld [vmem:[%s6424_s3 + $0x1b4] sm:$0xf0] }
  0xb3   : > { %v5062_v30 = vpack.c.bf16 %v683_v25, %v681_v24  ;;  %1529 = vmatpush.bf16.msrb.mxu2 %v3869_v21  ;;  %v3997_v24 = vor.u32 %v4422_v23, %v3996_v22 }
  0xb4   : > { %v5064_v31 = vpack.c.bf16 %v684_v27, %v682_v26 }
  0xb5   : > { %1179 = vmatmul.bf16.vlgmr.msra.gmra.mxu2 %v5062_v30  ;;  %1618 = vmatpush.bf16.msrb.mxu3 %v3997_v24 }
  0xb6   : > { %1268 = vmatmul.bf16.vlgmr.msra.gmra.mxu3 %v5064_v31  ;;  %v517_v33 = vpop.f32.mrf.mxu0 }
  0xb7   : > { %v606_v36 = vpop.f32.mrf.mxu1  ;;  %v518_v41 = vadd.f32 %v517_v33, %v5038_v10 }
  0xb8   : > { %v607_v42 = vadd.f32 %v606_v36, %v5041_v11 }
  0xb9   : > { %3755 = vmatmul.msk.bf16.gmra.mxu0 %vm454_vm0, %v393_v32  ;;  %v685_v47 = vmax.f32 %v518_v41, 0.0  ;;  %v396_v41 = vpack.c.bf16 %v377_v38, %v376_v37  ;;  %v4428_v37 = vld [vmem:[%s6424_s3 + $0x1ec] sm:$0xf]  ;;  %v4030_v38 = vld [vmem:[%s6424_s3 + $0x1f8] sm:$0xf0] }
  0xba   : > { %3771 = vmatmul.msk.bf16.gmra.mxu1 %vm454_vm0, %v393_v32  ;;  %v686_v49 = vmax.f32 %v607_v42, 0.0 }
  0xbe   : > { %v519_v43 = vpop.f32.mrf.mxu0 }
  0xbf   : > { %v520_v44 = vadd.f32 %v519_v43, %v5038_v10  ;;  %v608_v45 = vpop.f32.mrf.mxu1 }
  0xc0   : > { %v609_v46 = vadd.f32 %v608_v45, %v5041_v11  ;;  %v3782_v45 = vld [vmem:[%s6424_s3 + $0x10] sm:$0xf0] }
  0xc1   : > { %v687_v48 = vmax.f32 %v520_v44, 0.0  ;;  %v4367_v44 = vld [vmem:[%s6424_s3 + $0x4] sm:$0xf] }
  0xc2   : > { %v688_v50 = vmax.f32 %v609_v46, 0.0  ;;  %v3785_v46 = vor.u32 %v4367_v44, %v3782_v45 }
  0xc3   : > { %v5088_v53 = vpack.c.bf16 %v687_v48, %v685_v47  ;;  %v4399_v47 = vld [vmem:[%s6424_s3 + $0x104] sm:$0xf]  ;;  %v3910_v48 = vld [vmem:[%s6424_s3 + $0x110] sm:$0xf0] }
  0xc4   : > { %v5090_v54 = vpack.c.bf16 %v688_v50, %v686_v49  ;;  %v3913_v49 = vor.u32 %v4399_v47, %v3910_v48  ;;  %1356 = vmatpush.bf16.msrb.mxu0 %v3785_v46 }
  0xc5   : > { %1184 = vmatmul.bf16.gmra.mxu2 %v5088_v53 }
  0xc6   : > { %1273 = vmatmul.bf16.gmra.mxu3 %v5090_v54  ;;  %v522_v56 = vpop.f32.mrf.mxu0  ;;  %1445 = vmatpush.bf16.msrb.mxu1 %v3913_v49 }
  0xc7   : > { %v611_v57 = vpop.f32.mrf.mxu1  ;;  %v523_v0 = vadd.f32 %v522_v56, %v5038_v10 }
  0xc8   : > { %v612_v1 = vadd.f32 %v611_v57, %v5041_v11 }
  0xc9   : > { %3756 = vmatmul.msk.bf16.gmra.mxu0 %vm454_vm0, %v394_v55  ;;  %v689_v6 = vmax.f32 %v523_v0, 0.0 }
  0xca   : > { %3772 = vmatmul.msk.bf16.gmra.mxu1 %vm454_vm0, %v394_v55  ;;  %v690_v8 = vmax.f32 %v612_v1, 0.0 }
  0xce   : > { %v524_v2 = vpop.f32.mrf.mxu0 }
  0xcf   : > { %v525_v3 = vadd.f32 %v524_v2, %v5038_v10  ;;  %v613_v4 = vpop.f32.mrf.mxu1  ;;  %v397_v2 = vpack.c.bf16 %v379_v63, %v378_v62 }
  0xd0   : > { %v614_v5 = vadd.f32 %v613_v4, %v5041_v11  ;;  %v3852_v4 = vld [vmem:[%s6424_s3 + $0x88] sm:$0xf] }
  0xd1   : > { %v691_v7 = vmax.f32 %v525_v3, 0.0 }
  0xd2   : > { %v692_v9 = vmax.f32 %v614_v5, 0.0  ;;  %v4386_v5 = vld [vmem:[%s6424_s3 + $0x94] sm:$0xf0] }
  0xd3   : > { %v5114_v14 = vpack.c.bf16 %v691_v7, %v689_v6  ;;  %v3853_v7 = vor.u32 %v4386_v5, %v3852_v4 }
  0xd4   : > { %v5116_v15 = vpack.c.bf16 %v692_v9, %v690_v8  ;;  %v3980_v8 = vld [vmem:[%s6424_s3 + $0x188] sm:$0xf]  ;;  %v4418_v9 = vld [vmem:[%s6424_s3 + $0x194] sm:$0xf0] }
  0xd5   : > { %1189 = vmatmul.bf16.gmra.mxu2 %v5114_v14  ;;  %v3981_v12 = vor.u32 %v4418_v9, %v3980_v8 }
  0xd6   : > { %1278 = vmatmul.bf16.gmra.mxu3 %v5116_v15  ;;  %v527_v17 = vpop.f32.mrf.mxu0  ;;  %1530 = vmatpush.bf16.msrb.mxu2 %v3853_v7 }
  0xd7   : > { %v616_v20 = vpop.f32.mrf.mxu1  ;;  %v528_v25 = vadd.f32 %v527_v17, %v5038_v10  ;;  %1619 = vmatpush.bf16.msrb.mxu3 %v3981_v12 }
  0xd8   : > { %v617_v26 = vadd.f32 %v616_v20, %v5041_v11 }
  0xd9   : > { %3757 = vmatmul.msk.bf16.gmra.mxu0 %vm454_vm0, %v395_v16  ;;  %v693_v33 = vmax.f32 %v528_v25, 0.0  ;;  %v380_v25 = vld [vmem:[%s4828_s28 + $0xe0] sm:$0xff] }
  0xda   : > { %3773 = vmatmul.msk.bf16.gmra.mxu1 %vm454_vm0, %v395_v16  ;;  %v694_v35 = vmax.f32 %v617_v26, 0.0  ;;  %v381_v26 = vld [vmem:[%s4828_s28 + $0xe8] sm:$0xff] }
  0xde   : > { %v529_v27 = vpop.f32.mrf.mxu0 }
  0xdf   : > { %v530_v28 = vadd.f32 %v529_v27, %v5038_v10  ;;  %v618_v29 = vpop.f32.mrf.mxu1 }
  0xe0   : > { %v619_v32 = vadd.f32 %v618_v29, %v5041_v11  ;;  %v398_v29 = vpack.c.bf16 %v381_v26, %v380_v25  ;;  %v3886_v25 = vld [vmem:[%s6424_s3 + $0xd8] sm:$0xf0]  ;;  %v4424_v26 = vld [vmem:[%s6424_s3 + $0x1cc] sm:$0xf] }
  0xe1   : > { %v695_v34 = vmax.f32 %v530_v28, 0.0 }
  0xe2   : > { %v696_v36 = vmax.f32 %v619_v32, 0.0 }
  0xe3   : > { %v5140_v39 = vpack.c.bf16 %v695_v34, %v693_v33  ;;  %v4396_v34 = vld [vmem:[%s6424_s3 + $0xec] sm:$0xf] }
  0xe4   : > { %v5142_v40 = vpack.c.bf16 %v696_v36, %v694_v35  ;;  %v3902_v35 = vld [vmem:[%s6424_s3 + $0xf8] sm:$0xf0] }
  0xe5   : > { %1194 = vmatmul.bf16.gmra.mxu2 %v5140_v39  ;;  %v3905_v36 = vor.u32 %v4396_v34, %v3902_v35  ;;  %v4014_v34 = vld [vmem:[%s6424_s3 + $0x1d8] sm:$0xf0] }
  0xe6   : > { %1283 = vmatmul.bf16.gmra.mxu3 %v5142_v40  ;;  %v532_v42 = vpop.f32.mrf.mxu0 }
  0xe7   : > { %v621_v43 = vpop.f32.mrf.mxu1  ;;  %v533_v50 = vadd.f32 %v532_v42, %v5038_v10  ;;  %1705 = vmatpush.bf16.msra.mxu0 %v3905_v36 }
  0xe8   : > { %v622_v51 = vadd.f32 %v621_v43, %v5041_v11 }
  0xe9   : > { %3758 = vmatmul.msk.bf16.gmra.mxu0 %vm454_vm0, %v396_v41  ;;  %v697_v58 = vmax.f32 %v533_v50, 0.0 }
  0xea   : > { %3774 = vmatmul.msk.bf16.gmra.mxu1 %vm454_vm0, %v396_v41  ;;  %v698_v60 = vmax.f32 %v622_v51, 0.0  ;;  %v4033_v41 = vor.u32 %v4428_v37, %v4030_v38  ;;  %v4017_v37 = vor.u32 %v4424_v26, %v4014_v34 }
  0xec   : > { %1794 = vmatpush.bf16.msra.mxu1 %v4033_v41 }
  0xee   : > { %v534_v52 = vpop.f32.mrf.mxu0 }
  0xef   : > { %v535_v55 = vadd.f32 %v534_v52, %v5038_v10  ;;  %v623_v56 = vpop.f32.mrf.mxu1  ;;  %v382_v52 = vld [vmem:[%s4828_s28 + $0xf0] sm:$0xff] }
  0xf0   : > { %v624_v57 = vadd.f32 %v623_v56, %v5041_v11  ;;  %1795 = vmatpush.bf16.msra.mxu1 %v4017_v37 }
  0xf1   : > { %v699_v59 = vmax.f32 %v535_v55, 0.0  ;;  %v383_v55 = vld [vmem:[%s4828_s28 + $0xf8] sm:$0xff]  ;;  %s3630_s28 = sshll.u32 %s3627_s26, 4  ;;  %s3631_s28 = int_to_ptr.hbm [resolvable:$true] %s3630_s28 }
  0xf2   : > { %v700_v61 = vmax.f32 %v624_v57, 0.0  ;;  %s4612_s29 = sshra.s32 %s3631_s28, 4  ;;  %s4613_s29 = int_to_ptr.hbm [resolvable:$true] %s4612_s29 }
  0xf3   : > { %v5166_v0 = vpack.c.bf16 %v699_v59, %v697_v58  ;;  %v399_v58 = vpack.c.bf16 %v383_v55, %v382_v52  ;;  %s4614_s17 = scalar_lea.hbm %s4613_s29, 256  ;;  %p4619_p3 = scmp.lt.s32.totalorder %s4613_s29, %s6430_s9 }
  0xf4   : > { %v5168_v1 = vpack.c.bf16 %v700_v61, %v698_v60  ;;  %v3836_v60 = vld [vmem:[%s6424_s3 + $0x68] sm:$0xf]  ;;  %v4382_v61 = vld [vmem:[%s6424_s3 + $0x74] sm:$0xf0]  ;;  %p4615_p0 = scmp.ne.s32.totalorder %s4613_s29, %s4614_s17  ;;  %p4620_p4 = scmp.lt.s32.totalorder %s4618_s24, %s4614_s17 }
  0xf5   : > { %1199 = vmatmul.bf16.gmra.mxu2 %v5166_v0  ;;  %v3837_v63 = vor.u32 %v4382_v61, %v3836_v60  ;;  %v3948_v61 = vld [vmem:[%s6424_s3 + $0x148] sm:$0xf] }
  0xf6   : > { %1288 = vmatmul.bf16.gmra.mxu3 %v5168_v1  ;;  %v537_v3 = vpop.f32.mrf.mxu0  ;;  %p4616_p1 = pnand %p4615_p0, %p4759_p5  ;;  %p4621_p7 = por %p4620_p4, %p4619_p3 }
  0xf7   : > { %v626_v6 = vpop.f32.mrf.mxu1  ;;  %v538_v13 = vadd.f32 %v537_v3, %v5038_v10  ;;  %1531 = vmatpush.bf16.msrb.mxu2 %v3837_v63  ;;  %v4414_v3 = vld [vmem:[%s6424_s3 + $0x174] sm:$0xf0] }
  0xf8   : > { %v627_v16 = vadd.f32 %v626_v6, %v5041_v11  ;;  %p4617_p2 = pneg %p4616_p1 }
  0xf9   : > { %3759 = vmatmul.msk.bf16.gmra.mxu0 %vm454_vm0, %v397_v2  ;;  %v701_v21 = vmax.f32 %v538_v13, 0.0 }
  0xfa   : > { %3775 = vmatmul.msk.bf16.gmra.mxu1 %vm454_vm0, %v397_v2  ;;  %v702_v23 = vmax.f32 %v627_v16, 0.0  ;;  %v3964_v2 = vld [vmem:[%s6424_s3 + $0x168] sm:$0xf]  ;;  %p4622_p8 = pnand %p4621_p7, %p4617_p2 }
  0xfb   : > { %v3965_v4 = vor.u32 %v4414_v3, %v3964_v2 }
  0xfd   : > { %1620 = vmatpush.bf16.msrb.mxu3 %v3965_v4 }
  0xfe   : > { %v539_v17 = vpop.f32.mrf.mxu0 }
  0xff   : > { %v540_v18 = vadd.f32 %v539_v17, %v5038_v10  ;;  %v628_v19 = vpop.f32.mrf.mxu1 }
 0x100   : > { %v629_v20 = vadd.f32 %v628_v19, %v5041_v11 }
 0x101   : > { %v703_v22 = vmax.f32 %v540_v18, 0.0 }
 0x102   : > { %v704_v24 = vmax.f32 %v629_v20, 0.0 }
 0x103   : > { %v5192_v27 = vpack.c.bf16 %v703_v22, %v701_v21 }
 0x104   : > { %v5194_v28 = vpack.c.bf16 %v704_v24, %v702_v23  ;;  %v4392_v24 = vld [vmem:[%s6424_s3 + $0xcc] sm:$0xf] }
 0x105   : > { %1204 = vmatmul.bf16.gmra.mxu2 %v5192_v27 }
 0x106   : > { %1293 = vmatmul.bf16.gmra.mxu3 %v5194_v28  ;;  %v542_v32 = vpop.f32.mrf.mxu0 }
 0x107   : > { %v631_v33 = vpop.f32.mrf.mxu1  ;;  %v543_v42 = vadd.f32 %v542_v32, %v5038_v10 }
 0x108   : > { %v632_v43 = vadd.f32 %v631_v33, %v5041_v11  ;;  %v3889_v33 = vor.u32 %v4392_v24, %v3886_v25 }
 0x109   : > { %3760 = vmatmul.msk.bf16.gmra.mxu0 %vm454_vm0, %v398_v29  ;;  %v705_v48 = vmax.f32 %v543_v42, 0.0 }
 0x10a   : > { %3776 = vmatmul.msk.bf16.gmra.mxu1 %vm454_vm0, %v398_v29  ;;  %v706_v50 = vmax.f32 %v632_v43, 0.0  ;;  %1706 = vmatpush.bf16.msra.mxu0 %v3889_v33 }
 0x10e   : > { %v544_v44 = vpop.f32.mrf.mxu0 }
 0x10f   : > { %v545_v45 = vadd.f32 %v544_v44, %v5038_v10  ;;  %v633_v46 = vpop.f32.mrf.mxu1 }
 0x110   : > { %v634_v47 = vadd.f32 %v633_v46, %v5041_v11 }
 0x111   : > { %v707_v49 = vmax.f32 %v545_v45, 0.0  ;;  %v5269_v45 = vld [vmem:[%s6425_s4] sm:$0xf] }
 0x112   : > { %v708_v51 = vmax.f32 %v634_v47, 0.0 }
 0x113   : > { %v5218_v56 = vpack.c.bf16 %v707_v49, %v705_v48  ;;  %v5277_v48 = vperm.slane %v5269_v45, 0 }
 0x114   : > { %v5220_v57 = vpack.c.bf16 %v708_v51, %v706_v50  ;;  %v3820_v50 = vld [vmem:[%s6424_s3 + $0x48] sm:$0xf]  ;;  %v4378_v51 = vld [vmem:[%s6424_s3 + $0x54] sm:$0xf0] }
 0x115   : > { %1209 = vmatmul.bf16.gmra.mxu2 %v5218_v56  ;;  %v3821_v55 = vor.u32 %v4378_v51, %v3820_v50  ;;  %v4420_v50 = vld [vmem:[%s6424_s3 + $0x1ac] sm:$0xf]  ;;  %v3998_v51 = vld [vmem:[%s6424_s3 + $0x1b8] sm:$0xf0] }
 0x116   : > { %1298 = vmatmul.bf16.gmra.mxu3 %v5220_v57  ;;  %v547_v59 = vpop.f32.mrf.mxu0 }
 0x117   : > { %v636_v62 = vpop.f32.mrf.mxu1  ;;  %v548_v5 = vadd.f32 %v547_v59, %v5038_v10  ;;  %1532 = vmatpush.bf16.msrb.mxu2 %v3821_v55 }
 0x118   : > { %v637_v6 = vadd.f32 %v636_v62, %v5041_v11  ;;  %v4410_v62 = vld [vmem:[%s6424_s3 + $0x154] sm:$0xf0] }
 0x119   : > { %3761 = vmatmul.msk.bf16.gmra.mxu0 %vm454_vm0, %v399_v58  ;;  %v709_v13 = vmax.f32 %v548_v5, 0.0  ;;  %v3949_v2 = vor.u32 %v4410_v62, %v3948_v61 }
 0x11a   : > { %3777 = vmatmul.msk.bf16.gmra.mxu1 %vm454_vm0, %v399_v58  ;;  %v710_v17 = vmax.f32 %v637_v6, 0.0 }
 0x11b   : > { %1621 = vmatpush.bf16.msrb.mxu3 %v3949_v2 }
 0x11e   : > { %v549_v7 = vpop.f32.mrf.mxu0 }
 0x11f   : > { %v550_v8 = vadd.f32 %v549_v7, %v5038_v10  ;;  %v638_v9 = vpop.f32.mrf.mxu1 }
 0x120   : > { %v639_v12 = vadd.f32 %v638_v9, %v5041_v11 }
 0x121   : > { %v711_v16 = vmax.f32 %v550_v8, 0.0 }
 0x122   : > { %v712_v18 = vmax.f32 %v639_v12, 0.0 }
 0x123   : > { %v5242_v19 = vpack.c.bf16 %v711_v16, %v709_v13 }
 0x124   : > { %v5244_v20 = vpack.c.bf16 %v712_v18, %v710_v17 }
 0x125   : > { %1214 = vmatmul.bf16.gmra.mxu2 %v5242_v19 }
 0x126   : > { %1303 = vmatmul.bf16.gmra.mxu3 %v5244_v20  ;;  %v552_v21 = vpop.f32.mrf.mxu0 }
 0x127   : > { %v641_v22 = vpop.f32.mrf.mxu1  ;;  %v553_v23 = vadd.f32 %v552_v21, %v5038_v10 }
 0x128   : > { %v642_v29 = vadd.f32 %v641_v22, %v5041_v11 }
 0x129   : > { %1357 = vmatmul.bf16.vlgmr.msrb.gmra.mxu0 %v5062_v30  ;;  %v713_v41 = vmax.f32 %v553_v23, 0.0 }
 0x12a   : > { %1446 = vmatmul.bf16.vlgmr.msrb.gmra.mxu1 %v5064_v31  ;;  %v714_v43 = vmax.f32 %v642_v29, 0.0 }
 0x12e   : > { %v554_v32 = vpop.f32.mrf.mxu0 }
 0x12f   : > { %v555_v35 = vadd.f32 %v554_v32, %v5038_v10  ;;  %v643_v36 = vpop.f32.mrf.mxu1 }
 0x130   : > { %v644_v38 = vadd.f32 %v643_v36, %v5041_v11 }
 0x131   : > { %v715_v42 = vmax.f32 %v555_v35, 0.0 }
 0x132   : > { %v716_v44 = vmax.f32 %v644_v38, 0.0 }
 0x133   : > { %v5271_v46 = vpack.c.bf16 %v715_v42, %v713_v41  ;;  %v4388_v41 = vld [vmem:[%s6424_s3 + $0xac] sm:$0xf]  ;;  %v3870_v42 = vld [vmem:[%s6424_s3 + $0xb8] sm:$0xf0] }
 0x134   : > { %v5273_v47 = vpack.c.bf16 %v716_v44, %v714_v43 }
 0x135   : > { %1219 = vmatmul.bf16.gmra.mxu2 %v5271_v46 }
 0x136   : > { %1308 = vmatmul.bf16.gmra.mxu3 %v5273_v47  ;;  %v557_v49 = vpop.f32.mrf.mxu0 }
 0x137   : > { %v646_v52 = vpop.f32.mrf.mxu1  ;;  %v558_v3 = vadd.f32 %v557_v49, %v5038_v10  ;;  %v3873_v49 = vor.u32 %v4388_v41, %v3870_v42 }
 0x138   : > { %v1180_v58 = vpop.f32.mrf.mxu2  ;;  %v647_v4 = vadd.f32 %v646_v52, %v5041_v11 }
 0x139   : > { %v1181_v59 = vadd.f32 %v1180_v58, %v5277_v48  ;;  %v1269_v60 = vpop.f32.mrf.mxu3  ;;  %1362 = vmatmul.bf16.gmra.mxu0 %v5088_v53  ;;  %v717_v12 = vmax.f32 %v558_v3, 0.0  ;;  %v4001_v58 = vor.u32 %v4420_v50, %v3998_v51 }
 0x13a   : > { %1451 = vmatmul.bf16.gmra.mxu1 %v5090_v54  ;;  %v718_v18 = vmax.f32 %v647_v4, 0.0  ;;  %1707 = vmatpush.bf16.msra.mxu0 %v3873_v49 }
 0x13b   : > { %v1270_v63 = vadd.f32 %v1269_v60, %v1181_v59  ;;  %1796 = vmatpush.bf16.msra.mxu1 %v4001_v58 }
 0x13d   : > { %v1883_v25 = vmax.f32 %v1270_v63, 0.0 }
 0x13e   : > { %v559_v5 = vpop.f32.mrf.mxu0 }
 0x13f   : > { %v560_v6 = vadd.f32 %v559_v5, %v5038_v10  ;;  %v648_v7 = vpop.f32.mrf.mxu1 }
 0x140   : > { %v649_v8 = vadd.f32 %v648_v7, %v5041_v11  ;;  %v1182_v9 = vpop.f32.mrf.mxu2 }
 0x141   : > { %v719_v13 = vmax.f32 %v560_v6, 0.0  ;;  %v1183_v16 = vadd.f32 %v1182_v9, %v5277_v48  ;;  %v1271_v17 = vpop.f32.mrf.mxu3 }
 0x142   : > { %v720_v21 = vmax.f32 %v649_v8, 0.0 }
 0x143   : > { %v5300_v22 = vpack.c.bf16 %v719_v13, %v717_v12  ;;  %v1272_v23 = vadd.f32 %v1271_v17, %v1183_v16  ;;  %v3804_v13 = vld [vmem:[%s6424_s3 + $0x28] sm:$0xf]  ;;  %v4374_v16 = vld [vmem:[%s6424_s3 + $0x34] sm:$0xf0] }
 0x144   : > { %v5302_v24 = vpack.c.bf16 %v720_v21, %v718_v18  ;;  %v3805_v18 = vor.u32 %v4374_v16, %v3804_v13  ;;  %v4384_v16 = vld [vmem:[%s6424_s3 + $0x8c] sm:$0xf] }
 0x145   : > { %v1887_v26 = vmax.f32 %v1272_v23, 0.0  ;;  %1224 = vmatmul.bf16.gmra.mxu2 %v5300_v22 }
 0x146   : > { %1313 = vmatmul.bf16.gmra.mxu3 %v5302_v24  ;;  %v562_v29 = vpop.f32.mrf.mxu0  ;;  %1533 = vmatpush.bf16.msrb.mxu2 %v3805_v18 }
 0x147   : > { %v5306_v32 = vpack.c.bf16 %v1887_v26, %v1883_v25  ;;  %v651_v33 = vpop.f32.mrf.mxu1  ;;  %v563_v38 = vadd.f32 %v562_v29, %v5038_v10  ;;  %v3932_v29 = vld [vmem:[%s6424_s3 + $0x128] sm:$0xf] }
 0x148   : > { %v1185_v34 = vpop.f32.mrf.mxu2  ;;  %v652_v43 = vadd.f32 %v651_v33, %v5041_v11  ;;  %v4406_v33 = vld [vmem:[%s6424_s3 + $0x134] sm:$0xf0] }
 0x149   : > { %v1186_v35 = vadd.f32 %v1185_v34, %v5277_v48  ;;  %v1274_v36 = vpop.f32.mrf.mxu3  ;;  %1367 = vmatmul.bf16.gmra.mxu0 %v5114_v14  ;;  %v721_v61 = vmax.f32 %v563_v38, 0.0 }
 0x14a   : > { %1456 = vmatmul.bf16.gmra.mxu1 %v5116_v15  ;;  %v722_v3 = vmax.f32 %v652_v43, 0.0 }
 0x14b   : > { %v1275_v37 = vadd.f32 %v1274_v36, %v1186_v35  ;;  %v3933_v35 = vor.u32 %v4406_v33, %v3932_v29  ;;  %v3982_v29 = vld [vmem:[%s6424_s3 + $0x198] sm:$0xf0] }
 0x14d   : > { %v1891_v8 = vmax.f32 %v1275_v37, 0.0  ;;  %1622 = vmatpush.bf16.msrb.mxu3 %v3933_v35 }
 0x14e   : > { %v564_v44 = vpop.f32.mrf.mxu0 }
 0x14f   : > { %v565_v52 = vadd.f32 %v564_v44, %v5038_v10  ;;  %v653_v55 = vpop.f32.mrf.mxu1 }
 0x150   : > { %v654_v59 = vadd.f32 %v653_v55, %v5041_v11  ;;  %v1187_v60 = vpop.f32.mrf.mxu2 }
 0x151   : > { %v723_v62 = vmax.f32 %v565_v52, 0.0  ;;  %v1188_v63 = vadd.f32 %v1187_v60, %v5277_v48  ;;  %v1276_v2 = vpop.f32.mrf.mxu3 }
 0x152   : > { %v724_v4 = vmax.f32 %v654_v59, 0.0 }
 0x153   : > { %v5328_v5 = vpack.c.bf16 %v723_v62, %v721_v61  ;;  %v1277_v6 = vadd.f32 %v1276_v2, %v1188_v63 }
 0x154   : > { %v5330_v7 = vpack.c.bf16 %v724_v4, %v722_v3 }
 0x155   : > { %v1895_v9 = vmax.f32 %v1277_v6, 0.0  ;;  %1229 = vmatmul.bf16.gmra.mxu2 %v5328_v5 }
 0x156   : > { %1318 = vmatmul.bf16.gmra.mxu3 %v5330_v7  ;;  %v567_v12 = vpop.f32.mrf.mxu0 }
 0x157   : > { %v656_v17 = vpop.f32.mrf.mxu1  ;;  %v5340_v21 = vpack.c.bf16 %v1895_v9, %v1891_v8  ;;  %v568_v36 = vadd.f32 %v567_v12, %v5038_v10 }
 0x158   : > { %v1190_v23 = vpop.f32.mrf.mxu2  ;;  %v657_v37 = vadd.f32 %v656_v17, %v5041_v11  ;;  %v3854_v17 = vld [vmem:[%s6424_s3 + $0x98] sm:$0xf0] }
 0x159   : > { %v1191_v25 = vadd.f32 %v1190_v23, %v5277_v48  ;;  %v1279_v26 = vpop.f32.mrf.mxu3  ;;  %1372 = vmatmul.bf16.gmra.mxu0 %v5140_v39  ;;  %v725_v49 = vmax.f32 %v568_v36, 0.0 }
 0x15a   : > { %1461 = vmatmul.bf16.gmra.mxu1 %v5142_v40  ;;  %v726_v55 = vmax.f32 %v657_v37, 0.0 }
 0x15b   : > { %v1280_v34 = vadd.f32 %v1279_v26, %v1191_v25  ;;  %v3857_v25 = vor.u32 %v4384_v16, %v3854_v17  ;;  %v4416_v26 = vld [vmem:[%s6424_s3 + $0x18c] sm:$0xf]  ;;  %v4402_v16 = vld [vmem:[%s6424_s3 + $0x114] sm:$0xf0] }
 0x15c   : > { %v3985_v35 = vor.u32 %v4416_v26, %v3982_v29 }
 0x15d   : > { %v1899_v62 = vmax.f32 %v1280_v34, 0.0  ;;  %1708 = vmatpush.bf16.msra.mxu0 %v3857_v25 }
 0x15e   : > { %v569_v38 = vpop.f32.mrf.mxu0  ;;  %1797 = vmatpush.bf16.msra.mxu1 %v3985_v35 }
 0x15f   : > { %v570_v41 = vadd.f32 %v569_v38, %v5038_v10  ;;  %v658_v42 = vpop.f32.mrf.mxu1 }
 0x160   : > { %v659_v43 = vadd.f32 %v658_v42, %v5041_v11  ;;  %v1192_v44 = vpop.f32.mrf.mxu2 }
 0x161   : > { %v727_v50 = vmax.f32 %v570_v41, 0.0  ;;  %v1193_v51 = vadd.f32 %v1192_v44, %v5277_v48  ;;  %v1281_v52 = vpop.f32.mrf.mxu3 }
 0x162   : > { %v728_v58 = vmax.f32 %v659_v43, 0.0 }
 0x163   : > { %v5356_v59 = vpack.c.bf16 %v727_v50, %v725_v49  ;;  %v1282_v60 = vadd.f32 %v1281_v52, %v1193_v51 }
 0x164   : > { %v5358_v61 = vpack.c.bf16 %v728_v58, %v726_v55 }
 0x165   : > { %v1903_v63 = vmax.f32 %v1282_v60, 0.0  ;;  %1234 = vmatmul.bf16.gmra.mxu2 %v5356_v59 }
 0x166   : > { %1323 = vmatmul.bf16.gmra.mxu3 %v5358_v61  ;;  %v572_v2 = vpop.f32.mrf.mxu0 }
 0x167   : > { %v661_v3 = vpop.f32.mrf.mxu1  ;;  %v5362_v4 = vpack.c.bf16 %v1903_v63, %v1899_v62  ;;  %v573_v13 = vadd.f32 %v572_v2, %v5038_v10  ;;  %v3788_v62 = vld [vmem:[%s6424_s3 + $0x8] sm:$0xf]  ;;  %v4370_v63 = vld [vmem:[%s6424_s3 + $0x14] sm:$0xf0] }
 0x168   : > { %v1195_v6 = vpop.f32.mrf.mxu2  ;;  %v662_v18 = vadd.f32 %v661_v3, %v5041_v11  ;;  %v3789_v3 = vor.u32 %v4370_v63, %v3788_v62 }
 0x169   : > { %v1196_v8 = vadd.f32 %v1195_v6, %v5277_v48  ;;  %v1284_v9 = vpop.f32.mrf.mxu3  ;;  %1377 = vmatmul.bf16.gmra.mxu0 %v5166_v0  ;;  %v729_v38 = vmax.f32 %v573_v13, 0.0  ;;  %v3916_v13 = vld [vmem:[%s6424_s3 + $0x108] sm:$0xf] }
 0x16a   : > { %1466 = vmatmul.bf16.gmra.mxu1 %v5168_v1  ;;  %v730_v44 = vmax.f32 %v662_v18, 0.0  ;;  %1534 = vmatpush.bf16.msrb.mxu2 %v3789_v3  ;;  %v3917_v18 = vor.u32 %v4402_v16, %v3916_v13  ;;  %v4380_v13 = vld [vmem:[%s6424_s3 + $0x6c] sm:$0xf]  ;;  %v3838_v16 = vld [vmem:[%s6424_s3 + $0x78] sm:$0xf0] }
 0x16b   : > { %v1285_v12 = vadd.f32 %v1284_v9, %v1196_v8 }
 0x16c   : > { %1623 = vmatpush.bf16.msrb.mxu3 %v3917_v18 }
 0x16d   : > { %v1907_v55 = vmax.f32 %v1285_v12, 0.0 }
 0x16e   : > { %v574_v23 = vpop.f32.mrf.mxu0 }
 0x16f   : > { %v575_v33 = vadd.f32 %v574_v23, %v5038_v10  ;;  %v663_v34 = vpop.f32.mrf.mxu1 }
 0x170   : > { %v664_v36 = vadd.f32 %v663_v34, %v5041_v11  ;;  %v1197_v37 = vpop.f32.mrf.mxu2 }
 0x171   : > { %v731_v41 = vmax.f32 %v575_v33, 0.0  ;;  %v1198_v42 = vadd.f32 %v1197_v37, %v5277_v48  ;;  %v1286_v43 = vpop.f32.mrf.mxu3 }
 0x172   : > { %v732_v49 = vmax.f32 %v664_v36, 0.0 }
 0x173   : > { %v5384_v50 = vpack.c.bf16 %v731_v41, %v729_v38  ;;  %v1287_v51 = vadd.f32 %v1286_v43, %v1198_v42 }
 0x174   : > { %v5386_v52 = vpack.c.bf16 %v732_v49, %v730_v44 }
 0x175   : > { %v1911_v58 = vmax.f32 %v1287_v51, 0.0  ;;  %1239 = vmatmul.bf16.gmra.mxu2 %v5384_v50 }
 0x176   : > { %1328 = vmatmul.bf16.gmra.mxu3 %v5386_v52  ;;  %v577_v60 = vpop.f32.mrf.mxu0 }
 0x177   : > { %v666_v2 = vpop.f32.mrf.mxu1  ;;  %v5396_v6 = vpack.c.bf16 %v1911_v58, %v1907_v55  ;;  %v578_v23 = vadd.f32 %v577_v60, %v5038_v10 }
 0x178   : > { %v1200_v8 = vpop.f32.mrf.mxu2  ;;  %v667_v25 = vadd.f32 %v666_v2, %v5041_v11 }
 0x179   : > { %v1201_v9 = vadd.f32 %v1200_v8, %v5277_v48  ;;  %v1289_v12 = vpop.f32.mrf.mxu3  ;;  %1382 = vmatmul.bf16.gmra.mxu0 %v5192_v27  ;;  %v733_v36 = vmax.f32 %v578_v23, 0.0  ;;  %v3841_v23 = vor.u32 %v4380_v13, %v3838_v16 }
 0x17a   : > { %1471 = vmatmul.bf16.gmra.mxu1 %v5194_v28  ;;  %v734_v42 = vmax.f32 %v667_v25, 0.0  ;;  %v4412_v25 = vld [vmem:[%s6424_s3 + $0x16c] sm:$0xf] }
 0x17b   : > { %v1290_v17 = vadd.f32 %v1289_v12, %v1201_v9  ;;  %1709 = vmatpush.bf16.msra.mxu0 %v3841_v23 }
 0x17d   : > { %v1915_v55 = vmax.f32 %v1290_v17, 0.0 }
 0x17e   : > { %v579_v26 = vpop.f32.mrf.mxu0 }
 0x17f   : > { %v580_v29 = vadd.f32 %v579_v26, %v5038_v10  ;;  %v668_v33 = vpop.f32.mrf.mxu1  ;;  %v3966_v26 = vld [vmem:[%s6424_s3 + $0x178] sm:$0xf0] }
 0x180   : > { %v669_v34 = vadd.f32 %v668_v33, %v5041_v11  ;;  %v1202_v35 = vpop.f32.mrf.mxu2 }
 0x181   : > { %v735_v37 = vmax.f32 %v580_v29, 0.0  ;;  %v1203_v38 = vadd.f32 %v1202_v35, %v5277_v48  ;;  %v1291_v41 = vpop.f32.mrf.mxu3 }
 0x182   : > { %v736_v43 = vmax.f32 %v669_v34, 0.0  ;;  %v3969_v34 = vor.u32 %v4412_v25, %v3966_v26  ;;  %v4156_v26 = vld [vmem:[#allocation2 + $0xf0] sm:$0xf] }
 0x183   : > { %v5412_v44 = vpack.c.bf16 %v735_v37, %v733_v36  ;;  %v1292_v49 = vadd.f32 %v1291_v41, %v1203_v38 }
 0x184   : > { %v5414_v51 = vpack.c.bf16 %v736_v43, %v734_v42  ;;  %1798 = vmatpush.bf16.msra.mxu1 %v3969_v34 }
 0x185   : > { %v1919_v58 = vmax.f32 %v1292_v49, 0.0  ;;  %1244 = vmatmul.bf16.gmra.mxu2 %v5412_v44 }
 0x186   : > { %1333 = vmatmul.bf16.gmra.mxu3 %v5414_v51  ;;  %v582_v60 = vpop.f32.mrf.mxu0 }
 0x187   : > { %v671_v62 = vpop.f32.mrf.mxu1  ;;  %v5418_v63 = vpack.c.bf16 %v1919_v58, %v1915_v55  ;;  %v583_v12 = vadd.f32 %v582_v60, %v5038_v10 }
 0x188   : > { %v1205_v2 = vpop.f32.mrf.mxu2  ;;  %v672_v17 = vadd.f32 %v671_v62, %v5041_v11 }
 0x189   : > { %v1206_v3 = vadd.f32 %v1205_v2, %v5277_v48  ;;  %v1294_v8 = vpop.f32.mrf.mxu3  ;;  %1387 = vmatmul.bf16.gmra.mxu0 %v5218_v56  ;;  %v737_v37 = vmax.f32 %v583_v12, 0.0  ;;  %v4446_v12 = vld [vmem:[#allocation2 + $0x74] sm:$0xf0] }
 0x18a   : > { %1476 = vmatmul.bf16.gmra.mxu1 %v5220_v57  ;;  %v738_v43 = vmax.f32 %v672_v17, 0.0 }
 0x18b   : > { %v1295_v9 = vadd.f32 %v1294_v8, %v1206_v3  ;;  %v4092_v8 = vld [vmem:[#allocation2 + $0x70] sm:$0xf] }
 0x18c   : > { %v4093_v16 = vor.u32 %v4446_v12, %v4092_v8 }
 0x18d   : > { %v1923_v62 = vmax.f32 %v1295_v9, 0.0 }
 0x18e   : > { %v584_v18 = vpop.f32.mrf.mxu0  ;;  %2465 = vmatpush.bf16.msra.mxu2 %v4093_v16 }
 0x18f   : > { %v585_v29 = vadd.f32 %v584_v18, %v5038_v10  ;;  %v673_v33 = vpop.f32.mrf.mxu1 }
 0x190   : > { %v674_v35 = vadd.f32 %v673_v33, %v5041_v11  ;;  %v1207_v36 = vpop.f32.mrf.mxu2 }
 0x191   : > { %v739_v38 = vmax.f32 %v585_v29, 0.0  ;;  %v1208_v41 = vadd.f32 %v1207_v36, %v5277_v48  ;;  %v1296_v42 = vpop.f32.mrf.mxu3  ;;  %v4462_v29 = vld [vmem:[#allocation2 + $0xf4] sm:$0xf0] }
 0x192   : > { %v740_v49 = vmax.f32 %v674_v35, 0.0  ;;  %v4157_v33 = vor.u32 %v4462_v29, %v4156_v26 }
 0x193   : > { %v5440_v55 = vpack.c.bf16 %v739_v38, %v737_v37  ;;  %v1297_v58 = vadd.f32 %v1296_v42, %v1208_v41 }
 0x194   : > { %v5442_v60 = vpack.c.bf16 %v740_v49, %v738_v43  ;;  %2554 = vmatpush.bf16.msra.mxu3 %v4157_v33 }
 0x195   : > { %v1927_v2 = vmax.f32 %v1297_v58, 0.0  ;;  %1249 = vmatmul.bf16.gmra.mxu2 %v5440_v55 }
 0x196   : > { %1338 = vmatmul.bf16.gmra.mxu3 %v5442_v60  ;;  %v587_v3 = vpop.f32.mrf.mxu0 }
 0x197   : > { %v676_v13 = vpop.f32.mrf.mxu1  ;;  %v5446_v18 = vpack.c.bf16 %v1927_v2, %v1923_v62  ;;  %v588_v34 = vadd.f32 %v587_v3, %v5038_v10 }
 0x198   : > { %v1210_v17 = vpop.f32.mrf.mxu2  ;;  %v677_v35 = vadd.f32 %v676_v13, %v5041_v11  ;;  %v5459_v13 = vperm.slane %v5269_v45, 1 }
 0x199   : > { %6470 = vst [vmem:[#allocation8_spill] sm:$0xff] %v5446_v18  ;;  %v1211_v23 = vadd.f32 %v1210_v17, %v5277_v48  ;;  %v1299_v25 = vpop.f32.mrf.mxu3  ;;  %1392 = vmatmul.bf16.gmra.mxu0 %v5242_v19  ;;  %v741_v43 = vmax.f32 %v588_v34, 0.0 }
 0x19a   : > { %1481 = vmatmul.bf16.gmra.mxu1 %v5244_v20  ;;  %v742_v2 = vmax.f32 %v677_v35, 0.0  ;;  %v4376_v35 = vld [vmem:[%s6424_s3 + $0x4c] sm:$0xf] }
 0x19b   : > { %v1300_v9 = vadd.f32 %v1299_v25, %v1211_v23 }
 0x19e   : > { %v589_v36 = vpop.f32.mrf.mxu0 }
 0x19f   : > { %v590_v37 = vadd.f32 %v589_v36, %v5038_v10  ;;  %v678_v38 = vpop.f32.mrf.mxu1  ;;  %v1931_v10 = vmax.f32 %v1300_v9, 0.0  ;;  %v3822_v36 = vld [vmem:[%s6424_s3 + $0x58] sm:$0xf0] }
 0x1a0   : > { %v679_v41 = vadd.f32 %v678_v38, %v5041_v11  ;;  %v1212_v42 = vpop.f32.mrf.mxu2  ;;  %v3825_v38 = vor.u32 %v4376_v35, %v3822_v36  ;;  %v4444_v35 = vld [vmem:[#allocation2 + $0x64] sm:$0xf0] }
 0x1a1   : > { %v743_v49 = vmax.f32 %v590_v37, 0.0  ;;  %v1213_v58 = vadd.f32 %v1212_v42, %v5277_v48  ;;  %v1301_v62 = vpop.f32.mrf.mxu3  ;;  %v3950_v42 = vld [vmem:[%s6424_s3 + $0x158] sm:$0xf0] }
 0x1a2   : > { %v744_v8 = vmax.f32 %v679_v41, 0.0  ;;  %v4408_v41 = vld [vmem:[%s6424_s3 + $0x14c] sm:$0xf]  ;;  %1710 = vmatpush.bf16.msra.mxu0 %v3825_v38 }
 0x1a3   : > { %v5456_v12 = vpack.c.bf16 %v743_v49, %v741_v43  ;;  %v1302_v3 = vadd.f32 %v1301_v62, %v1213_v58  ;;  %v3953_v58 = vor.u32 %v4408_v41, %v3950_v42 }
 0x1a4   : > { %v5461_v16 = vpack.c.bf16 %v744_v8, %v742_v2 }
 0x1a5   : > { %v1935_v17 = vmax.f32 %v1302_v3, 0.0  ;;  %1254 = vmatmul.bf16.gmra.mxu2 %v5456_v12  ;;  %1799 = vmatpush.bf16.msra.mxu1 %v3953_v58  ;;  %v4148_v58 = vld [vmem:[#allocation2 + $0xe0] sm:$0xf] }
 0x1a6   : > { %1343 = vmatmul.bf16.gmra.mxu3 %v5461_v16  ;;  %v1358_v11 = vpop.f32.mrf.mxu0 }
 0x1a7   : > { %v1359_v23 = vadd.f32 %v1358_v11, %v5459_v13  ;;  %v1447_v25 = vpop.f32.mrf.mxu1  ;;  %v5466_v26 = vpack.c.bf16 %v1935_v17, %v1931_v10 }
 0x1a8   : > { %v1215_v29 = vpop.f32.mrf.mxu2 }
 0x1a9   : > { %6471 = vst [vmem:[#allocation9_spill] sm:$0xff] %v5466_v26  ;;  %v1448_v33 = vadd.f32 %v1447_v25, %v1359_v23  ;;  %v1216_v34 = vadd.f32 %v1215_v29, %v5277_v48  ;;  %v1304_v45 = vpop.f32.mrf.mxu3  ;;  %1397 = vmatmul.bf16.gmra.mxu0 %v5271_v46 }
 0x1aa   : > { %1486 = vmatmul.bf16.gmra.mxu1 %v5273_v47 }
 0x1ab   : > { %v1305_v9 = vadd.f32 %v1304_v45, %v1216_v34  ;;  %v1884_v10 = vmax.f32 %v1448_v33, 0.0  ;;  %v4084_v45 = vld [vmem:[#allocation2 + $0x60] sm:$0xf] }
 0x1ac   : > { %v4085_v38 = vor.u32 %v4444_v35, %v4084_v45 }
 0x1ad   : > { %v1939_v23 = vmax.f32 %v1305_v9, 0.0 }
 0x1ae   : > { %v1360_v37 = vpop.f32.mrf.mxu0  ;;  %2466 = vmatpush.bf16.msra.mxu2 %v4085_v38 }
 0x1af   : > { %v1361_v43 = vadd.f32 %v1360_v37, %v5459_v13  ;;  %v1449_v49 = vpop.f32.mrf.mxu1 }
 0x1b0   : > { %v1217_v62 = vpop.f32.mrf.mxu2 }
 0x1b1   : > { %v1450_v2 = vadd.f32 %v1449_v49, %v1361_v43  ;;  %v1218_v8 = vadd.f32 %v1217_v62, %v5277_v48  ;;  %v1306_v3 = vpop.f32.mrf.mxu3  ;;  %v4460_v62 = vld [vmem:[#allocation2 + $0xe4] sm:$0xf0] }
 0x1b3   : > { %v1888_v17 = vmax.f32 %v1450_v2, 0.0  ;;  %v1307_v11 = vadd.f32 %v1306_v3, %v1218_v8  ;;  %v4149_v2 = vor.u32 %v4460_v62, %v4148_v58 }
 0x1b5   : > { %v5485_v25 = vpack.c.bf16 %v1888_v17, %v1884_v10  ;;  %v1943_v29 = vmax.f32 %v1307_v11, 0.0  ;;  %1535 = vmatmul.bf16.vlgmr.msrb.gmra.mxu2 %v5062_v30  ;;  %2555 = vmatpush.bf16.msra.mxu3 %v4149_v2 }
 0x1b6   : > { %1624 = vmatmul.bf16.vlgmr.msrb.gmra.mxu3 %v5064_v31  ;;  %v1363_v34 = vpop.f32.mrf.mxu0 }
 0x1b7   : > { %v1364_v36 = vadd.f32 %v1363_v34, %v5459_v13  ;;  %v1452_v37 = vpop.f32.mrf.mxu1  ;;  %v5490_v41 = vpack.c.bf16 %v1943_v29, %v1939_v23 }
 0x1b8   : > { %v1220_v33 = vpop.f32.mrf.mxu2 }
 0x1b9   : > { %6472 = vst [vmem:[#allocation10_spill] sm:$0xff] %v5490_v41  ;;  %v1453_v42 = vadd.f32 %v1452_v37, %v1364_v36  ;;  %v1221_v9 = vadd.f32 %v1220_v33, %v5277_v48  ;;  %v1309_v43 = vpop.f32.mrf.mxu3  ;;  %1402 = vmatmul.bf16.gmra.mxu0 %v5300_v22 }
 0x1ba   : > { %1491 = vmatmul.bf16.gmra.mxu1 %v5302_v24 }
 0x1bb   : > { %v1310_v49 = vadd.f32 %v1309_v43, %v1221_v9  ;;  %v1892_v34 = vmax.f32 %v1453_v42, 0.0 }
 0x1bd   : > { %v1947_v36 = vmax.f32 %v1310_v49, 0.0 }
 0x1be   : > { %v1365_v8 = vpop.f32.mrf.mxu0 }
 0x1bf   : > { %v1366_v3 = vadd.f32 %v1365_v8, %v5459_v13  ;;  %v1454_v10 = vpop.f32.mrf.mxu1 }
 0x1c0   : > { %v1222_v17 = vpop.f32.mrf.mxu2 }
 0x1c1   : > { %v1455_v11 = vadd.f32 %v1454_v10, %v1366_v3  ;;  %v1223_v23 = vadd.f32 %v1222_v17, %v5277_v48  ;;  %v1311_v29 = vpop.f32.mrf.mxu3  ;;  %v4372_v3 = vld [vmem:[%s6424_s3 + $0x2c] sm:$0xf]  ;;  %v3806_v10 = vld [vmem:[%s6424_s3 + $0x38] sm:$0xf0] }
 0x1c3   : > { %v1896_v45 = vmax.f32 %v1455_v11, 0.0  ;;  %v1312_v35 = vadd.f32 %v1311_v29, %v1223_v23  ;;  %v3809_v11 = vor.u32 %v4372_v3, %v3806_v10  ;;  %v4404_v23 = vld [vmem:[%s6424_s3 + $0x12c] sm:$0xf]  ;;  %v3934_v29 = vld [vmem:[%s6424_s3 + $0x138] sm:$0xf0] }
 0x1c5   : > { %v1951_v37 = vmax.f32 %v1312_v35, 0.0  ;;  %1540 = vmatmul.bf16.gmra.mxu2 %v5088_v53  ;;  %v5498_v38 = vpack.c.bf16 %v1896_v45, %v1892_v34  ;;  %v3937_v35 = vor.u32 %v4404_v23, %v3934_v29  ;;  %1711 = vmatpush.bf16.msra.mxu0 %v3809_v11  ;;  %v4076_v23 = vld [vmem:[#allocation2 + $0x50] sm:$0xf]  ;;  %v4442_v29 = vld [vmem:[#allocation2 + $0x54] sm:$0xf0] }
 0x1c6   : > { %1629 = vmatmul.bf16.gmra.mxu3 %v5090_v54  ;;  %v1368_v33 = vpop.f32.mrf.mxu0 }
 0x1c7   : > { %v1369_v9 = vadd.f32 %v1368_v33, %v5459_v13  ;;  %v1457_v43 = vpop.f32.mrf.mxu1  ;;  %v5502_v58 = vpack.c.bf16 %v1951_v37, %v1947_v36  ;;  %1800 = vmatpush.bf16.msra.mxu1 %v3937_v35 }
 0x1c8   : > { %v1225_v62 = vpop.f32.mrf.mxu2 }
 0x1c9   : > { %6473 = vst [vmem:[#allocation11_spill] sm:$0xff] %v5502_v58  ;;  %v1458_v2 = vadd.f32 %v1457_v43, %v1369_v9  ;;  %v1226_v42 = vadd.f32 %v1225_v62, %v5277_v48  ;;  %v1314_v8 = vpop.f32.mrf.mxu3  ;;  %1407 = vmatmul.bf16.gmra.mxu0 %v5328_v5 }
 0x1ca   : > { %1496 = vmatmul.bf16.gmra.mxu1 %v5330_v7 }
 0x1cb   : > { %v1315_v49 = vadd.f32 %v1314_v8, %v1226_v42  ;;  %v1900_v43 = vmax.f32 %v1458_v2, 0.0 }
 0x1cd   : > { %v1955_v8 = vmax.f32 %v1315_v49, 0.0 }
 0x1ce   : > { %v1370_v17 = vpop.f32.mrf.mxu0 }
 0x1cf   : > { %v1371_v34 = vadd.f32 %v1370_v17, %v5459_v13  ;;  %v1459_v45 = vpop.f32.mrf.mxu1 }
 0x1d0   : > { %v1227_v36 = vpop.f32.mrf.mxu2 }
 0x1d1   : > { %v1460_v37 = vadd.f32 %v1459_v45, %v1371_v34  ;;  %v1228_v33 = vadd.f32 %v1227_v36, %v5277_v48  ;;  %v1316_v9 = vpop.f32.mrf.mxu3  ;;  %v4077_v45 = vor.u32 %v4442_v29, %v4076_v23 }
 0x1d3   : > { %v1904_v62 = vmax.f32 %v1460_v37, 0.0  ;;  %v1317_v42 = vadd.f32 %v1316_v9, %v1228_v33  ;;  %2467 = vmatpush.bf16.msra.mxu2 %v4077_v45  ;;  %v4140_v9 = vld [vmem:[#allocation2 + $0xd0] sm:$0xf] }
 0x1d5   : > { %v1959_v3 = vmax.f32 %v1317_v42, 0.0  ;;  %1545 = vmatmul.bf16.gmra.mxu2 %v5114_v14  ;;  %v5522_v10 = vpack.c.bf16 %v1904_v62, %v1900_v43  ;;  %v4458_v43 = vld [vmem:[#allocation2 + $0xd4] sm:$0xf0] }
 0x1d6   : > { %1634 = vmatmul.bf16.gmra.mxu3 %v5116_v15  ;;  %v1373_v17 = vpop.f32.mrf.mxu0  ;;  %v4141_v62 = vor.u32 %v4458_v43, %v4140_v9 }
 0x1d7   : > { %v1374_v11 = vadd.f32 %v1373_v17, %v5459_v13  ;;  %v1462_v34 = vpop.f32.mrf.mxu1  ;;  %v5526_v36 = vpack.c.bf16 %v1959_v3, %v1955_v8 }
 0x1d8   : > { %v1230_v2 = vpop.f32.mrf.mxu2  ;;  %2556 = vmatpush.bf16.msra.mxu3 %v4141_v62 }
 0x1d9   : > { %6474 = vst [vmem:[#allocation12_spill] sm:$0xff] %v5526_v36  ;;  %v1463_v35 = vadd.f32 %v1462_v34, %v1374_v11  ;;  %v1231_v49 = vadd.f32 %v1230_v2, %v5277_v48  ;;  %v1319_v37 = vpop.f32.mrf.mxu3  ;;  %1412 = vmatmul.bf16.gmra.mxu0 %v5356_v59 }
 0x1da   : > { %1501 = vmatmul.bf16.gmra.mxu1 %v5358_v61 }
 0x1db   : > { %v1320_v33 = vadd.f32 %v1319_v37, %v1231_v49  ;;  %v1908_v34 = vmax.f32 %v1463_v35, 0.0 }
 0x1dd   : > { %v1963_v45 = vmax.f32 %v1320_v33, 0.0  ;;  %v4368_v33 = vld [vmem:[%s6424_s3 + $0xc] sm:$0xf] }
 0x1de   : > { %v1375_v42 = vpop.f32.mrf.mxu0 }
 0x1df   : > { %v1376_v17 = vadd.f32 %v1375_v42, %v5459_v13  ;;  %v1464_v8 = vpop.f32.mrf.mxu1 }
 0x1e0   : > { %v1232_v3 = vpop.f32.mrf.mxu2 }
 0x1e1   : > { %v1465_v23 = vadd.f32 %v1464_v8, %v1376_v17  ;;  %v1233_v29 = vadd.f32 %v1232_v3, %v5277_v48  ;;  %v1321_v11 = vpop.f32.mrf.mxu3  ;;  %v3790_v3 = vld [vmem:[%s6424_s3 + $0x18] sm:$0xf0] }
 0x1e3   : > { %v1912_v2 = vmax.f32 %v1465_v23, 0.0  ;;  %v1322_v36 = vadd.f32 %v1321_v11, %v1233_v29  ;;  %v3793_v23 = vor.u32 %v4368_v33, %v3790_v3  ;;  %v4400_v29 = vld [vmem:[%s6424_s3 + $0x10c] sm:$0xf]  ;;  %v3918_v11 = vld [vmem:[%s6424_s3 + $0x118] sm:$0xf0] }
 0x1e5   : > { %v1967_v58 = vmax.f32 %v1322_v36, 0.0  ;;  %1550 = vmatmul.bf16.gmra.mxu2 %v5140_v39  ;;  %v5534_v49 = vpack.c.bf16 %v1912_v2, %v1908_v34  ;;  %1712 = vmatpush.bf16.msra.mxu0 %v3793_v23 }
 0x1e6   : > { %1639 = vmatmul.bf16.gmra.mxu3 %v5142_v40  ;;  %v1378_v37 = vpop.f32.mrf.mxu0 }
 0x1e7   : > { %v1379_v9 = vadd.f32 %v1378_v37, %v5459_v13  ;;  %v1467_v43 = vpop.f32.mrf.mxu1  ;;  %v5538_v62 = vpack.c.bf16 %v1967_v58, %v1963_v45  ;;  %v3921_v45 = vor.u32 %v4400_v29, %v3918_v11  ;;  %v4068_v29 = vld [vmem:[#allocation2 + $0x40] sm:$0xf]  ;;  %v4440_v11 = vld [vmem:[#allocation2 + $0x44] sm:$0xf0] }
 0x1e8   : > { %v1235_v42 = vpop.f32.mrf.mxu2 }
 0x1e9   : > { %6475 = vst [vmem:[#allocation13_spill] sm:$0xff] %v5538_v62  ;;  %v1468_v17 = vadd.f32 %v1467_v43, %v1379_v9  ;;  %v1236_v35 = vadd.f32 %v1235_v42, %v5277_v48  ;;  %v1324_v8 = vpop.f32.mrf.mxu3  ;;  %1417 = vmatmul.bf16.gmra.mxu0 %v5384_v50  ;;  %1801 = vmatpush.bf16.msra.mxu1 %v3921_v45 }
 0x1ea   : > { %1506 = vmatmul.bf16.gmra.mxu1 %v5386_v52 }
 0x1eb   : > { %v1325_v36 = vadd.f32 %v1324_v8, %v1236_v35  ;;  %v1916_v35 = vmax.f32 %v1468_v17, 0.0 }
 0x1ed   : > { %v1971_v3 = vmax.f32 %v1325_v36, 0.0 }
 0x1ee   : > { %v1380_v58 = vpop.f32.mrf.mxu0 }
 0x1ef   : > { %v1381_v34 = vadd.f32 %v1380_v58, %v5459_v13  ;;  %v1469_v2 = vpop.f32.mrf.mxu1 }
 0x1f0   : > { %v1237_v37 = vpop.f32.mrf.mxu2 }
 0x1f1   : > { %v1470_v9 = vadd.f32 %v1469_v2, %v1381_v34  ;;  %v1238_v43 = vadd.f32 %v1237_v37, %v5277_v48  ;;  %v1326_v42 = vpop.f32.mrf.mxu3  ;;  %v4069_v2 = vor.u32 %v4440_v11, %v4068_v29 }
 0x1f3   : > { %v1920_v8 = vmax.f32 %v1470_v9, 0.0  ;;  %v1327_v33 = vadd.f32 %v1326_v42, %v1238_v43  ;;  %2468 = vmatpush.bf16.msra.mxu2 %v4069_v2  ;;  %v4132_v42 = vld [vmem:[#allocation2 + $0xc0] sm:$0xf] }
 0x1f5   : > { %v1975_v62 = vmax.f32 %v1327_v33, 0.0  ;;  %1555 = vmatmul.bf16.gmra.mxu2 %v5166_v0  ;;  %v5558_v41 = vpack.c.bf16 %v1920_v8, %v1916_v35  ;;  %v4456_v35 = vld [vmem:[#allocation2 + $0xc4] sm:$0xf0] }
 0x1f6   : > { %1644 = vmatmul.bf16.gmra.mxu3 %v5168_v1  ;;  %v1383_v58 = vpop.f32.mrf.mxu0  ;;  %v4133_v8 = vor.u32 %v4456_v35, %v4132_v42 }
 0x1f7   : > { %v1384_v23 = vadd.f32 %v1383_v58, %v5459_v13  ;;  %v1472_v34 = vpop.f32.mrf.mxu1  ;;  %v5562_v37 = vpack.c.bf16 %v1975_v62, %v1971_v3 }
 0x1f8   : > { %v1240_v17 = vpop.f32.mrf.mxu2  ;;  %2557 = vmatpush.bf16.msra.mxu3 %v4133_v8 }
 0x1f9   : > { %6476 = vst [vmem:[#allocation14_spill] sm:$0xff] %v5562_v37  ;;  %v1473_v45 = vadd.f32 %v1472_v34, %v1384_v23  ;;  %v1241_v36 = vadd.f32 %v1240_v17, %v5277_v48  ;;  %v1329_v9 = vpop.f32.mrf.mxu3  ;;  %1422 = vmatmul.bf16.gmra.mxu0 %v5412_v44 }
 0x1fa   : > { %1511 = vmatmul.bf16.gmra.mxu1 %v5414_v51 }
 0x1fb   : > { %v1330_v43 = vadd.f32 %v1329_v9, %v1241_v36  ;;  %v1924_v34 = vmax.f32 %v1473_v45, 0.0 }
 0x1fd   : > { %v1979_v2 = vmax.f32 %v1330_v43, 0.0  ;;  %v4220_v43 = vld [vmem:[#allocation2 + $0x170] sm:$0xf] }
 0x1fe   : > { %v1385_v33 = vpop.f32.mrf.mxu0 }
 0x1ff   : > { %v1386_v58 = vadd.f32 %v1385_v33, %v5459_v13  ;;  %v1474_v62 = vpop.f32.mrf.mxu1 }
 0x200   : > { %v1242_v3 = vpop.f32.mrf.mxu2 }
 0x201   : > { %v1475_v29 = vadd.f32 %v1474_v62, %v1386_v58  ;;  %v1243_v11 = vadd.f32 %v1242_v3, %v5277_v48  ;;  %v1331_v23 = vpop.f32.mrf.mxu3  ;;  %v4478_v3 = vld [vmem:[#allocation2 + $0x174] sm:$0xf0] }
 0x203   : > { %v1928_v17 = vmax.f32 %v1475_v29, 0.0  ;;  %v1332_v37 = vadd.f32 %v1331_v23, %v1243_v11  ;;  %v4221_v11 = vor.u32 %v4478_v3, %v4220_v43  ;;  %v4284_v23 = vld [vmem:[#allocation2 + $0x1f0] sm:$0xf] }
 0x205   : > { %v1983_v26 = vmax.f32 %v1332_v37, 0.0  ;;  %1560 = vmatmul.bf16.gmra.mxu2 %v5192_v27  ;;  %v5570_v36 = vpack.c.bf16 %v1928_v17, %v1924_v34  ;;  %v4494_v34 = vld [vmem:[#allocation2 + $0x1f4] sm:$0xf0]  ;;  %2643 = vmatpush.bf16.msrb.mxu0 %v4221_v11 }
 0x206   : > { %1649 = vmatmul.bf16.gmra.mxu3 %v5194_v28  ;;  %v1388_v9 = vpop.f32.mrf.mxu0 }
 0x207   : > { %6477 = vst [vmem:[#allocation15_spill] sm:$0xff] %v5570_v36  ;;  %v1389_v42 = vadd.f32 %v1388_v9, %v5459_v13  ;;  %v1477_v35 = vpop.f32.mrf.mxu1  ;;  %v5574_v8 = vpack.c.bf16 %v1983_v26, %v1979_v2  ;;  %v4285_v2 = vor.u32 %v4494_v34, %v4284_v23  ;;  %v4438_v23 = vld [vmem:[#allocation2 + $0x34] sm:$0xf0] }
 0x208   : > { %v1245_v33 = vpop.f32.mrf.mxu2 }
 0x209   : > { %6478 = vst [vmem:[#allocation16_spill] sm:$0xff] %v5574_v8  ;;  %v1478_v58 = vadd.f32 %v1477_v35, %v1389_v42  ;;  %v1246_v45 = vadd.f32 %v1245_v33, %v5277_v48  ;;  %v1334_v62 = vpop.f32.mrf.mxu3  ;;  %1427 = vmatmul.bf16.gmra.mxu0 %v5440_v55  ;;  %2732 = vmatpush.bf16.msrb.mxu1 %v4285_v2 }
 0x20a   : > { %1516 = vmatmul.bf16.gmra.mxu1 %v5442_v60 }
 0x20b   : > { %v1335_v37 = vadd.f32 %v1334_v62, %v1246_v45  ;;  %v1932_v8 = vmax.f32 %v1478_v58, 0.0 }
 0x20d   : > { %v1987_v62 = vmax.f32 %v1335_v37, 0.0 }
 0x20e   : > { %v1390_v29 = vpop.f32.mrf.mxu0 }
 0x20f   : > { %v1391_v17 = vadd.f32 %v1390_v29, %v5459_v13  ;;  %v1479_v26 = vpop.f32.mrf.mxu1  ;;  %v4060_v29 = vld [vmem:[#allocation2 + $0x30] sm:$0xf] }
 0x210   : > { %v1247_v9 = vpop.f32.mrf.mxu2 }
 0x211   : > { %v1480_v42 = vadd.f32 %v1479_v26, %v1391_v17  ;;  %v1248_v35 = vadd.f32 %v1247_v9, %v5277_v48  ;;  %v1336_v33 = vpop.f32.mrf.mxu3  ;;  %v4061_v17 = vor.u32 %v4438_v23, %v4060_v29 }
 0x213   : > { %v1936_v36 = vmax.f32 %v1480_v42, 0.0  ;;  %v1337_v45 = vadd.f32 %v1336_v33, %v1248_v35  ;;  %2469 = vmatpush.bf16.msra.mxu2 %v4061_v17  ;;  %v4454_v42 = vld [vmem:[#allocation2 + $0xb4] sm:$0xf0] }
 0x215   : > { %v1991_v18 = vmax.f32 %v1337_v45, 0.0  ;;  %1565 = vmatmul.bf16.gmra.mxu2 %v5218_v56  ;;  %v5582_v43 = vpack.c.bf16 %v1936_v36, %v1932_v8  ;;  %v4124_v8 = vld [vmem:[#allocation2 + $0xb0] sm:$0xf] }
 0x216   : > { %1654 = vmatmul.bf16.gmra.mxu3 %v5220_v57  ;;  %v1393_v3 = vpop.f32.mrf.mxu0  ;;  %v4125_v35 = vor.u32 %v4454_v42, %v4124_v8 }
 0x217   : > { %v1394_v11 = vadd.f32 %v1393_v3, %v5459_v13  ;;  %v1482_v34 = vpop.f32.mrf.mxu1  ;;  %v5586_v26 = vpack.c.bf16 %v1991_v18, %v1987_v62 }
 0x218   : > { %v1250_v58 = vpop.f32.mrf.mxu2  ;;  %2558 = vmatpush.bf16.msra.mxu3 %v4125_v35 }
 0x219   : > { %6479 = vst [vmem:[#allocation17_spill] sm:$0xff] %v5586_v26  ;;  %v1483_v2 = vadd.f32 %v1482_v34, %v1394_v11  ;;  %v1251_v37 = vadd.f32 %v1250_v58, %v5277_v48  ;;  %v1339_v9 = vpop.f32.mrf.mxu3  ;;  %1432 = vmatmul.bf16.gmra.mxu0 %v5456_v12 }
 0x21a   : > { %1521 = vmatmul.bf16.gmra.mxu1 %v5461_v16 }
 0x21b   : > { %v1340_v36 = vadd.f32 %v1339_v9, %v1251_v37  ;;  %v1940_v11 = vmax.f32 %v1483_v2, 0.0 }
 0x21d   : > { %v1995_v17 = vmax.f32 %v1340_v36, 0.0 }
 0x21e   : > { %v1395_v33 = vpop.f32.mrf.mxu0 }
 0x21f   : > { %v1396_v45 = vadd.f32 %v1395_v33, %v5459_v13  ;;  %v1484_v18 = vpop.f32.mrf.mxu1 }
 0x220   : > { %v1252_v62 = vpop.f32.mrf.mxu2 }
 0x221   : > { %v1485_v3 = vadd.f32 %v1484_v18, %v1396_v45  ;;  %v1253_v29 = vadd.f32 %v1252_v62, %v5277_v48  ;;  %v1341_v23 = vpop.f32.mrf.mxu3  ;;  %v4212_v62 = vld [vmem:[#allocation2 + $0x160] sm:$0xf] }
 0x223   : > { %v1944_v34 = vmax.f32 %v1485_v3, 0.0  ;;  %v1342_v58 = vadd.f32 %v1341_v23, %v1253_v29  ;;  %v4476_v3 = vld [vmem:[#allocation2 + $0x164] sm:$0xf0] }
 0x224   : > { %v4213_v23 = vor.u32 %v4476_v3, %v4212_v62  ;;  %v5609_v62 = vld [vmem:[%s6425_s4] sm:$0xf] }
 0x225   : > { %v1999_v26 = vmax.f32 %v1342_v58, 0.0  ;;  %1570 = vmatmul.bf16.gmra.mxu2 %v5242_v19  ;;  %v5594_v37 = vpack.c.bf16 %v1944_v34, %v1940_v11  ;;  %v4276_v11 = vld [vmem:[#allocation2 + $0x1e0] sm:$0xf]  ;;  %v4492_v34 = vld [vmem:[#allocation2 + $0x1e4] sm:$0xf0]  ;;  %v5612_v3 = vperm.slane %v5609_v62, 2 }
 0x226   : > { %1659 = vmatmul.bf16.gmra.mxu3 %v5244_v20  ;;  %v1398_v9 = vpop.f32.mrf.mxu0  ;;  %2644 = vmatpush.bf16.msrb.mxu0 %v4213_v23  ;;  %v4436_v23 = vld [vmem:[#allocation2 + $0x24] sm:$0xf0] }
 0x227   : > { %v1399_v8 = vadd.f32 %v1398_v9, %v5459_v13  ;;  %v1487_v42 = vpop.f32.mrf.mxu1  ;;  %v5598_v35 = vpack.c.bf16 %v1999_v26, %v1995_v17  ;;  %v4277_v17 = vor.u32 %v4492_v34, %v4276_v11 }
 0x228   : > { %v1255_v33 = vpop.f32.mrf.mxu2 }
 0x229   : > { %6480 = vst [vmem:[#allocation18_spill] sm:$0xff] %v5598_v35  ;;  %v1488_v45 = vadd.f32 %v1487_v42, %v1399_v8  ;;  %v1256_v2 = vadd.f32 %v1255_v33, %v5277_v48  ;;  %v1344_v18 = vpop.f32.mrf.mxu3  ;;  %1713 = vmatmul.bf16.vlgmr.msra.gmra.mxu0 %v5062_v30  ;;  %2733 = vmatpush.bf16.msrb.mxu1 %v4277_v17 }
 0x22a   : > { %1802 = vmatmul.bf16.vlgmr.msra.gmra.mxu1 %v5064_v31 }
 0x22b   : > { %v1345_v36 = vadd.f32 %v1344_v18, %v1256_v2  ;;  %v1948_v30 = vmax.f32 %v1488_v45, 0.0  ;;  %v4052_v45 = vld [vmem:[#allocation2 + $0x20] sm:$0xf] }
 0x22c   : > { %v4053_v34 = vor.u32 %v4436_v23, %v4052_v45 }
 0x22d   : > { %v2003_v18 = vmax.f32 %v1345_v36, 0.0 }
 0x22e   : > { %v1400_v29 = vpop.f32.mrf.mxu0  ;;  %2470 = vmatpush.bf16.msra.mxu2 %v4053_v34 }
 0x22f   : > { %v1401_v58 = vadd.f32 %v1400_v29, %v5459_v13  ;;  %v1489_v26 = vpop.f32.mrf.mxu1 }
 0x230   : > { %v1257_v9 = vpop.f32.mrf.mxu2 }
 0x231   : > { %v1490_v8 = vadd.f32 %v1489_v26, %v1401_v58  ;;  %v1258_v42 = vadd.f32 %v1257_v9, %v5277_v48  ;;  %v1346_v33 = vpop.f32.mrf.mxu3 }
 0x233   : > { %v1952_v31 = vmax.f32 %v1490_v8, 0.0  ;;  %v1347_v2 = vadd.f32 %v1346_v33, %v1258_v42  ;;  %v4116_v33 = vld [vmem:[#allocation2 + $0xa0] sm:$0xf] }
 0x235   : > { %v2007_v35 = vmax.f32 %v1347_v2, 0.0  ;;  %1575 = vmatmul.bf16.gmra.mxu2 %v5271_v46  ;;  %v5614_v29 = vpack.c.bf16 %v1952_v31, %v1948_v30  ;;  %v4452_v30 = vld [vmem:[#allocation2 + $0xa4] sm:$0xf0] }
 0x236   : > { %1664 = vmatmul.bf16.gmra.mxu3 %v5273_v47  ;;  %v1403_v48 = vpop.f32.mrf.mxu0  ;;  %v4117_v31 = vor.u32 %v4452_v30, %v4116_v33 }
 0x237   : > { %6481 = vst [vmem:[#allocation19_spill] sm:$0xff] %v5614_v29  ;;  %v1404_v36 = vadd.f32 %v1403_v48, %v5459_v13  ;;  %v1492_v11 = vpop.f32.mrf.mxu1  ;;  %v5618_v58 = vpack.c.bf16 %v2007_v35, %v2003_v18 }
 0x238   : > { %v1536_v26 = vpop.f32.mrf.mxu2  ;;  %2559 = vmatpush.bf16.msra.mxu3 %v4117_v31 }
 0x239   : > { %6482 = vst [vmem:[#allocation20_spill] sm:$0xff] %v5618_v58  ;;  %v1493_v17 = vadd.f32 %v1492_v11, %v1404_v36  ;;  %v1537_v9 = vadd.f32 %v1536_v26, %v5612_v3  ;;  %v1625_v8 = vpop.f32.mrf.mxu3  ;;  %1718 = vmatmul.bf16.gmra.mxu0 %v5088_v53 }
 0x23a   : > { %1807 = vmatmul.bf16.gmra.mxu1 %v5090_v54 }
 0x23b   : > { %v1626_v42 = vadd.f32 %v1625_v8, %v1537_v9  ;;  %v1956_v11 = vmax.f32 %v1493_v17, 0.0 }
 0x23d   : > { %v1885_v34 = vmax.f32 %v1626_v42, 0.0 }
 0x23e   : > { %v1405_v2 = vpop.f32.mrf.mxu0 }
 0x23f   : > { %v1406_v48 = vadd.f32 %v1405_v2, %v5459_v13  ;;  %v1494_v35 = vpop.f32.mrf.mxu1 }
 0x240   : > { %v1538_v18 = vpop.f32.mrf.mxu2 }
 0x241   : > { %v1495_v45 = vadd.f32 %v1494_v35, %v1406_v48  ;;  %v1539_v23 = vadd.f32 %v1538_v18, %v5612_v3  ;;  %v1627_v36 = vpop.f32.mrf.mxu3  ;;  %v4204_v35 = vld [vmem:[#allocation2 + $0x150] sm:$0xf]  ;;  %v4474_v18 = vld [vmem:[#allocation2 + $0x154] sm:$0xf0] }
 0x243   : > { %v1960_v26 = vmax.f32 %v1495_v45, 0.0  ;;  %v1628_v53 = vadd.f32 %v1627_v36, %v1539_v23  ;;  %v4205_v23 = vor.u32 %v4474_v18, %v4204_v35  ;;  %v4268_v36 = vld [vmem:[#allocation2 + $0x1d0] sm:$0xf] }
 0x245   : > { %v1889_v58 = vmax.f32 %v1628_v53, 0.0  ;;  %1580 = vmatmul.bf16.gmra.mxu2 %v5300_v22  ;;  %v5626_v54 = vpack.c.bf16 %v1960_v26, %v1956_v11  ;;  %2645 = vmatpush.bf16.msrb.mxu0 %v4205_v23 }
 0x246   : > { %1669 = vmatmul.bf16.gmra.mxu3 %v5302_v24  ;;  %v1408_v9 = vpop.f32.mrf.mxu0 }
 0x247   : > { %6483 = vst [vmem:[#allocation21_spill] sm:$0xff] %v5626_v54  ;;  %v5629_v8 = vpack.c.bf16 %v1889_v58, %v1885_v34  ;;  %v1409_v33 = vadd.f32 %v1408_v9, %v5459_v13  ;;  %v1497_v30 = vpop.f32.mrf.mxu1  ;;  %v4490_v58 = vld [vmem:[#allocation2 + $0x1d4] sm:$0xf0] }
 0x248   : > { %v1541_v31 = vpop.f32.mrf.mxu2  ;;  %v4269_v53 = vor.u32 %v4490_v58, %v4268_v36  ;;  %v4434_v36 = vld [vmem:[#allocation2 + $0x14] sm:$0xf0] }
 0x249   : > { %v1498_v2 = vadd.f32 %v1497_v30, %v1409_v33  ;;  %v1542_v17 = vadd.f32 %v1541_v31, %v5612_v3  ;;  %v1630_v48 = vpop.f32.mrf.mxu3  ;;  %1723 = vmatmul.bf16.gmra.mxu0 %v5114_v14 }
 0x24a   : > { %1812 = vmatmul.bf16.gmra.mxu1 %v5116_v15 }
 0x24b   : > { %v1631_v42 = vadd.f32 %v1630_v48, %v1542_v17  ;;  %2734 = vmatpush.bf16.msrb.mxu1 %v4269_v53  ;;  %v1964_v14 = vmax.f32 %v1498_v2, 0.0 }
 0x24d   : > { %v1893_v17 = vmax.f32 %v1631_v42, 0.0 }
 0x24e   : > { %v1410_v45 = vpop.f32.mrf.mxu0 }
 0x24f   : > { %v1411_v11 = vadd.f32 %v1410_v45, %v5459_v13  ;;  %v1499_v26 = vpop.f32.mrf.mxu1  ;;  %v4044_v45 = vld [vmem:[#allocation2 + $0x10] sm:$0xf] }
 0x250   : > { %v1543_v34 = vpop.f32.mrf.mxu2 }
 0x251   : > { %v1500_v9 = vadd.f32 %v1499_v26, %v1411_v11  ;;  %v1544_v33 = vadd.f32 %v1543_v34, %v5612_v3  ;;  %v1632_v30 = vpop.f32.mrf.mxu3  ;;  %v4045_v11 = vor.u32 %v4434_v36, %v4044_v45 }
 0x253   : > { %v1968_v15 = vmax.f32 %v1500_v9, 0.0  ;;  %v1633_v31 = vadd.f32 %v1632_v30, %v1544_v33  ;;  %2471 = vmatpush.bf16.msra.mxu2 %v4045_v11  ;;  %v4108_v33 = vld [vmem:[#allocation2 + $0x90] sm:$0xf]  ;;  %v4450_v30 = vld [vmem:[#allocation2 + $0x94] sm:$0xf0] }
 0x255   : > { %v1897_v48 = vmax.f32 %v1633_v31, 0.0  ;;  %1585 = vmatmul.bf16.gmra.mxu2 %v5328_v5  ;;  %v5638_v35 = vpack.c.bf16 %v1968_v15, %v1964_v14  ;;  %v4109_v14 = vor.u32 %v4450_v30, %v4108_v33 }
 0x256   : > { %1674 = vmatmul.bf16.gmra.mxu3 %v5330_v7  ;;  %v1413_v18 = vpop.f32.mrf.mxu0 }
 0x257   : > { %6484 = vst [vmem:[#allocation22_spill] sm:$0xff] %v5638_v35  ;;  %v1414_v23 = vadd.f32 %v1413_v18, %v5459_v13  ;;  %v1502_v58 = vpop.f32.mrf.mxu1  ;;  %v5642_v26 = vpack.c.bf16 %v1897_v48, %v1893_v17  ;;  %2560 = vmatpush.bf16.msra.mxu3 %v4109_v14 }
 0x258   : > { %v1546_v2 = vpop.f32.mrf.mxu2 }
 0x259   : > { %6485 = vst [vmem:[#allocation23_spill] sm:$0xff] %v5642_v26  ;;  %v1503_v53 = vadd.f32 %v1502_v58, %v1414_v23  ;;  %v1547_v42 = vadd.f32 %v1546_v2, %v5612_v3  ;;  %v1635_v34 = vpop.f32.mrf.mxu3  ;;  %1728 = vmatmul.bf16.gmra.mxu0 %v5140_v39 }
 0x25a   : > { %1817 = vmatmul.bf16.gmra.mxu1 %v5142_v40 }
 0x25b   : > { %v1636_v9 = vadd.f32 %v1635_v34, %v1547_v42  ;;  %v1972_v23 = vmax.f32 %v1503_v53, 0.0 }
 0x25d   : > { %v1901_v11 = vmax.f32 %v1636_v9, 0.0 }
 0x25e   : > { %v1415_v15 = vpop.f32.mrf.mxu0 }
 0x25f   : > { %v1416_v31 = vadd.f32 %v1415_v15, %v5459_v13  ;;  %v1504_v17 = vpop.f32.mrf.mxu1 }
 0x260   : > { %v1548_v48 = vpop.f32.mrf.mxu2 }
 0x261   : > { %v1505_v18 = vadd.f32 %v1504_v17, %v1416_v31  ;;  %v1549_v45 = vadd.f32 %v1548_v48, %v5612_v3  ;;  %v1637_v36 = vpop.f32.mrf.mxu3  ;;  %v4196_v17 = vld [vmem:[#allocation2 + $0x140] sm:$0xf]  ;;  %v4472_v48 = vld [vmem:[#allocation2 + $0x144] sm:$0xf0] }
 0x263   : > { %v1976_v58 = vmax.f32 %v1505_v18, 0.0  ;;  %v1638_v39 = vadd.f32 %v1637_v36, %v1549_v45  ;;  %v4197_v45 = vor.u32 %v4472_v48, %v4196_v17  ;;  %v4260_v36 = vld [vmem:[#allocation2 + $0x1c0] sm:$0xf] }
 0x265   : > { %v1905_v2 = vmax.f32 %v1638_v39, 0.0  ;;  %1590 = vmatmul.bf16.gmra.mxu2 %v5356_v59  ;;  %v5650_v40 = vpack.c.bf16 %v1976_v58, %v1972_v23  ;;  %v4488_v23 = vld [vmem:[#allocation2 + $0x1c4] sm:$0xf0]  ;;  %2646 = vmatpush.bf16.msrb.mxu0 %v4197_v45 }
 0x266   : > { %1679 = vmatmul.bf16.gmra.mxu3 %v5358_v61  ;;  %v1418_v42 = vpop.f32.mrf.mxu0 }
 0x267   : > { %6486 = vst [vmem:[#allocation24_spill] sm:$0xff] %v5650_v40  ;;  %v1419_v34 = vadd.f32 %v1418_v42, %v5459_v13  ;;  %v1507_v33 = vpop.f32.mrf.mxu1  ;;  %v5654_v30 = vpack.c.bf16 %v1905_v2, %v1901_v11  ;;  %v4261_v11 = vor.u32 %v4488_v23, %v4260_v36  ;;  %v4432_v36 = vld [vmem:[#allocation2 + $0x4] sm:$0xf0] }
 0x268   : > { %v1551_v14 = vpop.f32.mrf.mxu2 }
 0x269   : > { %6487 = vst [vmem:[#allocation25_spill] sm:$0xff] %v5654_v30  ;;  %v1508_v15 = vadd.f32 %v1507_v33, %v1419_v34  ;;  %v1552_v53 = vadd.f32 %v1551_v14, %v5612_v3  ;;  %v1640_v31 = vpop.f32.mrf.mxu3  ;;  %1733 = vmatmul.bf16.gmra.mxu0 %v5166_v0  ;;  %2735 = vmatpush.bf16.msrb.mxu1 %v4261_v11 }
 0x26a   : > { %1822 = vmatmul.bf16.gmra.mxu1 %v5168_v1 }
 0x26b   : > { %v1641_v9 = vadd.f32 %v1640_v31, %v1552_v53  ;;  %v1980_v0 = vmax.f32 %v1508_v15, 0.0 }
 0x26d   : > { %v1909_v53 = vmax.f32 %v1641_v9, 0.0 }
 0x26e   : > { %v1420_v18 = vpop.f32.mrf.mxu0 }
 0x26f   : > { %v1421_v58 = vadd.f32 %v1420_v18, %v5459_v13  ;;  %v1509_v39 = vpop.f32.mrf.mxu1  ;;  %v4036_v18 = vld [vmem:[#allocation2] sm:$0xf] }
 0x270   : > { %v1553_v2 = vpop.f32.mrf.mxu2 }
 0x271   : > { %v1510_v42 = vadd.f32 %v1509_v39, %v1421_v58  ;;  %v1554_v34 = vadd.f32 %v1553_v2, %v5612_v3  ;;  %v1642_v33 = vpop.f32.mrf.mxu3  ;;  %v4037_v58 = vor.u32 %v4432_v36, %v4036_v18 }
 0x273   : > { %v1984_v1 = vmax.f32 %v1510_v42, 0.0  ;;  %v1643_v14 = vadd.f32 %v1642_v33, %v1554_v34  ;;  %2472 = vmatpush.bf16.msra.mxu2 %v4037_v58  ;;  %v4100_v34 = vld [vmem:[#allocation2 + $0x80] sm:$0xf]  ;;  %v4448_v33 = vld [vmem:[#allocation2 + $0x84] sm:$0xf0] }
 0x275   : > { %v1913_v31 = vmax.f32 %v1643_v14, 0.0  ;;  %1595 = vmatmul.bf16.gmra.mxu2 %v5384_v50  ;;  %v5662_v17 = vpack.c.bf16 %v1984_v1, %v1980_v0  ;;  %v4101_v0 = vor.u32 %v4448_v33, %v4100_v34 }
 0x276   : > { %1684 = vmatmul.bf16.gmra.mxu3 %v5386_v52  ;;  %v1423_v48 = vpop.f32.mrf.mxu0 }
 0x277   : > { %6488 = vst [vmem:[#allocation26_spill] sm:$0xff] %v5662_v17  ;;  %v1424_v45 = vadd.f32 %v1423_v48, %v5459_v13  ;;  %v1512_v23 = vpop.f32.mrf.mxu1  ;;  %v5666_v39 = vpack.c.bf16 %v1913_v31, %v1909_v53  ;;  %2561 = vmatpush.bf16.msra.mxu3 %v4101_v0 }
 0x278   : > { %v1556_v15 = vpop.f32.mrf.mxu2 }
 0x279   : > { %6489 = vst [vmem:[#allocation27_spill] sm:$0xff] %v5666_v39  ;;  %v1513_v11 = vadd.f32 %v1512_v23, %v1424_v45  ;;  %v1557_v9 = vadd.f32 %v1556_v15, %v5612_v3  ;;  %v1645_v2 = vpop.f32.mrf.mxu3  ;;  %1738 = vmatmul.bf16.gmra.mxu0 %v5192_v27 }
 0x27a   : > { %1827 = vmatmul.bf16.gmra.mxu1 %v5194_v28 }
 0x27b   : > { %v1646_v42 = vadd.f32 %v1645_v2, %v1557_v9  ;;  %v1988_v45 = vmax.f32 %v1513_v11, 0.0 }
 0x27d   : > { %v1917_v58 = vmax.f32 %v1646_v42, 0.0 }
 0x27e   : > { %v1425_v1 = vpop.f32.mrf.mxu0 }
 0x27f   : > { %v1426_v14 = vadd.f32 %v1425_v1, %v5459_v13  ;;  %v1514_v53 = vpop.f32.mrf.mxu1 }
 0x280   : > { %v1558_v31 = vpop.f32.mrf.mxu2 }
 0x281   : > { %v1515_v48 = vadd.f32 %v1514_v53, %v1426_v14  ;;  %v1559_v18 = vadd.f32 %v1558_v31, %v5612_v3  ;;  %v1647_v36 = vpop.f32.mrf.mxu3  ;;  %v4188_v53 = vld [vmem:[#allocation2 + $0x130] sm:$0xf]  ;;  %v4470_v31 = vld [vmem:[#allocation2 + $0x134] sm:$0xf0] }
 0x283   : > { %v1992_v23 = vmax.f32 %v1515_v48, 0.0  ;;  %v1648_v27 = vadd.f32 %v1647_v36, %v1559_v18  ;;  %v4189_v18 = vor.u32 %v4470_v31, %v4188_v53  ;;  %v4252_v36 = vld [vmem:[#allocation2 + $0x1b0] sm:$0xf] }
 0x285   : > { %v1921_v15 = vmax.f32 %v1648_v27, 0.0  ;;  %1600 = vmatmul.bf16.gmra.mxu2 %v5412_v44  ;;  %v5674_v28 = vpack.c.bf16 %v1992_v23, %v1988_v45  ;;  %v4486_v45 = vld [vmem:[#allocation2 + $0x1b4] sm:$0xf0]  ;;  %2647 = vmatpush.bf16.msrb.mxu0 %v4189_v18 }
 0x286   : > { %1689 = vmatmul.bf16.gmra.mxu3 %v5414_v51  ;;  %v1428_v9 = vpop.f32.mrf.mxu0 }
 0x287   : > { %6490 = vst [vmem:[#allocation28_spill] sm:$0xff] %v5674_v28  ;;  %v1429_v2 = vadd.f32 %v1428_v9, %v5459_v13  ;;  %v1517_v34 = vpop.f32.mrf.mxu1  ;;  %v5678_v33 = vpack.c.bf16 %v1921_v15, %v1917_v58  ;;  %v4253_v58 = vor.u32 %v4486_v45, %v4252_v36  ;;  %v4094_v36 = vld [vmem:[#allocation2 + $0x78] sm:$0xf0] }
 0x288   : > { %v1561_v0 = vpop.f32.mrf.mxu2 }
 0x289   : > { %6491 = vst [vmem:[#allocation29_spill] sm:$0xff] %v5678_v33  ;;  %v1518_v1 = vadd.f32 %v1517_v34, %v1429_v2  ;;  %v1562_v11 = vadd.f32 %v1561_v0, %v5612_v3  ;;  %v1650_v14 = vpop.f32.mrf.mxu3  ;;  %1743 = vmatmul.bf16.gmra.mxu0 %v5218_v56  ;;  %2736 = vmatpush.bf16.msrb.mxu1 %v4253_v58 }
 0x28a   : > { %1832 = vmatmul.bf16.gmra.mxu1 %v5220_v57 }
 0x28b   : > { %v1651_v42 = vadd.f32 %v1650_v14, %v1562_v11  ;;  %v1996_v56 = vmax.f32 %v1518_v1, 0.0 }
 0x28d   : > { %v1925_v11 = vmax.f32 %v1651_v42, 0.0 }
 0x28e   : > { %v1430_v48 = vpop.f32.mrf.mxu0 }
 0x28f   : > { %v1431_v23 = vadd.f32 %v1430_v48, %v5459_v13  ;;  %v1519_v27 = vpop.f32.mrf.mxu1  ;;  %v4445_v48 = vld [vmem:[#allocation2 + $0x74] sm:$0xf] }
 0x290   : > { %v1563_v15 = vpop.f32.mrf.mxu2 }
 0x291   : > { %v1520_v9 = vadd.f32 %v1519_v27, %v1431_v23  ;;  %v1564_v2 = vadd.f32 %v1563_v15, %v5612_v3  ;;  %v1652_v34 = vpop.f32.mrf.mxu3  ;;  %v4097_v23 = vor.u32 %v4445_v48, %v4094_v36 }
 0x293   : > { %v2000_v57 = vmax.f32 %v1520_v9, 0.0  ;;  %v1653_v0 = vadd.f32 %v1652_v34, %v1564_v2  ;;  %2821 = vmatpush.bf16.msrb.mxu2 %v4097_v23  ;;  %v4461_v2 = vld [vmem:[#allocation2 + $0xf4] sm:$0xf]  ;;  %v4158_v34 = vld [vmem:[#allocation2 + $0xf8] sm:$0xf0]  ;;  %v5698_v23 = vperm.slane %v5609_v62, 3 }
 0x295   : > { %v1929_v14 = vmax.f32 %v1653_v0, 0.0  ;;  %1605 = vmatmul.bf16.gmra.mxu2 %v5440_v55  ;;  %v5686_v53 = vpack.c.bf16 %v2000_v57, %v1996_v56  ;;  %v4161_v56 = vor.u32 %v4461_v2, %v4158_v34 }
 0x296   : > { %1694 = vmatmul.bf16.gmra.mxu3 %v5442_v60  ;;  %v1433_v31 = vpop.f32.mrf.mxu0 }
 0x297   : > { %v1434_v18 = vadd.f32 %v1433_v31, %v5459_v13  ;;  %v1522_v45 = vpop.f32.mrf.mxu1  ;;  %v5690_v27 = vpack.c.bf16 %v1929_v14, %v1925_v11  ;;  %2910 = vmatpush.bf16.msrb.mxu3 %v4161_v56 }
 0x298   : > { %v1566_v1 = vpop.f32.mrf.mxu2 }
 0x299   : > { %6492 = vst [vmem:[#allocation30_spill] sm:$0xff] %v5690_v27  ;;  %v1523_v58 = vadd.f32 %v1522_v45, %v1434_v18  ;;  %v1567_v42 = vadd.f32 %v1566_v1, %v5612_v3  ;;  %v1655_v15 = vpop.f32.mrf.mxu3  ;;  %1748 = vmatmul.bf16.gmra.mxu0 %v5242_v19 }
 0x29a   : > { %1837 = vmatmul.bf16.gmra.mxu1 %v5244_v20 }
 0x29b   : > { %v1656_v9 = vadd.f32 %v1655_v15, %v1567_v42  ;;  %v2004_v18 = vmax.f32 %v1523_v58, 0.0 }
 0x29d   : > { %v1933_v20 = vmax.f32 %v1656_v9, 0.0 }
 0x29e   : > { %v1435_v57 = vpop.f32.mrf.mxu0 }
 0x29f   : > { %v1436_v0 = vadd.f32 %v1435_v57, %v5459_v13  ;;  %v1524_v11 = vpop.f32.mrf.mxu1 }
 0x2a0   : > { %v1568_v14 = vpop.f32.mrf.mxu2 }
 0x2a1   : > { %v1525_v31 = vadd.f32 %v1524_v11, %v1436_v0  ;;  %v1569_v48 = vadd.f32 %v1568_v14, %v5612_v3  ;;  %v1657_v36 = vpop.f32.mrf.mxu3  ;;  %v4180_v0 = vld [vmem:[#allocation2 + $0x120] sm:$0xf]  ;;  %v4468_v11 = vld [vmem:[#allocation2 + $0x124] sm:$0xf0] }
 0x2a3   : > { %v2008_v45 = vmax.f32 %v1525_v31, 0.0  ;;  %v1658_v19 = vadd.f32 %v1657_v36, %v1569_v48  ;;  %v4181_v31 = vor.u32 %v4468_v11, %v4180_v0  ;;  %v4244_v48 = vld [vmem:[#allocation2 + $0x1a0] sm:$0xf]  ;;  %v4484_v36 = vld [vmem:[#allocation2 + $0x1a4] sm:$0xf0] }
 0x2a4   : > { %v4443_v11 = vld [vmem:[#allocation2 + $0x64] sm:$0xf] }
 0x2a5   : > { %v1937_v1 = vmax.f32 %v1658_v19, 0.0  ;;  %1610 = vmatmul.bf16.gmra.mxu2 %v5456_v12  ;;  %v5701_v42 = vpack.c.bf16 %v2008_v45, %v2004_v18  ;;  %v4245_v19 = vor.u32 %v4484_v36, %v4244_v48  ;;  %2648 = vmatpush.bf16.msrb.mxu0 %v4181_v31 }
 0x2a6   : > { %1699 = vmatmul.bf16.gmra.mxu3 %v5461_v16  ;;  %v1714_v13 = vpop.f32.mrf.mxu0 }
 0x2a7   : > { %6493 = vst [vmem:[#allocation31_spill] sm:$0xff] %v5701_v42  ;;  %v1715_v15 = vadd.f32 %v1714_v13, %v5698_v23  ;;  %v1803_v2 = vpop.f32.mrf.mxu1  ;;  %v5705_v34 = vpack.c.bf16 %v1937_v1, %v1933_v20  ;;  %2737 = vmatpush.bf16.msrb.mxu1 %v4245_v19 }
 0x2a8   : > { %v1571_v58 = vpop.f32.mrf.mxu2 }
 0x2a9   : > { %6494 = vst [vmem:[#allocation32_spill] sm:$0xff] %v5705_v34  ;;  %v1804_v56 = vadd.f32 %v1803_v2, %v1715_v15  ;;  %v1572_v57 = vadd.f32 %v1571_v58, %v5612_v3  ;;  %v1660_v62 = vpop.f32.mrf.mxu3  ;;  %1753 = vmatmul.bf16.gmra.mxu0 %v5271_v46 }
 0x2aa   : > { %1842 = vmatmul.bf16.gmra.mxu1 %v5273_v47 }
 0x2ab   : > { %v1661_v9 = vadd.f32 %v1660_v62, %v1572_v57  ;;  %v1886_v46 = vmax.f32 %v1804_v56, 0.0 }
 0x2ad   : > { %v1941_v58 = vmax.f32 %v1661_v9, 0.0 }
 0x2ae   : > { %v1716_v14 = vpop.f32.mrf.mxu0 }
 0x2af   : > { %v1717_v18 = vadd.f32 %v1716_v14, %v5698_v23  ;;  %v1805_v45 = vpop.f32.mrf.mxu1  ;;  %v4086_v14 = vld [vmem:[#allocation2 + $0x68] sm:$0xf0] }
 0x2b0   : > { %v1573_v20 = vpop.f32.mrf.mxu2  ;;  %v4089_v36 = vor.u32 %v4443_v11, %v4086_v14 }
 0x2b1   : > { %v1806_v1 = vadd.f32 %v1805_v45, %v1717_v18  ;;  %v1574_v13 = vadd.f32 %v1573_v20, %v5612_v3  ;;  %v1662_v15 = vpop.f32.mrf.mxu3 }
 0x2b2   : > { %2822 = vmatpush.bf16.msrb.mxu2 %v4089_v36 }
 0x2b3   : > { %v1890_v47 = vmax.f32 %v1806_v1, 0.0  ;;  %v1663_v2 = vadd.f32 %v1662_v15, %v1574_v13  ;;  %v4459_v1 = vld [vmem:[#allocation2 + $0xe4] sm:$0xf]  ;;  %v4150_v13 = vld [vmem:[#allocation2 + $0xe8] sm:$0xf0] }
 0x2b4   : > { %v4153_v15 = vor.u32 %v4459_v1, %v4150_v13 }
 0x2b5   : > { %v5712_v57 = vpack.c.bf16 %v1890_v47, %v1886_v46  ;;  %v1945_v62 = vmax.f32 %v1663_v2, 0.0  ;;  %2473 = vmatmul.bf16.vlgmr.msra.gmra.mxu2 %v5306_v32 }
 0x2b6   : > { %2562 = vmatmul.bf16.vlgmr.msra.gmra.mxu3 %v5485_v25  ;;  %v1719_v0 = vpop.f32.mrf.mxu0 }
 0x2b7   : > { %6495 = vst [vmem:[#allocation33_spill] sm:$0xff] %v5712_v57  ;;  %v1720_v31 = vadd.f32 %v1719_v0, %v5698_v23  ;;  %v1808_v48 = vpop.f32.mrf.mxu1  ;;  %v5717_v18 = vpack.c.bf16 %v1945_v62, %v1941_v58  ;;  %2911 = vmatpush.bf16.msrb.mxu3 %v4153_v15 }
 0x2b8   : > { %v1576_v56 = vpop.f32.mrf.mxu2 }
 0x2b9   : > { %6496 = vst [vmem:[#allocation34_spill] sm:$0xff] %v5717_v18  ;;  %v1809_v45 = vadd.f32 %v1808_v48, %v1720_v31  ;;  %v1577_v9 = vadd.f32 %v1576_v56, %v5612_v3  ;;  %v1665_v19 = vpop.f32.mrf.mxu3  ;;  %1758 = vmatmul.bf16.gmra.mxu0 %v5300_v22 }
 0x2ba   : > { %1847 = vmatmul.bf16.gmra.mxu1 %v5302_v24 }
 0x2bb   : > { %v1666_v20 = vadd.f32 %v1665_v19, %v1577_v9  ;;  %v1894_v14 = vmax.f32 %v1809_v45, 0.0 }
 0x2bd   : > { %v1949_v48 = vmax.f32 %v1666_v20, 0.0 }
 0x2be   : > { %v1721_v46 = vpop.f32.mrf.mxu0 }
 0x2bf   : > { %v1722_v47 = vadd.f32 %v1721_v46, %v5698_v23  ;;  %v1810_v2 = vpop.f32.mrf.mxu1 }
 0x2c0   : > { %v1578_v58 = vpop.f32.mrf.mxu2 }
 0x2c1   : > { %v1811_v62 = vadd.f32 %v1810_v2, %v1722_v47  ;;  %v1579_v0 = vadd.f32 %v1578_v58, %v5612_v3  ;;  %v1667_v11 = vpop.f32.mrf.mxu3  ;;  %v4172_v47 = vld [vmem:[#allocation2 + $0x110] sm:$0xf]  ;;  %v4466_v2 = vld [vmem:[#allocation2 + $0x114] sm:$0xf0] }
 0x2c3   : > { %v1898_v31 = vmax.f32 %v1811_v62, 0.0  ;;  %v1668_v22 = vadd.f32 %v1667_v11, %v1579_v0  ;;  %v4173_v62 = vor.u32 %v4466_v2, %v4172_v47  ;;  %v4236_v0 = vld [vmem:[#allocation2 + $0x190] sm:$0xf]  ;;  %v4482_v11 = vld [vmem:[#allocation2 + $0x194] sm:$0xf0] }
 0x2c4   : > { %v4441_v2 = vld [vmem:[#allocation2 + $0x54] sm:$0xf] }
 0x2c5   : > { %v1953_v36 = vmax.f32 %v1668_v22, 0.0  ;;  %2478 = vmatmul.bf16.gmra.mxu2 %v5340_v21  ;;  %v5725_v24 = vpack.c.bf16 %v1898_v31, %v1894_v14  ;;  %v4237_v22 = vor.u32 %v4482_v11, %v4236_v0  ;;  %2649 = vmatpush.bf16.msrb.mxu0 %v4173_v62 }
 0x2c6   : > { %2567 = vmatmul.bf16.gmra.mxu3 %v5498_v38  ;;  %v1724_v56 = vpop.f32.mrf.mxu0 }
 0x2c7   : > { %6497 = vst [vmem:[#allocation35_spill] sm:$0xff] %v5725_v24  ;;  %v1725_v9 = vadd.f32 %v1724_v56, %v5698_v23  ;;  %v1813_v19 = vpop.f32.mrf.mxu1  ;;  %v5729_v1 = vpack.c.bf16 %v1953_v36, %v1949_v48  ;;  %2738 = vmatpush.bf16.msrb.mxu1 %v4237_v22 }
 0x2c8   : > { %v1581_v13 = vpop.f32.mrf.mxu2 }
 0x2c9   : > { %6498 = vst [vmem:[#allocation36_spill] sm:$0xff] %v5729_v1  ;;  %v1814_v15 = vadd.f32 %v1813_v19, %v1725_v9  ;;  %v1582_v45 = vadd.f32 %v1581_v13, %v5612_v3  ;;  %v1670_v46 = vpop.f32.mrf.mxu3  ;;  %1763 = vmatmul.bf16.gmra.mxu0 %v5328_v5 }
 0x2ca   : > { %1852 = vmatmul.bf16.gmra.mxu1 %v5330_v7 }
 0x2cb   : > { %v1671_v20 = vadd.f32 %v1670_v46, %v1582_v45  ;;  %v1902_v5 = vmax.f32 %v1814_v15, 0.0 }
 0x2cd   : > { %v1957_v13 = vmax.f32 %v1671_v20, 0.0 }
 0x2ce   : > { %v1726_v58 = vpop.f32.mrf.mxu0 }
 0x2cf   : > { %v1727_v14 = vadd.f32 %v1726_v58, %v5698_v23  ;;  %v1815_v31 = vpop.f32.mrf.mxu1  ;;  %v4078_v58 = vld [vmem:[#allocation2 + $0x58] sm:$0xf0] }
 0x2d0   : > { %v1583_v48 = vpop.f32.mrf.mxu2  ;;  %v4081_v11 = vor.u32 %v4441_v2, %v4078_v58 }
 0x2d1   : > { %v1816_v36 = vadd.f32 %v1815_v31, %v1727_v14  ;;  %v1584_v56 = vadd.f32 %v1583_v48, %v5612_v3  ;;  %v1672_v9 = vpop.f32.mrf.mxu3 }
 0x2d2   : > { %2823 = vmatpush.bf16.msrb.mxu2 %v4081_v11 }
 0x2d3   : > { %v1906_v7 = vmax.f32 %v1816_v36, 0.0  ;;  %v1673_v19 = vadd.f32 %v1672_v9, %v1584_v56  ;;  %v4457_v36 = vld [vmem:[#allocation2 + $0xd4] sm:$0xf]  ;;  %v4142_v56 = vld [vmem:[#allocation2 + $0xd8] sm:$0xf0] }
 0x2d4   : > { %v4145_v9 = vor.u32 %v4457_v36, %v4142_v56 }
 0x2d5   : > { %v1961_v45 = vmax.f32 %v1673_v19, 0.0  ;;  %2483 = vmatmul.bf16.gmra.mxu2 %v5362_v4  ;;  %v5737_v46 = vpack.c.bf16 %v1906_v7, %v1902_v5 }
 0x2d6   : > { %2572 = vmatmul.bf16.gmra.mxu3 %v5522_v10  ;;  %v1729_v47 = vpop.f32.mrf.mxu0 }
 0x2d7   : > { %6499 = vst [vmem:[#allocation37_spill] sm:$0xff] %v5737_v46  ;;  %v1730_v62 = vadd.f32 %v1729_v47, %v5698_v23  ;;  %v1818_v0 = vpop.f32.mrf.mxu1  ;;  %v5741_v14 = vpack.c.bf16 %v1961_v45, %v1957_v13  ;;  %2912 = vmatpush.bf16.msrb.mxu3 %v4145_v9 }
 0x2d8   : > { %v1586_v15 = vpop.f32.mrf.mxu2 }
 0x2d9   : > { %v1819_v31 = vadd.f32 %v1818_v0, %v1730_v62  ;;  %v1587_v20 = vadd.f32 %v1586_v15, %v5612_v3  ;;  %v1675_v22 = vpop.f32.mrf.mxu3  ;;  %1768 = vmatmul.bf16.gmra.mxu0 %v5356_v59 }
 0x2da   : > { %1857 = vmatmul.bf16.gmra.mxu1 %v5358_v61 }
 0x2db   : > { %v1676_v48 = vadd.f32 %v1675_v22, %v1587_v20  ;;  %v1910_v58 = vmax.f32 %v1819_v31, 0.0 }
 0x2dd   : > { %v1965_v0 = vmax.f32 %v1676_v48, 0.0 }
 0x2de   : > { %v1731_v5 = vpop.f32.mrf.mxu0 }
 0x2df   : > { %v1732_v7 = vadd.f32 %v1731_v5, %v5698_v23  ;;  %v1820_v19 = vpop.f32.mrf.mxu1 }
 0x2e0   : > { %v1588_v13 = vpop.f32.mrf.mxu2 }
 0x2e1   : > { %v1821_v45 = vadd.f32 %v1820_v19, %v1732_v7  ;;  %v1589_v47 = vadd.f32 %v1588_v13, %v5612_v3  ;;  %v1677_v2 = vpop.f32.mrf.mxu3  ;;  %v4164_v7 = vld [vmem:[#allocation2 + $0x100] sm:$0xf]  ;;  %v4464_v19 = vld [vmem:[#allocation2 + $0x104] sm:$0xf0] }
 0x2e3   : > { %v1914_v62 = vmax.f32 %v1821_v45, 0.0  ;;  %v1678_v59 = vadd.f32 %v1677_v2, %v1589_v47  ;;  %v4165_v45 = vor.u32 %v4464_v19, %v4164_v7  ;;  %v4228_v47 = vld [vmem:[#allocation2 + $0x180] sm:$0xf]  ;;  %v4480_v2 = vld [vmem:[#allocation2 + $0x184] sm:$0xf0] }
 0x2e4   : > { %v4439_v19 = vld [vmem:[#allocation2 + $0x44] sm:$0xf] }
 0x2e5   : > { %v1969_v11 = vmax.f32 %v1678_v59, 0.0  ;;  %2488 = vmatmul.bf16.gmra.mxu2 %v5396_v6  ;;  %v5749_v61 = vpack.c.bf16 %v1914_v62, %v1910_v58  ;;  %v4229_v59 = vor.u32 %v4480_v2, %v4228_v47  ;;  %2650 = vmatpush.bf16.msrb.mxu0 %v4165_v45 }
 0x2e6   : > { %2577 = vmatmul.bf16.gmra.mxu3 %v5534_v49  ;;  %v1734_v15 = vpop.f32.mrf.mxu0 }
 0x2e7   : > { %6500 = vst [vmem:[#allocation38_spill] sm:$0xff] %v5749_v61  ;;  %v1735_v20 = vadd.f32 %v1734_v15, %v5698_v23  ;;  %v1823_v22 = vpop.f32.mrf.mxu1  ;;  %v5753_v36 = vpack.c.bf16 %v1969_v11, %v1965_v0  ;;  %2739 = vmatpush.bf16.msrb.mxu1 %v4229_v59 }
 0x2e8   : > { %v1591_v56 = vpop.f32.mrf.mxu2 }
 0x2e9   : > { %v1824_v9 = vadd.f32 %v1823_v22, %v1735_v20  ;;  %v1592_v31 = vadd.f32 %v1591_v56, %v5612_v3  ;;  %v1680_v5 = vpop.f32.mrf.mxu3  ;;  %1773 = vmatmul.bf16.gmra.mxu0 %v5384_v50 }
 0x2ea   : > { %1862 = vmatmul.bf16.gmra.mxu1 %v5386_v52 }
 0x2eb   : > { %v1681_v48 = vadd.f32 %v1680_v5, %v1592_v31  ;;  %v1918_v50 = vmax.f32 %v1824_v9, 0.0 }
 0x2ed   : > { %v1973_v56 = vmax.f32 %v1681_v48, 0.0 }
 0x2ee   : > { %v1736_v13 = vpop.f32.mrf.mxu0 }
 0x2ef   : > { %v1737_v58 = vadd.f32 %v1736_v13, %v5698_v23  ;;  %v1825_v62 = vpop.f32.mrf.mxu1  ;;  %v4070_v13 = vld [vmem:[#allocation2 + $0x48] sm:$0xf0] }
 0x2f0   : > { %v1593_v0 = vpop.f32.mrf.mxu2  ;;  %v4073_v2 = vor.u32 %v4439_v19, %v4070_v13 }
 0x2f1   : > { %v1826_v11 = vadd.f32 %v1825_v62, %v1737_v58  ;;  %v1594_v15 = vadd.f32 %v1593_v0, %v5612_v3  ;;  %v1682_v20 = vpop.f32.mrf.mxu3 }
 0x2f2   : > { %2824 = vmatpush.bf16.msrb.mxu2 %v4073_v2 }
 0x2f3   : > { %v1922_v52 = vmax.f32 %v1826_v11, 0.0  ;;  %v1683_v22 = vadd.f32 %v1682_v20, %v1594_v15  ;;  %v4455_v11 = vld [vmem:[#allocation2 + $0xc4] sm:$0xf]  ;;  %v4134_v15 = vld [vmem:[#allocation2 + $0xc8] sm:$0xf0] }
 0x2f4   : > { %v4137_v20 = vor.u32 %v4455_v11, %v4134_v15 }
 0x2f5   : > { %v1977_v31 = vmax.f32 %v1683_v22, 0.0  ;;  %2493 = vmatmul.bf16.gmra.mxu2 %v5418_v63  ;;  %v5761_v5 = vpack.c.bf16 %v1922_v52, %v1918_v50 }
 0x2f6   : > { %2582 = vmatmul.bf16.gmra.mxu3 %v5558_v41  ;;  %v1739_v7 = vpop.f32.mrf.mxu0 }
 0x2f7   : > { %6501 = vst [vmem:[#allocation39_spill] sm:$0xff] %v5761_v5  ;;  %v1740_v45 = vadd.f32 %v1739_v7, %v5698_v23  ;;  %v1828_v47 = vpop.f32.mrf.mxu1  ;;  %v5765_v58 = vpack.c.bf16 %v1977_v31, %v1973_v56  ;;  %2913 = vmatpush.bf16.msrb.mxu3 %v4137_v20 }
 0x2f8   : > { %v1596_v9 = vpop.f32.mrf.mxu2 }
 0x2f9   : > { %v1829_v62 = vadd.f32 %v1828_v47, %v1740_v45  ;;  %v1597_v48 = vadd.f32 %v1596_v9, %v5612_v3  ;;  %v1685_v59 = vpop.f32.mrf.mxu3  ;;  %1778 = vmatmul.bf16.gmra.mxu0 %v5412_v44 }
 0x2fa   : > { %1867 = vmatmul.bf16.gmra.mxu1 %v5414_v51  ;;  %v6502_v51 = vld [vmem:[#allocation8_spill] sm:$0xff] }
 0x2fb   : > { %v1686_v0 = vadd.f32 %v1685_v59, %v1597_v48  ;;  %v1926_v13 = vmax.f32 %v1829_v62, 0.0  ;;  %v6504_v48 = vld [vmem:[#allocation15_spill] sm:$0xff] }
 0x2fd   : > { %v1981_v47 = vmax.f32 %v1686_v0, 0.0 }
 0x2fe   : > { %v1741_v50 = vpop.f32.mrf.mxu0 }
 0x2ff   : > { %v1742_v52 = vadd.f32 %v1741_v50, %v5698_v23  ;;  %v1830_v22 = vpop.f32.mrf.mxu1 }
 0x300   : > { %v1598_v56 = vpop.f32.mrf.mxu2 }
 0x301   : > { %v1831_v31 = vadd.f32 %v1830_v22, %v1742_v52  ;;  %v1599_v7 = vadd.f32 %v1598_v56, %v5612_v3  ;;  %v1687_v19 = vpop.f32.mrf.mxu3  ;;  %v4477_v56 = vld [vmem:[#allocation2 + $0x174] sm:$0xf] }
 0x303   : > { %v1930_v45 = vmax.f32 %v1831_v31, 0.0  ;;  %v1688_v44 = vadd.f32 %v1687_v19, %v1599_v7  ;;  %v4222_v31 = vld [vmem:[#allocation2 + $0x178] sm:$0xf0] }
 0x304   : > { %v4225_v19 = vor.u32 %v4477_v56, %v4222_v31 }
 0x305   : > { %v1985_v2 = vmax.f32 %v1688_v44, 0.0  ;;  %2498 = vmatmul.bf16.gmra.mxu2 %v6502_v51  ;;  %v5773_v9 = vpack.c.bf16 %v1930_v45, %v1926_v13  ;;  %v4493_v13 = vld [vmem:[#allocation2 + $0x1f4] sm:$0xf]  ;;  %v4286_v45 = vld [vmem:[#allocation2 + $0x1f8] sm:$0xf0]  ;;  %v6505_v51 = vld [vmem:[#allocation9_spill] sm:$0xff] }
 0x306   : > { %2587 = vmatmul.bf16.gmra.mxu3 %v6504_v48  ;;  %v1744_v59 = vpop.f32.mrf.mxu0  ;;  %2999 = vmatpush.bf16.msra.mxu0 %v4225_v19 }
 0x307   : > { %6503 = vst [vmem:[#allocation40_spill] sm:$0xff] %v5773_v9  ;;  %v1745_v11 = vadd.f32 %v1744_v59, %v5698_v23  ;;  %v1833_v15 = vpop.f32.mrf.mxu1  ;;  %v5777_v20 = vpack.c.bf16 %v1985_v2, %v1981_v47  ;;  %v4289_v2 = vor.u32 %v4493_v13, %v4286_v45  ;;  %v4062_v13 = vld [vmem:[#allocation2 + $0x38] sm:$0xf0] }
 0x308   : > { %v1601_v50 = vpop.f32.mrf.mxu2 }
 0x309   : > { %v1834_v52 = vadd.f32 %v1833_v15, %v1745_v11  ;;  %v1602_v62 = vadd.f32 %v1601_v50, %v5612_v3  ;;  %v1690_v22 = vpop.f32.mrf.mxu3  ;;  %1783 = vmatmul.bf16.gmra.mxu0 %v5440_v55  ;;  %3088 = vmatpush.bf16.msra.mxu1 %v4289_v2 }
 0x30a   : > { %1872 = vmatmul.bf16.gmra.mxu1 %v5442_v60 }
 0x30b   : > { %v1691_v0 = vadd.f32 %v1690_v22, %v1602_v62  ;;  %v1934_v55 = vmax.f32 %v1834_v52, 0.0 }
 0x30d   : > { %v1989_v22 = vmax.f32 %v1691_v0, 0.0 }
 0x30e   : > { %v1746_v7 = vpop.f32.mrf.mxu0 }
 0x30f   : > { %v1747_v44 = vadd.f32 %v1746_v7, %v5698_v23  ;;  %v1835_v47 = vpop.f32.mrf.mxu1  ;;  %v4437_v7 = vld [vmem:[#allocation2 + $0x34] sm:$0xf] }
 0x310   : > { %v1603_v59 = vpop.f32.mrf.mxu2 }
 0x311   : > { %v1836_v11 = vadd.f32 %v1835_v47, %v1747_v44  ;;  %v1604_v15 = vadd.f32 %v1603_v59, %v5612_v3  ;;  %v1692_v50 = vpop.f32.mrf.mxu3  ;;  %v4065_v44 = vor.u32 %v4437_v7, %v4062_v13 }
 0x313   : > { %v1938_v60 = vmax.f32 %v1836_v11, 0.0  ;;  %v1693_v62 = vadd.f32 %v1692_v50, %v1604_v15  ;;  %2825 = vmatpush.bf16.msrb.mxu2 %v4065_v44  ;;  %v4453_v15 = vld [vmem:[#allocation2 + $0xb4] sm:$0xf]  ;;  %v4126_v50 = vld [vmem:[#allocation2 + $0xb8] sm:$0xf0] }
 0x315   : > { %v1993_v48 = vmax.f32 %v1693_v62, 0.0  ;;  %2503 = vmatmul.bf16.gmra.mxu2 %v6505_v51  ;;  %v5785_v56 = vpack.c.bf16 %v1938_v60, %v1934_v55  ;;  %v4129_v55 = vor.u32 %v4453_v15, %v4126_v50 }
 0x316   : > { %2592 = vmatmul.bf16.gmra.mxu3 %v5582_v43  ;;  %v1749_v31 = vpop.f32.mrf.mxu0 }
 0x317   : > { %6506 = vst [vmem:[#allocation9_spill] sm:$0xff] %v5785_v56  ;;  %v1750_v19 = vadd.f32 %v1749_v31, %v5698_v23  ;;  %v1838_v45 = vpop.f32.mrf.mxu1  ;;  %v5789_v47 = vpack.c.bf16 %v1993_v48, %v1989_v22  ;;  %2914 = vmatpush.bf16.msrb.mxu3 %v4129_v55 }
 0x318   : > { %v1606_v52 = vpop.f32.mrf.mxu2 }
 0x319   : > { %v1839_v2 = vadd.f32 %v1838_v45, %v1750_v19  ;;  %v1607_v0 = vadd.f32 %v1606_v52, %v5612_v3  ;;  %v1695_v59 = vpop.f32.mrf.mxu3  ;;  %1788 = vmatmul.bf16.gmra.mxu0 %v5456_v12 }
 0x31a   : > { %1877 = vmatmul.bf16.gmra.mxu1 %v5461_v16  ;;  %v6507_v16 = vld [vmem:[#allocation10_spill] sm:$0xff] }
 0x31b   : > { %v1696_v11 = vadd.f32 %v1695_v59, %v1607_v0  ;;  %v1942_v19 = vmax.f32 %v1839_v2, 0.0 }
 0x31d   : > { %v1997_v44 = vmax.f32 %v1696_v11, 0.0 }
 0x31e   : > { %v1751_v60 = vpop.f32.mrf.mxu0 }
 0x31f   : > { %v1752_v62 = vadd.f32 %v1751_v60, %v5698_v23  ;;  %v1840_v48 = vpop.f32.mrf.mxu1 }
 0x320   : > { %v1608_v22 = vpop.f32.mrf.mxu2 }
 0x321   : > { %v1841_v31 = vadd.f32 %v1840_v48, %v1752_v62  ;;  %v1609_v7 = vadd.f32 %v1608_v22, %v5612_v3  ;;  %v1697_v13 = vpop.f32.mrf.mxu3  ;;  %v4475_v22 = vld [vmem:[#allocation2 + $0x164] sm:$0xf] }
 0x323   : > { %v1946_v45 = vmax.f32 %v1841_v31, 0.0  ;;  %v1698_v12 = vadd.f32 %v1697_v13, %v1609_v7  ;;  %v4214_v31 = vld [vmem:[#allocation2 + $0x168] sm:$0xf0]  ;;  %v4491_v13 = vld [vmem:[#allocation2 + $0x1e4] sm:$0xf] }
 0x324   : > { %v4217_v7 = vor.u32 %v4475_v22, %v4214_v31 }
 0x325   : > { %v2001_v52 = vmax.f32 %v1698_v12, 0.0  ;;  %2508 = vmatmul.bf16.gmra.mxu2 %v6507_v16  ;;  %v5797_v0 = vpack.c.bf16 %v1946_v45, %v1942_v19  ;;  %v4278_v19 = vld [vmem:[#allocation2 + $0x1e8] sm:$0xf0] }
 0x326   : > { %2597 = vmatmul.bf16.gmra.mxu3 %v5594_v37  ;;  %v1754_v59 = vpop.f32.mrf.mxu0  ;;  %v4281_v45 = vor.u32 %v4491_v13, %v4278_v19  ;;  %3000 = vmatpush.bf16.msra.mxu0 %v4217_v7  ;;  %v6510_v7 = vld [vmem:[#allocation11_spill] sm:$0xff] }
 0x327   : > { %6508 = vst [vmem:[#allocation10_spill] sm:$0xff] %v5797_v0  ;;  %v1755_v15 = vadd.f32 %v1754_v59, %v5698_v23  ;;  %v1843_v50 = vpop.f32.mrf.mxu1  ;;  %v5801_v55 = vpack.c.bf16 %v2001_v52, %v1997_v44 }
 0x328   : > { %v1611_v60 = vpop.f32.mrf.mxu2  ;;  %3089 = vmatpush.bf16.msra.mxu1 %v4281_v45 }
 0x329   : > { %v1844_v62 = vadd.f32 %v1843_v50, %v1755_v15  ;;  %v1612_v2 = vadd.f32 %v1611_v60, %v5612_v3  ;;  %v1700_v48 = vpop.f32.mrf.mxu3  ;;  %2651 = vmatmul.bf16.vlgmr.msrb.gmra.mxu0 %v5629_v8 }
 0x32a   : > { %2740 = vmatmul.bf16.vlgmr.msrb.gmra.mxu1 %v5712_v57 }
 0x32b   : > { %v1701_v11 = vadd.f32 %v1700_v48, %v1612_v2  ;;  %v5811_v2 = vld [vmem:[%s6427_s6] sm:$0x3]  ;;  %v1950_v48 = vmax.f32 %v1844_v62, 0.0 }
 0x32c   : > { %6509 = vst [vmem:[#allocation41_spill] sm:$0xff] %v5811_v2 }
 0x32d   : > { %v2005_v13 = vmax.f32 %v1701_v11, 0.0 }
 0x32e   : > { %v1756_v12 = vpop.f32.mrf.mxu0 }
 0x32f   : > { %v1757_v44 = vadd.f32 %v1756_v12, %v5698_v23  ;;  %v1845_v52 = vpop.f32.mrf.mxu1  ;;  %v5815_v12 = vperm.slane %v5811_v2, 0 }
 0x330   : > { %v1613_v59 = vpop.f32.mrf.mxu2 }
 0x331   : > { %v1846_v15 = vadd.f32 %v1845_v52, %v1757_v44  ;;  %v1614_v50 = vadd.f32 %v1613_v59, %v5612_v3  ;;  %v1702_v60 = vpop.f32.mrf.mxu3  ;;  %v4435_v44 = vld [vmem:[#allocation2 + $0x24] sm:$0xf]  ;;  %v4054_v52 = vld [vmem:[#allocation2 + $0x28] sm:$0xf0] }
 0x332   : > { %v4057_v62 = vor.u32 %v4435_v44, %v4054_v52 }
 0x333   : > { %v1954_v22 = vmax.f32 %v1846_v15, 0.0  ;;  %v1703_v31 = vadd.f32 %v1702_v60, %v1614_v50 }
 0x334   : > { %2826 = vmatpush.bf16.msrb.mxu2 %v4057_v62 }
 0x335   : > { %v2009_v19 = vmax.f32 %v1703_v31, 0.0  ;;  %2513 = vmatmul.bf16.gmra.mxu2 %v6510_v7  ;;  %v5817_v45 = vpack.c.bf16 %v1954_v22, %v1950_v48  ;;  %v4451_v22 = vld [vmem:[#allocation2 + $0xa4] sm:$0xf]  ;;  %v6513_v7 = vld [vmem:[#allocation13_spill] sm:$0xff] }
 0x336   : > { %2602 = vmatmul.bf16.gmra.mxu3 %v5614_v29  ;;  %v1759_v3 = vpop.f32.mrf.mxu0  ;;  %v4118_v29 = vld [vmem:[#allocation2 + $0xa8] sm:$0xf0] }
 0x337   : > { %6511 = vst [vmem:[#allocation42_spill] sm:$0xff] %v5817_v45  ;;  %v1760_v59 = vadd.f32 %v1759_v3, %v5698_v23  ;;  %v1848_v57 = vpop.f32.mrf.mxu1  ;;  %v5821_v15 = vpack.c.bf16 %v2009_v19, %v2005_v13  ;;  %v4121_v2 = vor.u32 %v4451_v22, %v4118_v29 }
 0x338   : > { %v2474_v11 = vpop.f32.mrf.mxu2 }
 0x339   : > { %v1849_v50 = vadd.f32 %v1848_v57, %v1760_v59  ;;  %v2475_v60 = vadd.f32 %v2474_v11, %v5815_v12  ;;  %v2563_v31 = vpop.f32.mrf.mxu3  ;;  %2656 = vmatmul.bf16.gmra.mxu0 %v5642_v26  ;;  %2915 = vmatpush.bf16.msrb.mxu3 %v4121_v2 }
 0x33a   : > { %2745 = vmatmul.bf16.gmra.mxu1 %v5725_v24  ;;  %v6512_v24 = vld [vmem:[#allocation12_spill] sm:$0xff] }
 0x33b   : > { %v5826_v48 = vadd.f32 %v2563_v31, %v2475_v60  ;;  %v1958_v11 = vmax.f32 %v1849_v50, 0.0 }
 0x33e   : > { %v1761_v3 = vpop.f32.mrf.mxu0 }
 0x33f   : > { %v1762_v13 = vadd.f32 %v1761_v3, %v5698_v23  ;;  %v1850_v19 = vpop.f32.mrf.mxu1 }
 0x340   : > { %v2476_v44 = vpop.f32.mrf.mxu2 }
 0x341   : > { %v1851_v57 = vadd.f32 %v1850_v19, %v1762_v13  ;;  %v2477_v52 = vadd.f32 %v2476_v44, %v5815_v12  ;;  %v2565_v59 = vpop.f32.mrf.mxu3  ;;  %v4473_v44 = vld [vmem:[#allocation2 + $0x154] sm:$0xf] }
 0x343   : > { %v1962_v26 = vmax.f32 %v1851_v57, 0.0  ;;  %v5830_v62 = vadd.f32 %v2565_v59, %v2477_v52  ;;  %v4489_v52 = vld [vmem:[#allocation2 + $0x1d4] sm:$0xf]  ;;  %v4270_v59 = vld [vmem:[#allocation2 + $0x1d8] sm:$0xf0] }
 0x345   : > { %2518 = vmatmul.bf16.gmra.mxu2 %v6512_v24  ;;  %v5833_v60 = vpack.c.bf16 %v1962_v26, %v1958_v11  ;;  %v4206_v26 = vld [vmem:[#allocation2 + $0x158] sm:$0xf0]  ;;  %v4273_v11 = vor.u32 %v4489_v52, %v4270_v59 }
 0x346   : > { %2607 = vmatmul.bf16.gmra.mxu3 %v5626_v54  ;;  %v1764_v29 = vpop.f32.mrf.mxu0  ;;  %v4209_v57 = vor.u32 %v4473_v44, %v4206_v26 }
 0x347   : > { %v1765_v2 = vadd.f32 %v1764_v29, %v5698_v23  ;;  %v1853_v31 = vpop.f32.mrf.mxu1  ;;  %3090 = vmatpush.bf16.msra.mxu1 %v4273_v11 }
 0x348   : > { %v2479_v22 = vpop.f32.mrf.mxu2  ;;  %3001 = vmatpush.bf16.msra.mxu0 %v4209_v57  ;;  %v4433_v57 = vld [vmem:[#allocation2 + $0x14] sm:$0xf] }
 0x349   : > { %v1854_v3 = vadd.f32 %v1853_v31, %v1765_v2  ;;  %v2480_v13 = vadd.f32 %v2479_v22, %v5815_v12  ;;  %v2568_v19 = vpop.f32.mrf.mxu3  ;;  %2661 = vmatmul.bf16.gmra.mxu0 %v5654_v30 }
 0x34a   : > { %2750 = vmatmul.bf16.gmra.mxu1 %v5737_v46 }
 0x34b   : > { %v5840_v50 = vadd.f32 %v2568_v19, %v2480_v13  ;;  %v1966_v46 = vmax.f32 %v1854_v3, 0.0 }
 0x34e   : > { %v1766_v54 = vpop.f32.mrf.mxu0 }
 0x34f   : > { %v1767_v29 = vadd.f32 %v1766_v54, %v5698_v23  ;;  %v1855_v2 = vpop.f32.mrf.mxu1  ;;  %v4046_v54 = vld [vmem:[#allocation2 + $0x18] sm:$0xf0] }
 0x350   : > { %v2481_v31 = vpop.f32.mrf.mxu2  ;;  %v4049_v11 = vor.u32 %v4433_v57, %v4046_v54 }
 0x351   : > { %v1856_v22 = vadd.f32 %v1855_v2, %v1767_v29  ;;  %v2482_v30 = vadd.f32 %v2481_v31, %v5815_v12  ;;  %v2570_v24 = vpop.f32.mrf.mxu3 }
 0x352   : > { %2827 = vmatpush.bf16.msrb.mxu2 %v4049_v11 }
 0x353   : > { %v1970_v13 = vmax.f32 %v1856_v22, 0.0  ;;  %v5844_v19 = vadd.f32 %v2570_v24, %v2482_v30  ;;  %v4449_v24 = vld [vmem:[#allocation2 + $0x94] sm:$0xf] }
 0x355   : > { %2523 = vmatmul.bf16.gmra.mxu2 %v6513_v7  ;;  %v5847_v44 = vpack.c.bf16 %v1970_v13, %v1966_v46  ;;  %v4110_v46 = vld [vmem:[#allocation2 + $0x98] sm:$0xf0]  ;;  %v6515_v7 = vld [vmem:[#allocation16_spill] sm:$0xff] }
 0x356   : > { %2612 = vmatmul.bf16.gmra.mxu3 %v5638_v35  ;;  %v1769_v26 = vpop.f32.mrf.mxu0  ;;  %v4113_v22 = vor.u32 %v4449_v24, %v4110_v46 }
 0x357   : > { %v1770_v52 = vadd.f32 %v1769_v26, %v5698_v23  ;;  %v1858_v59 = vpop.f32.mrf.mxu1 }
 0x358   : > { %v2484_v29 = vpop.f32.mrf.mxu2  ;;  %2916 = vmatpush.bf16.msrb.mxu3 %v4113_v22 }
 0x359   : > { %v1859_v2 = vadd.f32 %v1858_v59, %v1770_v52  ;;  %v2485_v3 = vadd.f32 %v2484_v29, %v5815_v12  ;;  %v2573_v31 = vpop.f32.mrf.mxu3  ;;  %2666 = vmatmul.bf16.gmra.mxu0 %v5666_v39 }
 0x35a   : > { %2755 = vmatmul.bf16.gmra.mxu1 %v5749_v61  ;;  %v6514_v61 = vld [vmem:[#allocation14_spill] sm:$0xff] }
 0x35b   : > { %v5854_v30 = vadd.f32 %v2573_v31, %v2485_v3  ;;  %v1974_v35 = vmax.f32 %v1859_v2, 0.0 }
 0x35e   : > { %v1771_v13 = vpop.f32.mrf.mxu0 }
 0x35f   : > { %v1772_v26 = vadd.f32 %v1771_v13, %v5698_v23  ;;  %v1860_v57 = vpop.f32.mrf.mxu1 }
 0x360   : > { %v2486_v54 = vpop.f32.mrf.mxu2 }
 0x361   : > { %v1861_v52 = vadd.f32 %v1860_v57, %v1772_v26  ;;  %v2487_v59 = vadd.f32 %v2486_v54, %v5815_v12  ;;  %v2575_v29 = vpop.f32.mrf.mxu3  ;;  %v4471_v54 = vld [vmem:[#allocation2 + $0x144] sm:$0xf] }
 0x363   : > { %v1978_v39 = vmax.f32 %v1861_v52, 0.0  ;;  %v5858_v11 = vadd.f32 %v2575_v29, %v2487_v59  ;;  %v4487_v52 = vld [vmem:[#allocation2 + $0x1c4] sm:$0xf]  ;;  %v4262_v59 = vld [vmem:[#allocation2 + $0x1c8] sm:$0xf0] }
 0x364   : > { %v4265_v29 = vor.u32 %v4487_v52, %v4262_v59 }
 0x365   : > { %2528 = vmatmul.bf16.gmra.mxu2 %v6514_v61  ;;  %v5861_v3 = vpack.c.bf16 %v1978_v39, %v1974_v35  ;;  %v4198_v35 = vld [vmem:[#allocation2 + $0x148] sm:$0xf0] }
 0x366   : > { %2617 = vmatmul.bf16.gmra.mxu3 %v5650_v40  ;;  %v1774_v31 = vpop.f32.mrf.mxu0  ;;  %v4201_v39 = vor.u32 %v4471_v54, %v4198_v35  ;;  %3091 = vmatpush.bf16.msra.mxu1 %v4265_v29 }
 0x367   : > { %v1775_v24 = vadd.f32 %v1774_v31, %v5698_v23  ;;  %v1863_v46 = vpop.f32.mrf.mxu1 }
 0x368   : > { %v2489_v22 = vpop.f32.mrf.mxu2  ;;  %3002 = vmatpush.bf16.msra.mxu0 %v4201_v39  ;;  %v4431_v39 = vld [vmem:[#allocation2 + $0x4] sm:$0xf] }
 0x369   : > { %v1864_v13 = vadd.f32 %v1863_v46, %v1775_v24  ;;  %v2490_v26 = vadd.f32 %v2489_v22, %v5815_v12  ;;  %v2578_v57 = vpop.f32.mrf.mxu3  ;;  %2671 = vmatmul.bf16.gmra.mxu0 %v5678_v33 }
 0x36a   : > { %2760 = vmatmul.bf16.gmra.mxu1 %v5761_v5 }
 0x36b   : > { %v5868_v2 = vadd.f32 %v2578_v57, %v2490_v26  ;;  %v1982_v5 = vmax.f32 %v1864_v13, 0.0 }
 0x36e   : > { %v1776_v40 = vpop.f32.mrf.mxu0 }
 0x36f   : > { %v1777_v31 = vadd.f32 %v1776_v40, %v5698_v23  ;;  %v1865_v24 = vpop.f32.mrf.mxu1  ;;  %v4038_v40 = vld [vmem:[#allocation2 + $0x8] sm:$0xf0] }
 0x370   : > { %v2491_v46 = vpop.f32.mrf.mxu2  ;;  %v4041_v29 = vor.u32 %v4431_v39, %v4038_v40 }
 0x371   : > { %v1866_v22 = vadd.f32 %v1865_v24, %v1777_v31  ;;  %v2492_v33 = vadd.f32 %v2491_v46, %v5815_v12  ;;  %v2580_v61 = vpop.f32.mrf.mxu3 }
 0x372   : > { %2828 = vmatpush.bf16.msrb.mxu2 %v4041_v29 }
 0x373   : > { %v1986_v26 = vmax.f32 %v1866_v22, 0.0  ;;  %v5872_v57 = vadd.f32 %v2580_v61, %v2492_v33  ;;  %v4447_v61 = vld [vmem:[#allocation2 + $0x84] sm:$0xf] }
 0x375   : > { %2533 = vmatmul.bf16.gmra.mxu2 %v6515_v7  ;;  %v5875_v54 = vpack.c.bf16 %v1986_v26, %v1982_v5  ;;  %v4102_v5 = vld [vmem:[#allocation2 + $0x88] sm:$0xf0]  ;;  %v6517_v7 = vld [vmem:[#allocation18_spill] sm:$0xff] }
 0x376   : > { %2622 = vmatmul.bf16.gmra.mxu3 %v5662_v17  ;;  %v1779_v35 = vpop.f32.mrf.mxu0  ;;  %v4105_v22 = vor.u32 %v4447_v61, %v4102_v5 }
 0x377   : > { %v1780_v52 = vadd.f32 %v1779_v35, %v5698_v23  ;;  %v1868_v59 = vpop.f32.mrf.mxu1 }
 0x378   : > { %v2494_v31 = vpop.f32.mrf.mxu2  ;;  %2917 = vmatpush.bf16.msrb.mxu3 %v4105_v22 }
 0x379   : > { %v1869_v24 = vadd.f32 %v1868_v59, %v1780_v52  ;;  %v2495_v13 = vadd.f32 %v2494_v31, %v5815_v12  ;;  %v2583_v46 = vpop.f32.mrf.mxu3  ;;  %2676 = vmatmul.bf16.gmra.mxu0 %v5690_v27 }
 0x37a   : > { %2765 = vmatmul.bf16.gmra.mxu1 %v5773_v9  ;;  %v6516_v9 = vld [vmem:[#allocation17_spill] sm:$0xff] }
 0x37b   : > { %v5882_v33 = vadd.f32 %v2583_v46, %v2495_v13  ;;  %v1990_v17 = vmax.f32 %v1869_v24, 0.0 }
 0x37e   : > { %v1781_v26 = vpop.f32.mrf.mxu0 }
 0x37f   : > { %v1782_v35 = vadd.f32 %v1781_v26, %v5698_v23  ;;  %v1870_v39 = vpop.f32.mrf.mxu1 }
 0x380   : > { %v2496_v40 = vpop.f32.mrf.mxu2 }
 0x381   : > { %v1871_v52 = vadd.f32 %v1870_v39, %v1782_v35  ;;  %v2497_v59 = vadd.f32 %v2496_v40, %v5815_v12  ;;  %v2585_v31 = vpop.f32.mrf.mxu3  ;;  %v4469_v40 = vld [vmem:[#allocation2 + $0x134] sm:$0xf] }
 0x383   : > { %v1994_v27 = vmax.f32 %v1871_v52, 0.0  ;;  %v5886_v29 = vadd.f32 %v2585_v31, %v2497_v59  ;;  %v4485_v52 = vld [vmem:[#allocation2 + $0x1b4] sm:$0xf]  ;;  %v4254_v59 = vld [vmem:[#allocation2 + $0x1b8] sm:$0xf0] }
 0x384   : > { %v4257_v31 = vor.u32 %v4485_v52, %v4254_v59 }
 0x385   : > { %2538 = vmatmul.bf16.gmra.mxu2 %v6516_v9  ;;  %v5889_v13 = vpack.c.bf16 %v1994_v27, %v1990_v17  ;;  %v4190_v17 = vld [vmem:[#allocation2 + $0x138] sm:$0xf0] }
 0x386   : > { %2627 = vmatmul.bf16.gmra.mxu3 %v5674_v28  ;;  %v1784_v46 = vpop.f32.mrf.mxu0  ;;  %v4193_v27 = vor.u32 %v4469_v40, %v4190_v17  ;;  %3092 = vmatpush.bf16.msra.mxu1 %v4257_v31  ;;  %v4510_v31 = vld [vmem:[%s6428_s7 + $0x78] sm:$0xff] }
 0x387   : > { %v1785_v61 = vadd.f32 %v1784_v46, %v5698_v23  ;;  %v1873_v5 = vpop.f32.mrf.mxu1  ;;  %3494 = vmatpush.bf16.msra.mxu3 %v4510_v31 }
 0x388   : > { %v2499_v22 = vpop.f32.mrf.mxu2  ;;  %3003 = vmatpush.bf16.msra.mxu0 %v4193_v27 }
 0x389   : > { %v1874_v26 = vadd.f32 %v1873_v5, %v1785_v61  ;;  %v2500_v35 = vadd.f32 %v2499_v22, %v5815_v12  ;;  %v2588_v39 = vpop.f32.mrf.mxu3  ;;  %2681 = vmatmul.bf16.gmra.mxu0 %v5705_v34 }
 0x38a   : > { %2770 = vmatmul.bf16.gmra.mxu1 %v5785_v56 }
 0x38b   : > { %v5896_v24 = vadd.f32 %v2588_v39, %v2500_v35  ;;  %v1998_v56 = vmax.f32 %v1874_v26, 0.0 }
 0x38e   : > { %v1786_v28 = vpop.f32.mrf.mxu0 }
 0x38f   : > { %v1787_v46 = vadd.f32 %v1786_v28, %v5698_v23  ;;  %v1875_v61 = vpop.f32.mrf.mxu1  ;;  %v4502_v28 = vld [vmem:[%s6428_s7 + $0x38] sm:$0xff] }
 0x390   : > { %v2501_v5 = vpop.f32.mrf.mxu2  ;;  %3405 = vmatpush.bf16.msra.mxu2 %v4502_v28 }
 0x391   : > { %v1876_v22 = vadd.f32 %v1875_v61, %v1787_v46  ;;  %v2502_v34 = vadd.f32 %v2501_v5, %v5815_v12  ;;  %v2590_v9 = vpop.f32.mrf.mxu3 }
 0x393   : > { %v2002_v35 = vmax.f32 %v1876_v22, 0.0  ;;  %v5900_v39 = vadd.f32 %v2590_v9, %v2502_v34 }
 0x395   : > { %2543 = vmatmul.bf16.gmra.mxu2 %v6517_v7  ;;  %v5903_v40 = vpack.c.bf16 %v2002_v35, %v1998_v56 }
 0x396   : > { %2632 = vmatmul.bf16.gmra.mxu3 %v5686_v53  ;;  %v1789_v17 = vpop.f32.mrf.mxu0 }
 0x397   : > { %v1790_v27 = vadd.f32 %v1789_v17, %v5698_v23  ;;  %v1878_v52 = vpop.f32.mrf.mxu1 }
 0x398   : > { %v2504_v59 = vpop.f32.mrf.mxu2 }
 0x399   : > { %v1879_v26 = vadd.f32 %v1878_v52, %v1790_v27  ;;  %v2505_v34 = vadd.f32 %v2504_v59, %v5815_v12  ;;  %v2593_v9 = vpop.f32.mrf.mxu3  ;;  %2686 = vmatmul.bf16.gmra.mxu0 %v5717_v18 }
 0x39a   : > { %2775 = vmatmul.bf16.gmra.mxu1 %v5797_v0 }
 0x39b   : > { %v5913_v56 = vadd.f32 %v2593_v9, %v2505_v34  ;;  %v2006_v27 = vmax.f32 %v1879_v26, 0.0  ;;  %v6518_v34 = vld [vmem:[#allocation20_spill] sm:$0xff] }
 0x39e   : > { %v1791_v46 = vpop.f32.mrf.mxu0 }
 0x39f   : > { %v1792_v61 = vadd.f32 %v1791_v46, %v5698_v23  ;;  %v1880_v5 = vpop.f32.mrf.mxu1 }
 0x3a0   : > { %v2506_v22 = vpop.f32.mrf.mxu2 }
 0x3a1   : > { %v1881_v35 = vadd.f32 %v1880_v5, %v1792_v61  ;;  %v2507_v17 = vadd.f32 %v2506_v22, %v5815_v12  ;;  %v2595_v28 = vpop.f32.mrf.mxu3  ;;  %v4467_v22 = vld [vmem:[#allocation2 + $0x124] sm:$0xf] }
 0x3a3   : > { %v2010_v52 = vmax.f32 %v1881_v35, 0.0  ;;  %v5920_v59 = vadd.f32 %v2595_v28, %v2507_v17  ;;  %v4182_v35 = vld [vmem:[#allocation2 + $0x128] sm:$0xf0]  ;;  %v4483_v28 = vld [vmem:[#allocation2 + $0x1a4] sm:$0xf] }
 0x3a4   : > { %v4185_v17 = vor.u32 %v4467_v22, %v4182_v35 }
 0x3a5   : > { %2548 = vmatmul.bf16.gmra.mxu2 %v6518_v34  ;;  %v5923_v9 = vpack.c.bf16 %v2010_v52, %v2006_v27  ;;  %v4246_v27 = vld [vmem:[#allocation2 + $0x1a8] sm:$0xf0] }
 0x3a6   : > { %2637 = vmatmul.bf16.gmra.mxu3 %v5701_v42  ;;  %v2652_v31 = vpop.f32.mrf.mxu0  ;;  %v4249_v52 = vor.u32 %v4483_v28, %v4246_v27  ;;  %3004 = vmatpush.bf16.msra.mxu0 %v4185_v17 }
 0x3a7   : > { %v2653_v0 = vadd.f32 %v2652_v31, %v5826_v48  ;;  %v2741_v23 = vpop.f32.mrf.mxu1 }
 0x3a8   : > { %v2509_v46 = vpop.f32.mrf.mxu2  ;;  %3093 = vmatpush.bf16.msra.mxu1 %v4249_v52 }
 0x3a9   : > { %v2742_v18 = vadd.f32 %v2741_v23, %v2653_v0  ;;  %v2510_v61 = vadd.f32 %v2509_v46, %v5815_v12  ;;  %v2598_v5 = vpop.f32.mrf.mxu3  ;;  %2691 = vmatmul.bf16.gmra.mxu0 %v5729_v1 }
 0x3aa   : > { %2780 = vmatmul.bf16.gmra.mxu1 %v5817_v45 }
 0x3ab   : > { %v5930_v26 = vadd.f32 %v2598_v5, %v2510_v61  ;;  %v3177_v45 = vmax.f32 %v2742_v18, 0.0 }
 0x3ae   : > { %v2654_v42 = vpop.f32.mrf.mxu0 }
 0x3af   : > { %v2655_v48 = vadd.f32 %v2654_v42, %v5830_v62  ;;  %v2743_v0 = vpop.f32.mrf.mxu1  ;;  %v4501_v42 = vld [vmem:[%s6428_s7 + $0x30] sm:$0xff] }
 0x3b0   : > { %v2511_v31 = vpop.f32.mrf.mxu2  ;;  %3406 = vmatpush.bf16.msra.mxu2 %v4501_v42 }
 0x3b1   : > { %v2744_v23 = vadd.f32 %v2743_v0, %v2655_v48  ;;  %v2512_v46 = vadd.f32 %v2511_v31, %v5815_v12  ;;  %v2600_v1 = vpop.f32.mrf.mxu3 }
 0x3b3   : > { %v3179_v61 = vmax.f32 %v2744_v23, 0.0  ;;  %v5934_v5 = vadd.f32 %v2600_v1, %v2512_v46 }
 0x3b5   : > { %v5936_v34 = vpack.c.bf16 %v3179_v61, %v3177_v45  ;;  %2829 = vmatmul.bf16.vlgmr.msrb.gmra.mxu2 %v5306_v32 }
 0x3b6   : > { %2918 = vmatmul.bf16.vlgmr.msrb.gmra.mxu3 %v5485_v25  ;;  %v2657_v22 = vpop.f32.mrf.mxu0  ;;  %v4509_v25 = vld [vmem:[%s6428_s7 + $0x70] sm:$0xff] }
 0x3b7   : > { %v2658_v62 = vadd.f32 %v2657_v22, %v5840_v50  ;;  %v2746_v35 = vpop.f32.mrf.mxu1  ;;  %3495 = vmatpush.bf16.msra.mxu3 %v4509_v25  ;;  %v4174_v25 = vld [vmem:[#allocation2 + $0x118] sm:$0xf0] }
 0x3b8   : > { %v2514_v17 = vpop.f32.mrf.mxu2 }
 0x3b9   : > { %v2747_v18 = vadd.f32 %v2746_v35, %v2658_v62  ;;  %v2515_v1 = vadd.f32 %v2514_v17, %v5815_v12  ;;  %v2603_v28 = vpop.f32.mrf.mxu3  ;;  %2696 = vmatmul.bf16.gmra.mxu0 %v5741_v14 }
 0x3ba   : > { %2785 = vmatmul.bf16.gmra.mxu1 %v5833_v60 }
 0x3bb   : > { %v5947_v32 = vadd.f32 %v2603_v28, %v2515_v1  ;;  %v3181_v23 = vmax.f32 %v2747_v18, 0.0 }
 0x3be   : > { %v2659_v45 = vpop.f32.mrf.mxu0 }
 0x3bf   : > { %v2660_v50 = vadd.f32 %v2659_v45, %v5844_v19  ;;  %v2748_v27 = vpop.f32.mrf.mxu1 }
 0x3c0   : > { %v2516_v52 = vpop.f32.mrf.mxu2 }
 0x3c1   : > { %v2749_v48 = vadd.f32 %v2748_v27, %v2660_v50  ;;  %v2517_v0 = vadd.f32 %v2516_v52, %v5815_v12  ;;  %v2605_v31 = vpop.f32.mrf.mxu3  ;;  %v4481_v50 = vld [vmem:[#allocation2 + $0x194] sm:$0xf] }
 0x3c3   : > { %v3183_v46 = vmax.f32 %v2749_v48, 0.0  ;;  %v5954_v61 = vadd.f32 %v2605_v31, %v2517_v0 }
 0x3c5   : > { %2834 = vmatmul.bf16.gmra.mxu2 %v5340_v21  ;;  %v5957_v22 = vpack.c.bf16 %v3183_v46, %v3181_v23  ;;  %v4465_v21 = vld [vmem:[#allocation2 + $0x114] sm:$0xf] }
 0x3c6   : > { %2923 = vmatmul.bf16.gmra.mxu3 %v5498_v38  ;;  %v2662_v42 = vpop.f32.mrf.mxu0  ;;  %v4177_v45 = vor.u32 %v4465_v21, %v4174_v25  ;;  %v4238_v38 = vld [vmem:[#allocation2 + $0x198] sm:$0xf0] }
 0x3c7   : > { %v2663_v62 = vadd.f32 %v2662_v42, %v5854_v30  ;;  %v2751_v19 = vpop.f32.mrf.mxu1  ;;  %v4241_v27 = vor.u32 %v4481_v50, %v4238_v38 }
 0x3c8   : > { %v2519_v35 = vpop.f32.mrf.mxu2  ;;  %3005 = vmatpush.bf16.msra.mxu0 %v4177_v45 }
 0x3c9   : > { %v2752_v17 = vadd.f32 %v2751_v19, %v2663_v62  ;;  %v2520_v1 = vadd.f32 %v2519_v35, %v5815_v12  ;;  %v2608_v28 = vpop.f32.mrf.mxu3  ;;  %2701 = vmatmul.bf16.gmra.mxu0 %v5753_v36  ;;  %3094 = vmatpush.bf16.msra.mxu1 %v4241_v27 }
 0x3ca   : > { %2790 = vmatmul.bf16.gmra.mxu1 %v5847_v44 }
 0x3cb   : > { %v5964_v18 = vadd.f32 %v2608_v28, %v2520_v1  ;;  %v3185_v42 = vmax.f32 %v2752_v17, 0.0 }
 0x3ce   : > { %v2664_v52 = vpop.f32.mrf.mxu0 }
 0x3cf   : > { %v2665_v30 = vadd.f32 %v2664_v52, %v5858_v11  ;;  %v2753_v48 = vpop.f32.mrf.mxu1  ;;  %v4500_v11 = vld [vmem:[%s6428_s7 + $0x28] sm:$0xff] }
 0x3d0   : > { %v2521_v0 = vpop.f32.mrf.mxu2  ;;  %3407 = vmatpush.bf16.msra.mxu2 %v4500_v11 }
 0x3d1   : > { %v2754_v31 = vadd.f32 %v2753_v48, %v2665_v30  ;;  %v2522_v23 = vadd.f32 %v2521_v0, %v5815_v12  ;;  %v2610_v46 = vpop.f32.mrf.mxu3 }
 0x3d3   : > { %v3187_v62 = vmax.f32 %v2754_v31, 0.0  ;;  %v5968_v19 = vadd.f32 %v2610_v46, %v2522_v23 }
 0x3d5   : > { %2839 = vmatmul.bf16.gmra.mxu2 %v5362_v4  ;;  %v5971_v35 = vpack.c.bf16 %v3187_v62, %v3185_v42 }
 0x3d6   : > { %2928 = vmatmul.bf16.gmra.mxu3 %v5522_v10  ;;  %v2667_v1 = vpop.f32.mrf.mxu0  ;;  %v4508_v10 = vld [vmem:[%s6428_s7 + $0x68] sm:$0xff] }
 0x3d7   : > { %v2668_v28 = vadd.f32 %v2667_v1, %v5868_v2  ;;  %v2756_v21 = vpop.f32.mrf.mxu1  ;;  %3496 = vmatpush.bf16.msra.mxu3 %v4508_v10  ;;  %v4479_v10 = vld [vmem:[#allocation2 + $0x184] sm:$0xf] }
 0x3d8   : > { %v2524_v25 = vpop.f32.mrf.mxu2 }
 0x3d9   : > { %v2757_v17 = vadd.f32 %v2756_v21, %v2668_v28  ;;  %v2525_v45 = vadd.f32 %v2524_v25, %v5815_v12  ;;  %v2613_v50 = vpop.f32.mrf.mxu3  ;;  %2706 = vmatmul.bf16.gmra.mxu0 %v5765_v58 }
 0x3da   : > { %2795 = vmatmul.bf16.gmra.mxu1 %v5861_v3 }
 0x3db   : > { %v5981_v4 = vadd.f32 %v2613_v50, %v2525_v45  ;;  %v3189_v31 = vmax.f32 %v2757_v17, 0.0  ;;  %v4166_v45 = vld [vmem:[#allocation2 + $0x108] sm:$0xf0] }
 0x3de   : > { %v2669_v38 = vpop.f32.mrf.mxu0 }
 0x3df   : > { %v2670_v2 = vadd.f32 %v2669_v38, %v5872_v57  ;;  %v2758_v27 = vpop.f32.mrf.mxu1 }
 0x3e0   : > { %v2526_v52 = vpop.f32.mrf.mxu2 }
 0x3e1   : > { %v2759_v30 = vadd.f32 %v2758_v27, %v2670_v2  ;;  %v2527_v48 = vadd.f32 %v2526_v52, %v5815_v12  ;;  %v2615_v0 = vpop.f32.mrf.mxu3 }
 0x3e3   : > { %v3191_v23 = vmax.f32 %v2759_v30, 0.0  ;;  %v5988_v46 = vadd.f32 %v2615_v0, %v2527_v48 }
 0x3e5   : > { %2844 = vmatmul.bf16.gmra.mxu2 %v5396_v6  ;;  %v5991_v42 = vpack.c.bf16 %v3191_v23, %v3189_v31  ;;  %v4463_v6 = vld [vmem:[#allocation2 + $0x104] sm:$0xf] }
 0x3e6   : > { %2933 = vmatmul.bf16.gmra.mxu3 %v5534_v49  ;;  %v2672_v62 = vpop.f32.mrf.mxu0  ;;  %v4169_v50 = vor.u32 %v4463_v6, %v4166_v45  ;;  %v4230_v49 = vld [vmem:[#allocation2 + $0x188] sm:$0xf0] }
 0x3e7   : > { %v2673_v1 = vadd.f32 %v2672_v62, %v5882_v33  ;;  %v2761_v57 = vpop.f32.mrf.mxu1  ;;  %v4233_v38 = vor.u32 %v4479_v10, %v4230_v49 }
 0x3e8   : > { %v2529_v11 = vpop.f32.mrf.mxu2  ;;  %3006 = vmatpush.bf16.msra.mxu0 %v4169_v50 }
 0x3e9   : > { %v2762_v28 = vadd.f32 %v2761_v57, %v2673_v1  ;;  %v2530_v21 = vadd.f32 %v2529_v11, %v5815_v12  ;;  %v2618_v25 = vpop.f32.mrf.mxu3  ;;  %2711 = vmatmul.bf16.gmra.mxu0 %v5777_v20  ;;  %3095 = vmatpush.bf16.msra.mxu1 %v4233_v38 }
 0x3ea   : > { %2800 = vmatmul.bf16.gmra.mxu1 %v5875_v54 }
 0x3eb   : > { %v5998_v17 = vadd.f32 %v2618_v25, %v2530_v21  ;;  %v3193_v31 = vmax.f32 %v2762_v28, 0.0 }
 0x3ee   : > { %v2674_v2 = vpop.f32.mrf.mxu0 }
 0x3ef   : > { %v2675_v33 = vadd.f32 %v2674_v2, %v5886_v29  ;;  %v2763_v27 = vpop.f32.mrf.mxu1  ;;  %v4499_v29 = vld [vmem:[%s6428_s7 + $0x20] sm:$0xff] }
 0x3f0   : > { %v2531_v52 = vpop.f32.mrf.mxu2  ;;  %3408 = vmatpush.bf16.msra.mxu2 %v4499_v29 }
 0x3f1   : > { %v2764_v30 = vadd.f32 %v2763_v27, %v2675_v33  ;;  %v2532_v48 = vadd.f32 %v2531_v52, %v5815_v12  ;;  %v2620_v0 = vpop.f32.mrf.mxu3 }
 0x3f3   : > { %v3195_v23 = vmax.f32 %v2764_v30, 0.0  ;;  %v6002_v62 = vadd.f32 %v2620_v0, %v2532_v48  ;;  %v6519_v48 = vld [vmem:[#allocation8_spill] sm:$0xff] }
 0x3f5   : > { %2849 = vmatmul.bf16.gmra.mxu2 %v5418_v63  ;;  %v6005_v1 = vpack.c.bf16 %v3195_v23, %v3193_v31  ;;  %v6520_v31 = vld [vmem:[#allocation15_spill] sm:$0xff] }
 0x3f6   : > { %2938 = vmatmul.bf16.gmra.mxu3 %v5558_v41  ;;  %v2677_v57 = vpop.f32.mrf.mxu0  ;;  %v4507_v41 = vld [vmem:[%s6428_s7 + $0x60] sm:$0xff] }
 0x3f7   : > { %v2678_v11 = vadd.f32 %v2677_v57, %v5896_v24  ;;  %v2766_v21 = vpop.f32.mrf.mxu1  ;;  %3497 = vmatpush.bf16.msra.mxu3 %v4507_v41 }
 0x3f8   : > { %v2534_v25 = vpop.f32.mrf.mxu2 }
 0x3f9   : > { %v2767_v28 = vadd.f32 %v2766_v21, %v2678_v11  ;;  %v2535_v6 = vadd.f32 %v2534_v25, %v5815_v12  ;;  %v2623_v45 = vpop.f32.mrf.mxu3  ;;  %2716 = vmatmul.bf16.gmra.mxu0 %v5789_v47 }
 0x3fa   : > { %2805 = vmatmul.bf16.gmra.mxu1 %v5889_v13 }
 0x3fb   : > { %v6015_v63 = vadd.f32 %v2623_v45, %v2535_v6  ;;  %v3197_v27 = vmax.f32 %v2767_v28, 0.0 }
 0x3fe   : > { %v2679_v50 = vpop.f32.mrf.mxu0 }
 0x3ff   : > { %v2680_v24 = vadd.f32 %v2679_v50, %v5900_v39  ;;  %v2768_v10 = vpop.f32.mrf.mxu1 }
 0x400   : > { %v2536_v49 = vpop.f32.mrf.mxu2 }
 0x401   : > { %v2769_v38 = vadd.f32 %v2768_v10, %v2680_v24  ;;  %v2537_v2 = vadd.f32 %v2536_v49, %v5815_v12  ;;  %v2625_v33 = vpop.f32.mrf.mxu3 }
 0x403   : > { %v3199_v52 = vmax.f32 %v2769_v38, 0.0  ;;  %v6022_v30 = vadd.f32 %v2625_v33, %v2537_v2 }
 0x405   : > { %2854 = vmatmul.bf16.gmra.mxu2 %v6519_v48  ;;  %v6025_v0 = vpack.c.bf16 %v3199_v52, %v3197_v27 }
 0x406   : > { %2943 = vmatmul.bf16.gmra.mxu3 %v6520_v31  ;;  %v2682_v23 = vpop.f32.mrf.mxu0 }
 0x407   : > { %v2683_v57 = vadd.f32 %v2682_v23, %v5913_v56  ;;  %v2771_v39 = vpop.f32.mrf.mxu1 }
 0x408   : > { %v2539_v29 = vpop.f32.mrf.mxu2 }
 0x409   : > { %v2772_v11 = vadd.f32 %v2771_v39, %v2683_v57  ;;  %v2540_v21 = vadd.f32 %v2539_v29, %v5815_v12  ;;  %v2628_v25 = vpop.f32.mrf.mxu3  ;;  %2721 = vmatmul.bf16.gmra.mxu0 %v5801_v55 }
 0x40a   : > { %2810 = vmatmul.bf16.gmra.mxu1 %v5903_v40 }
 0x40b   : > { %v6032_v28 = vadd.f32 %v2628_v25, %v2540_v21  ;;  %v3201_v49 = vmax.f32 %v2772_v11, 0.0 }
 0x40e   : > { %v2684_v6 = vpop.f32.mrf.mxu0 }
 0x40f   : > { %v2685_v45 = vadd.f32 %v2684_v6, %v5920_v59  ;;  %v2773_v41 = vpop.f32.mrf.mxu1  ;;  %v4498_v59 = vld [vmem:[%s6428_s7 + $0x18] sm:$0xff] }
 0x410   : > { %v2541_v50 = vpop.f32.mrf.mxu2  ;;  %3409 = vmatpush.bf16.msra.mxu2 %v4498_v59 }
 0x411   : > { %v2774_v24 = vadd.f32 %v2773_v41, %v2685_v45  ;;  %v2542_v56 = vadd.f32 %v2541_v50, %v5815_v12  ;;  %v2630_v10 = vpop.f32.mrf.mxu3 }
 0x413   : > { %v3203_v38 = vmax.f32 %v2774_v24, 0.0  ;;  %v6036_v2 = vadd.f32 %v2630_v10, %v2542_v56 }
 0x415   : > { %2859 = vmatmul.bf16.gmra.mxu2 %v6505_v51  ;;  %v6039_v33 = vpack.c.bf16 %v3203_v38, %v3201_v49 }
 0x416   : > { %2948 = vmatmul.bf16.gmra.mxu3 %v5582_v43  ;;  %v2687_v27 = vpop.f32.mrf.mxu0  ;;  %v4506_v43 = vld [vmem:[%s6428_s7 + $0x58] sm:$0xff] }
 0x417   : > { %v2688_v52 = vadd.f32 %v2687_v27, %v5930_v26  ;;  %v2776_v48 = vpop.f32.mrf.mxu1  ;;  %3498 = vmatpush.bf16.msra.mxu3 %v4506_v43 }
 0x418   : > { %v2544_v31 = vpop.f32.mrf.mxu2 }
 0x419   : > { %v2777_v23 = vadd.f32 %v2776_v48, %v2688_v52  ;;  %v2545_v57 = vadd.f32 %v2544_v31, %v5815_v12  ;;  %v2633_v39 = vpop.f32.mrf.mxu3  ;;  %2726 = vmatmul.bf16.gmra.mxu0 %v5821_v15  ;;  %v6521_v48 = vld [vmem:[#allocation33_spill] sm:$0xff] }
 0x41a   : > { %2815 = vmatmul.bf16.gmra.mxu1 %v5923_v9 }
 0x41b   : > { %v6049_v51 = vadd.f32 %v2633_v39, %v2545_v57  ;;  %v3205_v41 = vmax.f32 %v2777_v23, 0.0 }
 0x41e   : > { %v2689_v29 = vpop.f32.mrf.mxu0 }
 0x41f   : > { %v2690_v26 = vadd.f32 %v2689_v29, %v5934_v5  ;;  %v2778_v11 = vpop.f32.mrf.mxu1 }
 0x420   : > { %v2546_v21 = vpop.f32.mrf.mxu2 }
 0x421   : > { %v2779_v25 = vadd.f32 %v2778_v11, %v2690_v26  ;;  %v2547_v6 = vadd.f32 %v2546_v21, %v5815_v12  ;;  %v2635_v45 = vpop.f32.mrf.mxu3  ;;  %v6522_v21 = vld [vmem:[#allocation11_spill] sm:$0xff] }
 0x423   : > { %v3207_v50 = vmax.f32 %v2779_v25, 0.0  ;;  %v6056_v24 = vadd.f32 %v2635_v45, %v2547_v6  ;;  %v6524_v45 = vld [vmem:[#allocation19_spill] sm:$0xff] }
 0x425   : > { %2864 = vmatmul.bf16.gmra.mxu2 %v6507_v16  ;;  %v6059_v56 = vpack.c.bf16 %v3207_v50, %v3205_v41  ;;  %v4497_v41 = vld [vmem:[%s6428_s7 + $0x10] sm:$0xff] }
 0x426   : > { %2953 = vmatmul.bf16.gmra.mxu3 %v5594_v37  ;;  %v2692_v10 = vpop.f32.mrf.mxu0  ;;  %3410 = vmatpush.bf16.msra.mxu2 %v4497_v41 }
 0x427   : > { %v2693_v49 = vadd.f32 %v2692_v10, %v5947_v32  ;;  %v2781_v5 = vpop.f32.mrf.mxu1 }
 0x428   : > { %v2549_v38 = vpop.f32.mrf.mxu2 }
 0x429   : > { %v2782_v27 = vadd.f32 %v2781_v5, %v2693_v49  ;;  %v2550_v59 = vadd.f32 %v2549_v38, %v5815_v12  ;;  %v2638_v52 = vpop.f32.mrf.mxu3  ;;  %3007 = vmatmul.bf16.vlgmr.msra.gmra.mxu0 %v5629_v8  ;;  %v6523_v8 = vld [vmem:[#allocation41_spill] sm:$0xff] }
 0x42a   : > { %3096 = vmatmul.bf16.vlgmr.msra.gmra.mxu1 %v6521_v48  ;;  %v6074_v25 = vperm.slane %v6523_v8, 1  ;;  %v4505_v48 = vld [vmem:[%s6428_s7 + $0x50] sm:$0xff] }
 0x42b   : > { %v6066_v31 = vadd.f32 %v2638_v52, %v2550_v59  ;;  %v3209_v29 = vmax.f32 %v2782_v27, 0.0  ;;  %v6525_v27 = vld [vmem:[#allocation23_spill] sm:$0xff]  ;;  %3499 = vmatpush.bf16.msra.mxu3 %v4505_v48 }
 0x42c   : > { %v6526_v59 = vld [vmem:[#allocation35_spill] sm:$0xff] }
 0x42e   : > { %v2694_v16 = vpop.f32.mrf.mxu0 }
 0x42f   : > { %v2695_v23 = vadd.f32 %v2694_v16, %v5954_v61  ;;  %v2783_v57 = vpop.f32.mrf.mxu1 }
 0x430   : > { %v2551_v37 = vpop.f32.mrf.mxu2 }
 0x431   : > { %v2784_v39 = vadd.f32 %v2783_v57, %v2695_v23  ;;  %v2552_v32 = vadd.f32 %v2551_v37, %v5815_v12  ;;  %v2640_v43 = vpop.f32.mrf.mxu3 }
 0x433   : > { %v3211_v26 = vmax.f32 %v2784_v39, 0.0  ;;  %v6070_v11 = vadd.f32 %v2640_v43, %v2552_v32 }
 0x435   : > { %2869 = vmatmul.bf16.gmra.mxu2 %v6522_v21  ;;  %v6076_v6 = vpack.c.bf16 %v3211_v26, %v3209_v29  ;;  %v6527_v21 = vld [vmem:[#allocation12_spill] sm:$0xff] }
 0x436   : > { %2958 = vmatmul.bf16.gmra.mxu3 %v6524_v45  ;;  %v2697_v61 = vpop.f32.mrf.mxu0  ;;  %v6528_v45 = vld [vmem:[#allocation21_spill] sm:$0xff] }
 0x437   : > { %v2698_v12 = vadd.f32 %v2697_v61, %v5964_v18  ;;  %v2786_v50 = vpop.f32.mrf.mxu1 }
 0x438   : > { %v2830_v10 = vpop.f32.mrf.mxu2 }
 0x439   : > { %v2787_v49 = vadd.f32 %v2786_v50, %v2698_v12  ;;  %v2831_v5 = vadd.f32 %v2830_v10, %v6074_v25  ;;  %v2919_v38 = vpop.f32.mrf.mxu3  ;;  %3012 = vmatmul.bf16.gmra.mxu0 %v6525_v27 }
 0x43a   : > { %3101 = vmatmul.bf16.gmra.mxu1 %v6526_v59 }
 0x43b   : > { %v6086_v52 = vadd.f32 %v2919_v38, %v2831_v5  ;;  %v3213_v43 = vmax.f32 %v2787_v49, 0.0  ;;  %v6529_v38 = vld [vmem:[#allocation25_spill] sm:$0xff] }
 0x43c   : > { %v6530_v49 = vld [vmem:[#allocation37_spill] sm:$0xff] }
 0x43e   : > { %v2699_v16 = vpop.f32.mrf.mxu0 }
 0x43f   : > { %v2700_v18 = vadd.f32 %v2699_v16, %v5968_v19  ;;  %v2788_v23 = vpop.f32.mrf.mxu1 }
 0x440   : > { %v2832_v57 = vpop.f32.mrf.mxu2 }
 0x441   : > { %v2789_v37 = vadd.f32 %v2788_v23, %v2700_v18  ;;  %v2833_v39 = vadd.f32 %v2832_v57, %v6074_v25  ;;  %v2921_v32 = vpop.f32.mrf.mxu3 }
 0x443   : > { %v3215_v29 = vmax.f32 %v2789_v37, 0.0  ;;  %v6093_v26 = vadd.f32 %v2921_v32, %v2833_v39 }
 0x445   : > { %2874 = vmatmul.bf16.gmra.mxu2 %v6527_v21  ;;  %v6096_v8 = vpack.c.bf16 %v3215_v29, %v3213_v43  ;;  %v6531_v43 = vld [vmem:[#allocation13_spill] sm:$0xff]  ;;  %v6532_v21 = vld [vmem:[#allocation22_spill] sm:$0xff] }
 0x446   : > { %2963 = vmatmul.bf16.gmra.mxu3 %v6528_v45  ;;  %v2702_v61 = vpop.f32.mrf.mxu0 }
 0x447   : > { %v2703_v41 = vadd.f32 %v2702_v61, %v5981_v4  ;;  %v2791_v19 = vpop.f32.mrf.mxu1 }
 0x448   : > { %v2835_v12 = vpop.f32.mrf.mxu2 }
 0x449   : > { %v2792_v50 = vadd.f32 %v2791_v19, %v2703_v41  ;;  %v2836_v10 = vadd.f32 %v2835_v12, %v6074_v25  ;;  %v2924_v5 = vpop.f32.mrf.mxu3  ;;  %3017 = vmatmul.bf16.gmra.mxu0 %v6529_v38  ;;  %v6534_v38 = vld [vmem:[#allocation38_spill] sm:$0xff] }
 0x44a   : > { %3106 = vmatmul.bf16.gmra.mxu1 %v6530_v49 }
 0x44b   : > { %v6103_v27 = vadd.f32 %v2924_v5, %v2836_v10  ;;  %v3217_v37 = vmax.f32 %v2792_v50, 0.0  ;;  %v6533_v5 = vld [vmem:[#allocation27_spill] sm:$0xff] }
 0x44e   : > { %v2704_v59 = vpop.f32.mrf.mxu0 }
 0x44f   : > { %v2705_v48 = vadd.f32 %v2704_v59, %v5988_v46  ;;  %v2793_v16 = vpop.f32.mrf.mxu1  ;;  %v4496_v46 = vld [vmem:[%s6428_s7 + $0x8] sm:$0xff] }
 0x450   : > { %v2837_v18 = vpop.f32.mrf.mxu2  ;;  %3411 = vmatpush.bf16.msra.mxu2 %v4496_v46  ;;  %v4504_v59 = vld [vmem:[%s6428_s7 + $0x48] sm:$0xff]  ;;  %v6536_v46 = vld [vmem:[#allocation24_spill] sm:$0xff] }
 0x451   : > { %v2794_v23 = vadd.f32 %v2793_v16, %v2705_v48  ;;  %v2838_v4 = vadd.f32 %v2837_v18, %v6074_v25  ;;  %v2926_v57 = vpop.f32.mrf.mxu3  ;;  %3500 = vmatpush.bf16.msra.mxu3 %v4504_v59 }
 0x453   : > { %v3219_v39 = vmax.f32 %v2794_v23, 0.0  ;;  %v6107_v32 = vadd.f32 %v2926_v57, %v2838_v4 }
 0x455   : > { %2879 = vmatmul.bf16.gmra.mxu2 %v6531_v43  ;;  %v6110_v29 = vpack.c.bf16 %v3219_v39, %v3217_v37 }
 0x456   : > { %2968 = vmatmul.bf16.gmra.mxu3 %v6532_v21  ;;  %v2707_v45 = vpop.f32.mrf.mxu0  ;;  %v6535_v21 = vld [vmem:[#allocation14_spill] sm:$0xff] }
 0x457   : > { %v2708_v61 = vadd.f32 %v2707_v45, %v5998_v17  ;;  %v2796_v41 = vpop.f32.mrf.mxu1 }
 0x458   : > { %v2840_v19 = vpop.f32.mrf.mxu2 }
 0x459   : > { %v2797_v12 = vadd.f32 %v2796_v41, %v2708_v61  ;;  %v2841_v50 = vadd.f32 %v2840_v19, %v6074_v25  ;;  %v2929_v10 = vpop.f32.mrf.mxu3  ;;  %3022 = vmatmul.bf16.gmra.mxu0 %v6533_v5 }
 0x45a   : > { %3111 = vmatmul.bf16.gmra.mxu1 %v6534_v38  ;;  %v6537_v38 = vld [vmem:[#allocation29_spill] sm:$0xff] }
 0x45b   : > { %v6120_v49 = vadd.f32 %v2929_v10, %v2841_v50  ;;  %v3221_v37 = vmax.f32 %v2797_v12, 0.0  ;;  %v6538_v12 = vld [vmem:[#allocation39_spill] sm:$0xff] }
 0x45e   : > { %v2709_v48 = vpop.f32.mrf.mxu0 }
 0x45f   : > { %v2710_v17 = vadd.f32 %v2709_v48, %v6002_v62  ;;  %v2798_v16 = vpop.f32.mrf.mxu1 }
 0x460   : > { %v2842_v18 = vpop.f32.mrf.mxu2 }
 0x461   : > { %v2799_v23 = vadd.f32 %v2798_v16, %v2710_v17  ;;  %v2843_v4 = vadd.f32 %v2842_v18, %v6074_v25  ;;  %v2931_v57 = vpop.f32.mrf.mxu3 }
 0x463   : > { %v3223_v39 = vmax.f32 %v2799_v23, 0.0  ;;  %v6127_v43 = vadd.f32 %v2931_v57, %v2843_v4 }
 0x465   : > { %2884 = vmatmul.bf16.gmra.mxu2 %v6535_v21  ;;  %v6130_v45 = vpack.c.bf16 %v3223_v39, %v3221_v37  ;;  %v6539_v21 = vld [vmem:[#allocation16_spill] sm:$0xff] }
 0x466   : > { %2973 = vmatmul.bf16.gmra.mxu3 %v6536_v46  ;;  %v2712_v61 = vpop.f32.mrf.mxu0 }
 0x467   : > { %v2713_v41 = vadd.f32 %v2712_v61, %v6015_v63  ;;  %v2801_v62 = vpop.f32.mrf.mxu1  ;;  %v6540_v61 = vld [vmem:[#allocation26_spill] sm:$0xff] }
 0x468   : > { %v2845_v19 = vpop.f32.mrf.mxu2 }
 0x469   : > { %v2802_v50 = vadd.f32 %v2801_v62, %v2713_v41  ;;  %v2846_v10 = vadd.f32 %v2845_v19, %v6074_v25  ;;  %v2934_v5 = vpop.f32.mrf.mxu3  ;;  %3027 = vmatmul.bf16.gmra.mxu0 %v6537_v38 }
 0x46a   : > { %3116 = vmatmul.bf16.gmra.mxu1 %v6538_v12  ;;  %v6541_v12 = vld [vmem:[#allocation30_spill] sm:$0xff] }
 0x46b   : > { %v6137_v59 = vadd.f32 %v2934_v5, %v2846_v10  ;;  %v3225_v57 = vmax.f32 %v2802_v50, 0.0 }
 0x46e   : > { %v2714_v48 = vpop.f32.mrf.mxu0 }
 0x46f   : > { %v2715_v17 = vadd.f32 %v2714_v48, %v6022_v30  ;;  %v2803_v16 = vpop.f32.mrf.mxu1  ;;  %v4495_v30 = vld [vmem:[%s6428_s7] sm:$0xff] }
 0x470   : > { %v2847_v18 = vpop.f32.mrf.mxu2  ;;  %3412 = vmatpush.bf16.msra.mxu2 %v4495_v30  ;;  %v6542_v48 = vld [vmem:[#allocation40_spill] sm:$0xff]  ;;  %v6543_v30 = vld [vmem:[#allocation17_spill] sm:$0xff] }
 0x471   : > { %v2804_v23 = vadd.f32 %v2803_v16, %v2715_v17  ;;  %v2848_v63 = vadd.f32 %v2847_v18, %v6074_v25  ;;  %v2936_v4 = vpop.f32.mrf.mxu3  ;;  %v4503_v16 = vld [vmem:[%s6428_s7 + $0x40] sm:$0xff] }
 0x472   : > { %3501 = vmatpush.bf16.msra.mxu3 %v4503_v16 }
 0x473   : > { %v3227_v37 = vmax.f32 %v2804_v23, 0.0  ;;  %v6141_v39 = vadd.f32 %v2936_v4, %v2848_v63 }
 0x475   : > { %2889 = vmatmul.bf16.gmra.mxu2 %v6539_v21  ;;  %v6144_v46 = vpack.c.bf16 %v3227_v37, %v3225_v57 }
 0x476   : > { %2978 = vmatmul.bf16.gmra.mxu3 %v6540_v61  ;;  %v2717_v41 = vpop.f32.mrf.mxu0 }
 0x477   : > { %v2718_v62 = vadd.f32 %v2717_v41, %v6032_v28  ;;  %v2806_v19 = vpop.f32.mrf.mxu1 }
 0x478   : > { %v2850_v10 = vpop.f32.mrf.mxu2 }
 0x479   : > { %v2807_v50 = vadd.f32 %v2806_v19, %v2718_v62  ;;  %v2851_v5 = vadd.f32 %v2850_v10, %v6074_v25  ;;  %v2939_v38 = vpop.f32.mrf.mxu3  ;;  %3032 = vmatmul.bf16.gmra.mxu0 %v6541_v12  ;;  %v6544_v19 = vld [vmem:[#allocation28_spill] sm:$0xff] }
 0x47a   : > { %3121 = vmatmul.bf16.gmra.mxu1 %v6542_v48 }
 0x47b   : > { %v6154_v17 = vadd.f32 %v2939_v38, %v2851_v5  ;;  %v3229_v21 = vmax.f32 %v2807_v50, 0.0  ;;  %v6546_v50 = vld [vmem:[#allocation9_spill] sm:$0xff] }
 0x47e   : > { %v2719_v18 = vpop.f32.mrf.mxu0 }
 0x47f   : > { %v2720_v28 = vadd.f32 %v2719_v18, %v6036_v2  ;;  %v2808_v23 = vpop.f32.mrf.mxu1  ;;  %v6545_v18 = vld [vmem:[#allocation32_spill] sm:$0xff] }
 0x480   : > { %v2852_v63 = vpop.f32.mrf.mxu2 }
 0x481   : > { %v2809_v4 = vadd.f32 %v2808_v23, %v2720_v28  ;;  %v2853_v57 = vadd.f32 %v2852_v63, %v6074_v25  ;;  %v2941_v37 = vpop.f32.mrf.mxu3 }
 0x483   : > { %v3231_v61 = vmax.f32 %v2809_v4, 0.0  ;;  %v6161_v41 = vadd.f32 %v2941_v37, %v2853_v57 }
 0x485   : > { %2894 = vmatmul.bf16.gmra.mxu2 %v6543_v30  ;;  %v6164_v62 = vpack.c.bf16 %v3231_v61, %v3229_v21 }
 0x486   : > { %2983 = vmatmul.bf16.gmra.mxu3 %v6544_v19  ;;  %v2722_v10 = vpop.f32.mrf.mxu0 }
 0x487   : > { %v2723_v5 = vadd.f32 %v2722_v10, %v6049_v51  ;;  %v2811_v2 = vpop.f32.mrf.mxu1 }
 0x488   : > { %v2855_v38 = vpop.f32.mrf.mxu2 }
 0x489   : > { %v2812_v12 = vadd.f32 %v2811_v2, %v2723_v5  ;;  %v2856_v48 = vadd.f32 %v2855_v38, %v6074_v25  ;;  %v2944_v16 = vpop.f32.mrf.mxu3  ;;  %3037 = vmatmul.bf16.gmra.mxu0 %v6545_v18 }
 0x48a   : > { %3126 = vmatmul.bf16.gmra.mxu1 %v6546_v50  ;;  %v6547_v50 = vld [vmem:[#allocation34_spill] sm:$0xff] }
 0x48b   : > { %v6171_v28 = vadd.f32 %v2944_v16, %v2856_v48  ;;  %v3233_v61 = vmax.f32 %v2812_v12, 0.0  ;;  %v6548_v12 = vld [vmem:[#allocation10_spill] sm:$0xff] }
 0x48e   : > { %v2724_v23 = vpop.f32.mrf.mxu0 }
 0x48f   : > { %v2725_v63 = vadd.f32 %v2724_v23, %v6056_v24  ;;  %v2813_v4 = vpop.f32.mrf.mxu1 }
 0x490   : > { %v2857_v57 = vpop.f32.mrf.mxu2 }
 0x491   : > { %v2814_v37 = vadd.f32 %v2813_v4, %v2725_v63  ;;  %v2858_v51 = vadd.f32 %v2857_v57, %v6074_v25  ;;  %v2946_v21 = vpop.f32.mrf.mxu3 }
 0x493   : > { %v3235_v30 = vmax.f32 %v2814_v37, 0.0  ;;  %v6175_v19 = vadd.f32 %v2946_v21, %v2858_v51 }
 0x495   : > { %2899 = vmatmul.bf16.gmra.mxu2 %v6517_v7  ;;  %v6178_v10 = vpack.c.bf16 %v3235_v30, %v3233_v61  ;;  %v6549_v30 = vld [vmem:[#allocation20_spill] sm:$0xff] }
 0x496   : > { %2988 = vmatmul.bf16.gmra.mxu3 %v5686_v53  ;;  %v2727_v5 = vpop.f32.mrf.mxu0 }
 0x497   : > { %v2728_v2 = vadd.f32 %v2727_v5, %v6066_v31  ;;  %v2816_v24 = vpop.f32.mrf.mxu1 }
 0x498   : > { %v2860_v38 = vpop.f32.mrf.mxu2 }
 0x499   : > { %v2817_v48 = vadd.f32 %v2816_v24, %v2728_v2  ;;  %v2861_v16 = vadd.f32 %v2860_v38, %v6074_v25  ;;  %v2949_v18 = vpop.f32.mrf.mxu3  ;;  %3042 = vmatmul.bf16.gmra.mxu0 %v6547_v50  ;;  %v6550_v2 = vld [vmem:[#allocation31_spill] sm:$0xff]  ;;  %v6551_v50 = vld [vmem:[#allocation36_spill] sm:$0xff] }
 0x49a   : > { %3131 = vmatmul.bf16.gmra.mxu1 %v6548_v12  ;;  %v6552_v12 = vld [vmem:[#allocation42_spill] sm:$0xff] }
 0x49b   : > { %v6185_v23 = vadd.f32 %v2949_v18, %v2861_v16  ;;  %v3237_v51 = vmax.f32 %v2817_v48, 0.0 }
 0x49e   : > { %v2729_v7 = vpop.f32.mrf.mxu0 }
 0x49f   : > { %v2730_v63 = vadd.f32 %v2729_v7, %v6070_v11  ;;  %v2818_v4 = vpop.f32.mrf.mxu1 }
 0x4a0   : > { %v2862_v53 = vpop.f32.mrf.mxu2 }
 0x4a1   : > { %v2819_v57 = vadd.f32 %v2818_v4, %v2730_v63  ;;  %v2863_v31 = vadd.f32 %v2862_v53, %v6074_v25  ;;  %v2951_v37 = vpop.f32.mrf.mxu3 }
 0x4a3   : > { %v3239_v21 = vmax.f32 %v2819_v57, 0.0  ;;  %v6189_v61 = vadd.f32 %v2951_v37, %v2863_v31 }
 0x4a5   : > { %2904 = vmatmul.bf16.gmra.mxu2 %v6549_v30  ;;  %v6192_v5 = vpack.c.bf16 %v3239_v21, %v3237_v51 }
 0x4a6   : > { %2993 = vmatmul.bf16.gmra.mxu3 %v6550_v2  ;;  %v3008_v24 = vpop.f32.mrf.mxu0 }
 0x4a7   : > { %v3097_v38 = vpop.f32.mrf.mxu1  ;;  %v3009_v48 = vadd.f32 %v3008_v24, %v6086_v52 }
 0x4a8   : > { %v2865_v16 = vpop.f32.mrf.mxu2 }
 0x4a9   : > { %v2866_v11 = vadd.f32 %v2865_v16, %v6074_v25  ;;  %v2954_v18 = vpop.f32.mrf.mxu3  ;;  %3047 = vmatmul.bf16.gmra.mxu0 %v6551_v50  ;;  %v3098_v4 = vadd.f32 %v3097_v38, %v3009_v48 }
 0x4aa   : > { %3136 = vmatmul.bf16.gmra.mxu1 %v6552_v12 }
 0x4ab   : > { %v6199_v7 = vadd.f32 %v2954_v18, %v2866_v11  ;;  %v3178_v30 = vmax.f32 %v3098_v4, 0.0 }
 0x4ae   : > { %v3010_v63 = vpop.f32.mrf.mxu0 }
 0x4af   : > { %v3011_v53 = vadd.f32 %v3010_v63, %v6093_v26  ;;  %v3099_v57 = vpop.f32.mrf.mxu1 }
 0x4b0   : > { %v2867_v31 = vpop.f32.mrf.mxu2 }
 0x4b1   : > { %v3100_v37 = vadd.f32 %v3099_v57, %v3011_v53  ;;  %v2868_v51 = vadd.f32 %v2867_v31, %v6074_v25  ;;  %v2956_v21 = vpop.f32.mrf.mxu3 }
 0x4b3   : > { %v3180_v2 = vmax.f32 %v3100_v37, 0.0  ;;  %v6203_v16 = vadd.f32 %v2956_v21, %v2868_v51 }
 0x4b5   : > { %v3242_v50 = vpack.c.bf16 %v3180_v2, %v3178_v30  ;;  %3413 = vmatmul.bf16.vlgmr.msra.gmra.mxu2 %v5936_v34 }
 0x4b6   : > { %v3013_v52 = vpop.f32.mrf.mxu0 }
 0x4b7   : > { %v3102_v24 = vpop.f32.mrf.mxu1  ;;  %3502 = vmatmul.bf16.vlgmr.msra.gmra.mxu3 %v3242_v50  ;;  %v3014_v18 = vadd.f32 %v3013_v52, %v6103_v27 }
 0x4b8   : > { %v2870_v11 = vpop.f32.mrf.mxu2 }
 0x4b9   : > { %v2871_v38 = vadd.f32 %v2870_v11, %v6074_v25  ;;  %v2959_v26 = vpop.f32.mrf.mxu3  ;;  %3052 = vmatmul.bf16.gmra.mxu0 %v5741_v14  ;;  %v3103_v63 = vadd.f32 %v3102_v24, %v3014_v18 }
 0x4ba   : > { %3141 = vmatmul.bf16.gmra.mxu1 %v5833_v60 }
 0x4bb   : > { %v6210_v12 = vadd.f32 %v2959_v26, %v2871_v38  ;;  %v3182_v51 = vmax.f32 %v3103_v63, 0.0 }
 0x4be   : > { %v3015_v48 = vpop.f32.mrf.mxu0 }
 0x4bf   : > { %v3016_v4 = vadd.f32 %v3015_v48, %v6107_v32  ;;  %v3104_v34 = vpop.f32.mrf.mxu1 }
 0x4c0   : > { %v2872_v53 = vpop.f32.mrf.mxu2 }
 0x4c1   : > { %v3105_v57 = vadd.f32 %v3104_v34, %v3016_v4  ;;  %v2873_v31 = vadd.f32 %v2872_v53, %v6074_v25  ;;  %v2961_v37 = vpop.f32.mrf.mxu3 }
 0x4c3   : > { %v3184_v21 = vmax.f32 %v3105_v57, 0.0  ;;  %v6214_v30 = vadd.f32 %v2961_v37, %v2873_v31 }
 0x4c5   : > { %3418 = vmatmul.bf16.gmra.mxu2 %v5957_v22  ;;  %v3244_v14 = vpack.c.bf16 %v3184_v21, %v3182_v51 }
 0x4c6   : > { %v3018_v60 = vpop.f32.mrf.mxu0 }
 0x4c7   : > { %v3107_v27 = vpop.f32.mrf.mxu1  ;;  %3507 = vmatmul.bf16.gmra.mxu3 %v3244_v14  ;;  %v3019_v52 = vadd.f32 %v3018_v60, %v6120_v49 }
 0x4c8   : > { %v2875_v2 = vpop.f32.mrf.mxu2 }
 0x4c9   : > { %v2876_v50 = vadd.f32 %v2875_v2, %v6074_v25  ;;  %v2964_v32 = vpop.f32.mrf.mxu3  ;;  %3057 = vmatmul.bf16.gmra.mxu0 %v5753_v36  ;;  %v3108_v38 = vadd.f32 %v3107_v27, %v3019_v52 }
 0x4ca   : > { %3146 = vmatmul.bf16.gmra.mxu1 %v5847_v44 }
 0x4cb   : > { %v6221_v24 = vadd.f32 %v2964_v32, %v2876_v50  ;;  %v3186_v34 = vmax.f32 %v3108_v38, 0.0 }
 0x4ce   : > { %v3020_v11 = vpop.f32.mrf.mxu0 }
 0x4cf   : > { %v3021_v22 = vadd.f32 %v3020_v11, %v6127_v43  ;;  %v3109_v26 = vpop.f32.mrf.mxu1 }
 0x4d0   : > { %v2877_v18 = vpop.f32.mrf.mxu2 }
 0x4d1   : > { %v3110_v48 = vadd.f32 %v3109_v26, %v3021_v22  ;;  %v2878_v63 = vadd.f32 %v2877_v18, %v6074_v25  ;;  %v2966_v4 = vpop.f32.mrf.mxu3 }
 0x4d3   : > { %v3188_v53 = vmax.f32 %v3110_v48, 0.0  ;;  %v6225_v57 = vadd.f32 %v2966_v4, %v2878_v63 }
 0x4d5   : > { %3423 = vmatmul.bf16.gmra.mxu2 %v5971_v35  ;;  %v3246_v36 = vpack.c.bf16 %v3188_v53, %v3186_v34 }
 0x4d6   : > { %v3023_v44 = vpop.f32.mrf.mxu0 }
 0x4d7   : > { %v3112_v49 = vpop.f32.mrf.mxu1  ;;  %3512 = vmatmul.bf16.gmra.mxu3 %v3246_v36  ;;  %v3024_v51 = vadd.f32 %v3023_v44, %v6137_v59 }
 0x4d8   : > { %v2880_v31 = vpop.f32.mrf.mxu2 }
 0x4d9   : > { %v2881_v37 = vadd.f32 %v2880_v31, %v6074_v25  ;;  %v2969_v43 = vpop.f32.mrf.mxu3  ;;  %3062 = vmatmul.bf16.gmra.mxu0 %v5765_v58  ;;  %v3113_v60 = vadd.f32 %v3112_v49, %v3024_v51 }
 0x4da   : > { %3151 = vmatmul.bf16.gmra.mxu1 %v5861_v3 }
 0x4db   : > { %v6232_v21 = vadd.f32 %v2969_v43, %v2881_v37  ;;  %v3190_v11 = vmax.f32 %v3113_v60, 0.0 }
 0x4de   : > { %v3025_v14 = vpop.f32.mrf.mxu0 }
 0x4df   : > { %v3026_v35 = vadd.f32 %v3025_v14, %v6141_v39  ;;  %v3114_v27 = vpop.f32.mrf.mxu1 }
 0x4e0   : > { %v2882_v2 = vpop.f32.mrf.mxu2 }
 0x4e1   : > { %v3115_v50 = vadd.f32 %v3114_v27, %v3026_v35  ;;  %v2883_v32 = vadd.f32 %v2882_v2, %v6074_v25  ;;  %v2971_v52 = vpop.f32.mrf.mxu3 }
 0x4e3   : > { %v3192_v38 = vmax.f32 %v3115_v50, 0.0  ;;  %v6236_v22 = vadd.f32 %v2971_v52, %v2883_v32 }
 0x4e5   : > { %3428 = vmatmul.bf16.gmra.mxu2 %v5991_v42  ;;  %v3248_v58 = vpack.c.bf16 %v3192_v38, %v3190_v11 }
 0x4e6   : > { %v3028_v3 = vpop.f32.mrf.mxu0 }
 0x4e7   : > { %v3117_v59 = vpop.f32.mrf.mxu1  ;;  %3517 = vmatmul.bf16.gmra.mxu3 %v3248_v58  ;;  %v3029_v48 = vadd.f32 %v3028_v3, %v6154_v17 }
 0x4e8   : > { %v2885_v26 = vpop.f32.mrf.mxu2 }
 0x4e9   : > { %v2886_v18 = vadd.f32 %v2885_v26, %v6074_v25  ;;  %v2974_v39 = vpop.f32.mrf.mxu3  ;;  %3067 = vmatmul.bf16.gmra.mxu0 %v5777_v20  ;;  %v3118_v34 = vadd.f32 %v3117_v59, %v3029_v48 }
 0x4ea   : > { %3156 = vmatmul.bf16.gmra.mxu1 %v5875_v54 }
 0x4eb   : > { %v6243_v63 = vadd.f32 %v2974_v39, %v2886_v18  ;;  %v3194_v37 = vmax.f32 %v3118_v34, 0.0 }
 0x4ee   : > { %v3030_v4 = vpop.f32.mrf.mxu0 }
 0x4ef   : > { %v3031_v42 = vadd.f32 %v3030_v4, %v6161_v41  ;;  %v3119_v53 = vpop.f32.mrf.mxu1 }
 0x4f0   : > { %v2887_v36 = vpop.f32.mrf.mxu2 }
 0x4f1   : > { %v3120_v44 = vadd.f32 %v3119_v53, %v3031_v42  ;;  %v2888_v49 = vadd.f32 %v2887_v36, %v6074_v25  ;;  %v2976_v31 = vpop.f32.mrf.mxu3 }
 0x4f3   : > { %v3196_v43 = vmax.f32 %v3120_v44, 0.0  ;;  %v6247_v51 = vadd.f32 %v2976_v31, %v2888_v49 }
 0x4f5   : > { %v3250_v20 = vpack.c.bf16 %v3196_v43, %v3194_v37  ;;  %3433 = vmatmul.bf16.gmra.mxu2 %v6005_v1 }
 0x4f6   : > { %v3033_v54 = vpop.f32.mrf.mxu0 }
 0x4f7   : > { %v3122_v17 = vpop.f32.mrf.mxu1  ;;  %3522 = vmatmul.bf16.gmra.mxu3 %v3250_v20  ;;  %v3034_v35 = vadd.f32 %v3033_v54, %v6171_v28 }
 0x4f8   : > { %v2890_v14 = vpop.f32.mrf.mxu2 }
 0x4f9   : > { %v2891_v60 = vadd.f32 %v2890_v14, %v6074_v25  ;;  %v2979_v41 = vpop.f32.mrf.mxu3  ;;  %3072 = vmatmul.bf16.gmra.mxu0 %v5789_v47  ;;  %v3123_v50 = vadd.f32 %v3122_v17, %v3034_v35 }
 0x4fa   : > { %3161 = vmatmul.bf16.gmra.mxu1 %v5889_v13 }
 0x4fb   : > { %v6254_v27 = vadd.f32 %v2979_v41, %v2891_v60  ;;  %v3198_v3 = vmax.f32 %v3123_v50, 0.0 }
 0x4fe   : > { %v3035_v2 = vpop.f32.mrf.mxu0 }
 0x4ff   : > { %v3036_v32 = vadd.f32 %v3035_v2, %v6175_v19  ;;  %v3124_v1 = vpop.f32.mrf.mxu1 }
 0x500   : > { %v2892_v52 = vpop.f32.mrf.mxu2 }
 0x501   : > { %v3125_v11 = vadd.f32 %v3124_v1, %v3036_v32  ;;  %v2893_v38 = vadd.f32 %v2892_v52, %v6074_v25  ;;  %v2981_v58 = vpop.f32.mrf.mxu3 }
 0x503   : > { %v3200_v59 = vmax.f32 %v3125_v11, 0.0  ;;  %v6258_v26 = vadd.f32 %v2981_v58, %v2893_v38 }
 0x505   : > { %v3252_v47 = vpack.c.bf16 %v3200_v59, %v3198_v3  ;;  %3438 = vmatmul.bf16.gmra.mxu2 %v6025_v0 }
 0x506   : > { %v3038_v13 = vpop.f32.mrf.mxu0 }
 0x507   : > { %v3127_v28 = vpop.f32.mrf.mxu1  ;;  %3527 = vmatmul.bf16.gmra.mxu3 %v3252_v47  ;;  %v3039_v48 = vadd.f32 %v3038_v13, %v6185_v23 }
 0x508   : > { %v2895_v18 = vpop.f32.mrf.mxu2 }
 0x509   : > { %v2896_v39 = vadd.f32 %v2895_v18, %v6074_v25  ;;  %v2984_v19 = vpop.f32.mrf.mxu3  ;;  %3077 = vmatmul.bf16.gmra.mxu0 %v5801_v55  ;;  %v3128_v42 = vadd.f32 %v3127_v28, %v3039_v48 }
 0x50a   : > { %3166 = vmatmul.bf16.gmra.mxu1 %v5903_v40 }
 0x50b   : > { %v6265_v4 = vadd.f32 %v2984_v19, %v2896_v39  ;;  %v3202_v37 = vmax.f32 %v3128_v42, 0.0 }
 0x50e   : > { %v3040_v34 = vpop.f32.mrf.mxu0 }
 0x50f   : > { %v3041_v53 = vadd.f32 %v3040_v34, %v6189_v61  ;;  %v3129_v0 = vpop.f32.mrf.mxu1 }
 0x510   : > { %v2897_v36 = vpop.f32.mrf.mxu2 }
 0x511   : > { %v3130_v44 = vadd.f32 %v3129_v0, %v3041_v53  ;;  %v2898_v49 = vadd.f32 %v2897_v36, %v6074_v25  ;;  %v2986_v31 = vpop.f32.mrf.mxu3 }
 0x513   : > { %v3204_v43 = vmax.f32 %v3130_v44, 0.0  ;;  %v6269_v20 = vadd.f32 %v2986_v31, %v2898_v49 }
 0x515   : > { %v3254_v55 = vpack.c.bf16 %v3204_v43, %v3202_v37  ;;  %3443 = vmatmul.bf16.gmra.mxu2 %v6039_v33 }
 0x516   : > { %v3043_v40 = vpop.f32.mrf.mxu0 }
 0x517   : > { %v3132_v23 = vpop.f32.mrf.mxu1  ;;  %3532 = vmatmul.bf16.gmra.mxu3 %v3254_v55  ;;  %v3044_v14 = vadd.f32 %v3043_v40, %v6199_v7 }
 0x518   : > { %v2900_v54 = vpop.f32.mrf.mxu2 }
 0x519   : > { %v2901_v17 = vadd.f32 %v2900_v54, %v6074_v25  ;;  %v2989_v61 = vpop.f32.mrf.mxu3  ;;  %3082 = vmatmul.bf16.gmra.mxu0 %v5821_v15  ;;  %v3133_v35 = vadd.f32 %v3132_v23, %v3044_v14 }
 0x51a   : > { %3171 = vmatmul.bf16.gmra.mxu1 %v5923_v9 }
 0x51b   : > { %v6276_v60 = vadd.f32 %v2989_v61, %v2901_v17  ;;  %v3206_v11 = vmax.f32 %v3133_v35, 0.0 }
 0x51e   : > { %v3045_v41 = vpop.f32.mrf.mxu0 }
 0x51f   : > { %v3046_v2 = vadd.f32 %v3045_v41, %v6203_v16  ;;  %v3134_v33 = vpop.f32.mrf.mxu1 }
 0x520   : > { %v2902_v50 = vpop.f32.mrf.mxu2 }
 0x521   : > { %v3135_v32 = vadd.f32 %v3134_v33, %v3046_v2  ;;  %v2903_v1 = vadd.f32 %v2902_v50, %v6074_v25  ;;  %v2991_v52 = vpop.f32.mrf.mxu3 }
 0x523   : > { %v3208_v38 = vmax.f32 %v3135_v32, 0.0  ;;  %v6280_v58 = vadd.f32 %v2991_v52, %v2903_v1 }
 0x525   : > { %v3256_v15 = vpack.c.bf16 %v3208_v38, %v3206_v11  ;;  %3448 = vmatmul.bf16.gmra.mxu2 %v6059_v56 }
 0x526   : > { %v3048_v9 = vpop.f32.mrf.mxu0 }
 0x527   : > { %v3137_v7 = vpop.f32.mrf.mxu1  ;;  %3537 = vmatmul.bf16.gmra.mxu3 %v3256_v15  ;;  %v3049_v47 = vadd.f32 %v3048_v9, %v6210_v12  ;;  %v6296_v12 = vld [vmem:[%s6429_s8] ss:$0 sm:$0xff] }
 0x528   : > { %v2905_v3 = vpop.f32.mrf.mxu2 }
 0x529   : > { %v2906_v16 = vadd.f32 %v2905_v3, %v6074_v25  ;;  %v2994_v59 = vpop.f32.mrf.mxu3  ;;  %v3138_v18 = vadd.f32 %v3137_v7, %v3049_v47 }
 0x52b   : > { %v6285_v13 = vadd.f32 %v2994_v59, %v2906_v16  ;;  %v3210_v53 = vmax.f32 %v3138_v18, 0.0 }
 0x52e   : > { %v3050_v28 = vpop.f32.mrf.mxu0 }
 0x52f   : > { %v3051_v39 = vadd.f32 %v3050_v28, %v6214_v30  ;;  %v3139_v19 = vpop.f32.mrf.mxu1 }
 0x530   : > { %v2907_v48 = vpop.f32.mrf.mxu2 }
 0x531   : > { %v3140_v56 = vadd.f32 %v3139_v19, %v3051_v39  ;;  %v2908_v34 = vadd.f32 %v2907_v48, %v6074_v25  ;;  %v2996_v42 = vpop.f32.mrf.mxu3 }
 0x533   : > { %v3212_v0 = vmax.f32 %v3140_v56, 0.0  ;;  %v6289_v36 = vadd.f32 %v2996_v42, %v2908_v34 }
 0x535   : > { %v3258_v44 = vpack.c.bf16 %v3212_v0, %v3210_v53  ;;  %3453 = vmatmul.bf16.gmra.mxu2 %v6076_v6 }
 0x536   : > { %v3053_v30 = vpop.f32.mrf.mxu0 }
 0x537   : > { %v3142_v49 = vpop.f32.mrf.mxu1  ;;  %3542 = vmatmul.bf16.gmra.mxu3 %v3258_v44  ;;  %v3054_v43 = vadd.f32 %v3053_v30, %v6221_v24 }
 0x538   : > { %v3414_v25 = vpop.f32.mrf.mxu2 }
 0x539   : > { %v3415_v31 = vadd.f32 %v6296_v12, %v3414_v25  ;;  %v3143_v40 = vadd.f32 %v3142_v49, %v3054_v43 }
 0x53a   : > { %v3503_v37 = vpop.f32.mrf.mxu3 }
 0x53b   : > { %v3504_v55 = vadd.f32 %v3503_v37, %v3415_v31  ;;  %v3214_v35 = vmax.f32 %v3143_v40, 0.0 }
 0x53d   : > { %3583 = vst [vmem:[%s6302_s23] sm:$0xff] %v3504_v55 }
 0x53e   : > { %v3055_v6 = vpop.f32.mrf.mxu0 }
 0x53f   : > { %v3056_v23 = vadd.f32 %v3055_v6, %v6225_v57  ;;  %v3144_v54 = vpop.f32.mrf.mxu1 }
 0x540   : > { %v3416_v17 = vpop.f32.mrf.mxu2 }
 0x541   : > { %v3145_v61 = vadd.f32 %v3144_v54, %v3056_v23  ;;  %v3417_v14 = vadd.f32 %v6296_v12, %v3416_v17 }
 0x542   : > { %v3505_v41 = vpop.f32.mrf.mxu3 }
 0x543   : > { %v3216_v2 = vmax.f32 %v3145_v61, 0.0  ;;  %v3506_v24 = vadd.f32 %v3505_v41, %v3417_v14 }
 0x545   : > { %v3260_v33 = vpack.c.bf16 %v3216_v2, %v3214_v35  ;;  %3584 = vst [vmem:[%s6302_s23 + $0x8] sm:$0xff] %v3506_v24  ;;  %3458 = vmatmul.bf16.gmra.mxu2 %v6096_v8 }
 0x546   : > { %v3058_v50 = vpop.f32.mrf.mxu0 }
 0x547   : > { %v3147_v32 = vpop.f32.mrf.mxu1  ;;  %3547 = vmatmul.bf16.gmra.mxu3 %v3260_v33  ;;  %v3059_v11 = vadd.f32 %v3058_v50, %v6232_v21 }
 0x548   : > { %v3419_v1 = vpop.f32.mrf.mxu2 }
 0x549   : > { %v3420_v57 = vadd.f32 %v6296_v12, %v3419_v1  ;;  %v3148_v9 = vadd.f32 %v3147_v32, %v3059_v11 }
 0x54a   : > { %v3508_v52 = vpop.f32.mrf.mxu3 }
 0x54b   : > { %v3509_v38 = vadd.f32 %v3508_v52, %v3420_v57  ;;  %v3218_v28 = vmax.f32 %v3148_v9, 0.0 }
 0x54d   : > { %3585 = vst [vmem:[%s6302_s23 + $0x10] sm:$0xff] %v3509_v38 }
 0x54e   : > { %v3060_v15 = vpop.f32.mrf.mxu0 }
 0x54f   : > { %v3061_v7 = vadd.f32 %v3060_v15, %v6236_v22  ;;  %v3149_v3 = vpop.f32.mrf.mxu1 }
 0x550   : > { %v3421_v16 = vpop.f32.mrf.mxu2 }
 0x551   : > { %v3150_v59 = vadd.f32 %v3149_v3, %v3061_v7  ;;  %v3422_v8 = vadd.f32 %v6296_v12, %v3421_v16 }
 0x552   : > { %v3510_v47 = vpop.f32.mrf.mxu3 }
 0x553   : > { %v3220_v18 = vmax.f32 %v3150_v59, 0.0  ;;  %v3511_v39 = vadd.f32 %v3510_v47, %v3422_v8 }
 0x555   : > { %v3262_v19 = vpack.c.bf16 %v3220_v18, %v3218_v28  ;;  %3586 = vst [vmem:[%s6302_s23 + $0x18] sm:$0xff] %v3511_v39  ;;  %3463 = vmatmul.bf16.gmra.mxu2 %v6110_v29 }
 0x556   : > { %v3063_v21 = vpop.f32.mrf.mxu0 }
 0x557   : > { %v3152_v48 = vpop.f32.mrf.mxu1  ;;  %3552 = vmatmul.bf16.gmra.mxu3 %v3262_v19  ;;  %v3064_v42 = vadd.f32 %v3063_v21, %v6243_v63 }
 0x558   : > { %v3424_v56 = vpop.f32.mrf.mxu2 }
 0x559   : > { %v3425_v22 = vadd.f32 %v6296_v12, %v3424_v56  ;;  %v3153_v44 = vadd.f32 %v3152_v48, %v3064_v42 }
 0x55a   : > { %v3513_v34 = vpop.f32.mrf.mxu3 }
 0x55b   : > { %v3514_v53 = vadd.f32 %v3513_v34, %v3425_v22  ;;  %v3222_v43 = vmax.f32 %v3153_v44, 0.0 }
 0x55d   : > { %3587 = vst [vmem:[%s6302_s23 + $0x20] sm:$0xff] %v3514_v53 }
 0x55e   : > { %v3065_v0 = vpop.f32.mrf.mxu0 }
 0x55f   : > { %v3066_v30 = vadd.f32 %v3065_v0, %v6247_v51  ;;  %v3154_v49 = vpop.f32.mrf.mxu1 }
 0x560   : > { %v3426_v25 = vpop.f32.mrf.mxu2 }
 0x561   : > { %v3155_v31 = vadd.f32 %v3154_v49, %v3066_v30  ;;  %v3427_v29 = vadd.f32 %v6296_v12, %v3426_v25 }
 0x562   : > { %v3515_v37 = vpop.f32.mrf.mxu3 }
 0x563   : > { %v3224_v55 = vmax.f32 %v3155_v31, 0.0  ;;  %v3516_v6 = vadd.f32 %v3515_v37, %v3427_v29 }
 0x565   : > { %v3264_v40 = vpack.c.bf16 %v3224_v55, %v3222_v43  ;;  %3588 = vst [vmem:[%s6302_s23 + $0x28] sm:$0xff] %v3516_v6  ;;  %3468 = vmatmul.bf16.gmra.mxu2 %v6130_v45 }
 0x566   : > { %v3068_v63 = vpop.f32.mrf.mxu0 }
 0x567   : > { %v3157_v23 = vpop.f32.mrf.mxu1  ;;  %3557 = vmatmul.bf16.gmra.mxu3 %v3264_v40  ;;  %v3069_v61 = vadd.f32 %v3068_v63, %v6254_v27 }
 0x568   : > { %v3429_v54 = vpop.f32.mrf.mxu2 }
 0x569   : > { %v3430_v51 = vadd.f32 %v6296_v12, %v3429_v54  ;;  %v3158_v35 = vadd.f32 %v3157_v23, %v3069_v61 }
 0x56a   : > { %v3518_v17 = vpop.f32.mrf.mxu3 }
 0x56b   : > { %v3519_v14 = vadd.f32 %v3518_v17, %v3430_v51  ;;  %v3226_v1 = vmax.f32 %v3158_v35, 0.0 }
 0x56d   : > { %3589 = vst [vmem:[%s6302_s23 + $0x30] sm:$0xff] %v3519_v14 }
 0x56e   : > { %v3070_v41 = vpop.f32.mrf.mxu0 }
 0x56f   : > { %v3071_v2 = vadd.f32 %v3070_v41, %v6258_v26  ;;  %v3159_v24 = vpop.f32.mrf.mxu1 }
 0x570   : > { %v3431_v33 = vpop.f32.mrf.mxu2 }
 0x571   : > { %v3160_v50 = vadd.f32 %v3159_v24, %v3071_v2  ;;  %v3432_v45 = vadd.f32 %v6296_v12, %v3431_v33 }
 0x572   : > { %v3520_v32 = vpop.f32.mrf.mxu3 }
 0x573   : > { %v3228_v57 = vmax.f32 %v3160_v50, 0.0  ;;  %v3521_v52 = vadd.f32 %v3520_v32, %v3432_v45 }
 0x575   : > { %v3266_v11 = vpack.c.bf16 %v3228_v57, %v3226_v1  ;;  %3590 = vst [vmem:[%s6302_s23 + $0x38] sm:$0xff] %v3521_v52  ;;  %3473 = vmatmul.bf16.gmra.mxu2 %v6144_v46 }
 0x576   : > { %v3073_v27 = vpop.f32.mrf.mxu0 }
 0x577   : > { %v3162_v38 = vpop.f32.mrf.mxu1  ;;  %3562 = vmatmul.bf16.gmra.mxu3 %v3266_v11  ;;  %v3074_v7 = vadd.f32 %v3073_v27, %v6265_v4 }
 0x578   : > { %v3434_v15 = vpop.f32.mrf.mxu2 }
 0x579   : > { %v3435_v26 = vadd.f32 %v6296_v12, %v3434_v15  ;;  %v3163_v59 = vadd.f32 %v3162_v38, %v3074_v7 }
 0x57a   : > { %v3523_v9 = vpop.f32.mrf.mxu3 }
 0x57b   : > { %v3524_v3 = vadd.f32 %v3523_v9, %v3435_v26  ;;  %v3230_v19 = vmax.f32 %v3163_v59, 0.0 }
 0x57d   : > { %3591 = vst [vmem:[%s6302_s23 + $0x40] sm:$0xff] %v3524_v3 }
 0x57e   : > { %v3075_v16 = vpop.f32.mrf.mxu0 }
 0x57f   : > { %v3076_v8 = vadd.f32 %v3075_v16, %v6269_v20  ;;  %v3164_v47 = vpop.f32.mrf.mxu1 }
 0x580   : > { %v3436_v28 = vpop.f32.mrf.mxu2 }
 0x581   : > { %v3165_v18 = vadd.f32 %v3164_v47, %v3076_v8  ;;  %v3437_v46 = vadd.f32 %v6296_v12, %v3436_v28 }
 0x582   : > { %v3525_v39 = vpop.f32.mrf.mxu3 }
 0x583   : > { %v3232_v21 = vmax.f32 %v3165_v18, 0.0  ;;  %v3526_v48 = vadd.f32 %v3525_v39, %v3437_v46 }
 0x585   : > { %v3268_v56 = vpack.c.bf16 %v3232_v21, %v3230_v19  ;;  %3592 = vst [vmem:[%s6302_s23 + $0x48] sm:$0xff] %v3526_v48  ;;  %3478 = vmatmul.bf16.gmra.mxu2 %v6164_v62 }
 0x586   : > { %v3078_v4 = vpop.f32.mrf.mxu0 }
 0x587   : > { %v3167_v22 = vpop.f32.mrf.mxu1  ;;  %3567 = vmatmul.bf16.gmra.mxu3 %v3268_v56  ;;  %v3079_v53 = vadd.f32 %v3078_v4, %v6276_v60 }
 0x588   : > { %v3439_v34 = vpop.f32.mrf.mxu2 }
 0x589   : > { %v3440_v20 = vadd.f32 %v6296_v12, %v3439_v34  ;;  %v3168_v30 = vadd.f32 %v3167_v22, %v3079_v53 }
 0x58a   : > { %v3528_v42 = vpop.f32.mrf.mxu3 }
 0x58b   : > { %v3529_v0 = vadd.f32 %v3528_v42, %v3440_v20  ;;  %v3234_v43 = vmax.f32 %v3168_v30, 0.0 }
 0x58d   : > { %3593 = vst [vmem:[%s6302_s23 + $0x50] sm:$0xff] %v3529_v0 }
 0x58e   : > { %v3080_v44 = vpop.f32.mrf.mxu0 }
 0x58f   : > { %v3081_v49 = vadd.f32 %v3080_v44, %v6280_v58  ;;  %v3169_v25 = vpop.f32.mrf.mxu1 }
 0x590   : > { %v3441_v31 = vpop.f32.mrf.mxu2 }
 0x591   : > { %v3170_v29 = vadd.f32 %v3169_v25, %v3081_v49  ;;  %v3442_v62 = vadd.f32 %v6296_v12, %v3441_v31 }
 0x592   : > { %v3530_v37 = vpop.f32.mrf.mxu3 }
 0x593   : > { %v3236_v55 = vmax.f32 %v3170_v29, 0.0  ;;  %v3531_v6 = vadd.f32 %v3530_v37, %v3442_v62 }
 0x595   : > { %v3270_v40 = vpack.c.bf16 %v3236_v55, %v3234_v43  ;;  %3594 = vst [vmem:[%s6302_s23 + $0x58] sm:$0xff] %v3531_v6  ;;  %3483 = vmatmul.bf16.gmra.mxu2 %v6178_v10 }
 0x596   : > { %v3083_v60 = vpop.f32.mrf.mxu0 }
 0x597   : > { %v3172_v63 = vpop.f32.mrf.mxu1  ;;  %3572 = vmatmul.bf16.gmra.mxu3 %v3270_v40  ;;  %v3084_v51 = vadd.f32 %v3083_v60, %v6285_v13 }
 0x598   : > { %v3444_v23 = vpop.f32.mrf.mxu2 }
 0x599   : > { %v3445_v58 = vadd.f32 %v6296_v12, %v3444_v23  ;;  %v3173_v14 = vadd.f32 %v3172_v63, %v3084_v51 }
 0x59a   : > { %v3533_v54 = vpop.f32.mrf.mxu3 }
 0x59b   : > { %v3534_v17 = vadd.f32 %v3533_v54, %v3445_v58  ;;  %v3238_v50 = vmax.f32 %v3173_v14, 0.0 }
 0x59d   : > { %3595 = vst [vmem:[%s6302_s23 + $0x60] sm:$0xff] %v3534_v17 }
 0x59e   : > { %v3085_v61 = vpop.f32.mrf.mxu0 }
 0x59f   : > { %v3086_v41 = vadd.f32 %v3085_v61, %v6289_v36  ;;  %v3174_v35 = vpop.f32.mrf.mxu1 }
 0x5a0   : > { %v3446_v2 = vpop.f32.mrf.mxu2 }
 0x5a1   : > { %v3175_v10 = vadd.f32 %v3174_v35, %v3086_v41  ;;  %v3447_v24 = vadd.f32 %v6296_v12, %v3446_v2 }
 0x5a2   : > { %v3535_v33 = vpop.f32.mrf.mxu3 }
 0x5a3   : > { %v3240_v45 = vmax.f32 %v3175_v10, 0.0  ;;  %v3536_v32 = vadd.f32 %v3535_v33, %v3447_v24 }
 0x5a5   : > { %v3272_v1 = vpack.c.bf16 %v3240_v45, %v3238_v50  ;;  %3596 = vst [vmem:[%s6302_s23 + $0x68] sm:$0xff] %v3536_v32  ;;  %3488 = vmatmul.bf16.gmra.mxu2 %v6192_v5 }
 0x5a7   : > { %3577 = vmatmul.bf16.gmra.mxu3 %v3272_v1 }
 0x5a8   : > { %v3449_v13 = vpop.f32.mrf.mxu2 }
 0x5a9   : > { %v3450_v36 = vadd.f32 %v6296_v12, %v3449_v13 }
 0x5aa   : > { %v3538_v57 = vpop.f32.mrf.mxu3 }
 0x5ab   : > { %v3539_v52 = vadd.f32 %v3538_v57, %v3450_v36 }
 0x5ad   : > { %3597 = vst [vmem:[%s6302_s23 + $0x70] sm:$0xff] %v3539_v52 }
 0x5b0   : > { %v3451_v11 = vpop.f32.mrf.mxu2 }
 0x5b1   : > { %v3452_v27 = vadd.f32 %v6296_v12, %v3451_v11 }
 0x5b2   : > { %v3540_v38 = vpop.f32.mrf.mxu3 }
 0x5b3   : > { %v3541_v15 = vadd.f32 %v3540_v38, %v3452_v27 }
 0x5b5   : > { %3598 = vst [vmem:[%s6302_s23 + $0x78] sm:$0xff] %v3541_v15 }
 0x5b8   : > { %v3454_v26 = vpop.f32.mrf.mxu2 }
 0x5b9   : > { %v3455_v9 = vadd.f32 %v6296_v12, %v3454_v26 }
 0x5ba   : > { %v3543_v5 = vpop.f32.mrf.mxu3 }
 0x5bb   : > { %v3544_v7 = vadd.f32 %v3543_v5, %v3455_v9 }
 0x5bd   : > { %3599 = vst [vmem:[%s6302_s23 + $0x80] sm:$0xff] %v3544_v7 }
 0x5c0   : > { %v3456_v3 = vpop.f32.mrf.mxu2 }
 0x5c1   : > { %v3457_v16 = vadd.f32 %v6296_v12, %v3456_v3 }
 0x5c2   : > { %v3545_v59 = vpop.f32.mrf.mxu3 }
 0x5c3   : > { %v3546_v8 = vadd.f32 %v3545_v59, %v3457_v16 }
 0x5c5   : > { %3600 = vst [vmem:[%s6302_s23 + $0x88] sm:$0xff] %v3546_v8 }
 0x5c8   : > { %v3459_v47 = vpop.f32.mrf.mxu2 }
 0x5c9   : > { %v3460_v28 = vadd.f32 %v6296_v12, %v3459_v47 }
 0x5ca   : > { %v3548_v18 = vpop.f32.mrf.mxu3 }
 0x5cb   : > { %v3549_v46 = vadd.f32 %v3548_v18, %v3460_v28 }
 0x5cd   : > { %3601 = vst [vmem:[%s6302_s23 + $0x90] sm:$0xff] %v3549_v46 }
 0x5d0   : > { %v3461_v39 = vpop.f32.mrf.mxu2 }
 0x5d1   : > { %v3462_v19 = vadd.f32 %v6296_v12, %v3461_v39 }
 0x5d2   : > { %v3550_v21 = vpop.f32.mrf.mxu3 }
 0x5d3   : > { %v3551_v48 = vadd.f32 %v3550_v21, %v3462_v19 }
 0x5d5   : > { %3602 = vst [vmem:[%s6302_s23 + $0x98] sm:$0xff] %v3551_v48 }
 0x5d8   : > { %v3464_v56 = vpop.f32.mrf.mxu2 }
 0x5d9   : > { %v3465_v4 = vadd.f32 %v6296_v12, %v3464_v56 }
 0x5da   : > { %v3553_v22 = vpop.f32.mrf.mxu3 }
 0x5db   : > { %v3554_v34 = vadd.f32 %v3553_v22, %v3465_v4 }
 0x5dd   : > { %3603 = vst [vmem:[%s6302_s23 + $0xa0] sm:$0xff] %v3554_v34 }
 0x5e0   : > { %v3466_v20 = vpop.f32.mrf.mxu2 }
 0x5e1   : > { %v3467_v42 = vadd.f32 %v6296_v12, %v3466_v20 }
 0x5e2   : > { %v3555_v53 = vpop.f32.mrf.mxu3 }
 0x5e3   : > { %v3556_v0 = vadd.f32 %v3555_v53, %v3467_v42 }
 0x5e5   : > { %3604 = vst [vmem:[%s6302_s23 + $0xa8] sm:$0xff] %v3556_v0 }
 0x5e8   : > { %v3469_v44 = vpop.f32.mrf.mxu2 }
 0x5e9   : > { %v3470_v30 = vadd.f32 %v6296_v12, %v3469_v44 }
 0x5ea   : > { %v3558_v49 = vpop.f32.mrf.mxu3 }
 0x5eb   : > { %v3559_v25 = vadd.f32 %v3558_v49, %v3470_v30 }
 0x5ed   : > { %3605 = vst [vmem:[%s6302_s23 + $0xb0] sm:$0xff] %v3559_v25 }
 0x5f0   : > { %v3471_v31 = vpop.f32.mrf.mxu2 }
 0x5f1   : > { %v3472_v29 = vadd.f32 %v6296_v12, %v3471_v31 }
 0x5f2   : > { %v3560_v62 = vpop.f32.mrf.mxu3 }
 0x5f3   : > { %v3561_v37 = vadd.f32 %v3560_v62, %v3472_v29 }
 0x5f5   : > { %3606 = vst [vmem:[%s6302_s23 + $0xb8] sm:$0xff] %v3561_v37 }
 0x5f8   : > { %v3474_v43 = vpop.f32.mrf.mxu2 }
 0x5f9   : > { %v3475_v55 = vadd.f32 %v6296_v12, %v3474_v43 }
 0x5fa   : > { %v3563_v6 = vpop.f32.mrf.mxu3 }
 0x5fb   : > { %v3564_v40 = vadd.f32 %v3563_v6, %v3475_v55 }
 0x5fd   : > { %3607 = vst [vmem:[%s6302_s23 + $0xc0] sm:$0xff] %v3564_v40 }
 0x600   : > { %v3476_v60 = vpop.f32.mrf.mxu2 }
 0x601   : > { %v3477_v63 = vadd.f32 %v6296_v12, %v3476_v60 }
 0x602   : > { %v3565_v23 = vpop.f32.mrf.mxu3 }
 0x603   : > { %v3566_v58 = vadd.f32 %v3565_v23, %v3477_v63 }
 0x605   : > { %3608 = vst [vmem:[%s6302_s23 + $0xc8] sm:$0xff] %v3566_v58 }
 0x608   : > { %v3479_v54 = vpop.f32.mrf.mxu2 }
 0x609   : > { %v3480_v51 = vadd.f32 %v6296_v12, %v3479_v54 }
 0x60a   : > { %v3568_v17 = vpop.f32.mrf.mxu3 }
 0x60b   : > { %v3569_v61 = vadd.f32 %v3568_v17, %v3480_v51 }
 0x60d   : > { %3609 = vst [vmem:[%s6302_s23 + $0xd0] sm:$0xff] %v3569_v61 }
 0x610   : > { %v3481_v14 = vpop.f32.mrf.mxu2 }
 0x611   : > { %v3482_v41 = vadd.f32 %v6296_v12, %v3481_v14 }
 0x612   : > { %v3570_v35 = vpop.f32.mrf.mxu3 }
 0x613   : > { %v3571_v2 = vadd.f32 %v3570_v35, %v3482_v41 }
 0x615   : > { %3610 = vst [vmem:[%s6302_s23 + $0xd8] sm:$0xff] %v3571_v2 }
 0x618   : > { %v3484_v10 = vpop.f32.mrf.mxu2 }
 0x619   : > { %v3485_v24 = vadd.f32 %v6296_v12, %v3484_v10 }
 0x61a   : > { %v3573_v33 = vpop.f32.mrf.mxu3 }
 0x61b   : > { %v3574_v50 = vadd.f32 %v3573_v33, %v3485_v24 }
 0x61d   : > { %3611 = vst [vmem:[%s6302_s23 + $0xe0] sm:$0xff] %v3574_v50 }
 0x620   : > { %v3486_v45 = vpop.f32.mrf.mxu2 }
 0x621   : > { %v3487_v32 = vadd.f32 %v6296_v12, %v3486_v45 }
 0x622   : > { %v3575_v1 = vpop.f32.mrf.mxu3 }
 0x623   : > { %v3576_v13 = vadd.f32 %v3575_v1, %v3487_v32 }
 0x625   : > { %3612 = vst [vmem:[%s6302_s23 + $0xe8] sm:$0xff] %v3576_v13 }
 0x628   : > { %v3489_v36 = vpop.f32.mrf.mxu2 }
 0x629   : > { %v3490_v57 = vadd.f32 %v6296_v12, %v3489_v36 }
 0x62a   : > { %v3578_v52 = vpop.f32.mrf.mxu3 }
 0x62b   : > { %v3579_v11 = vadd.f32 %v3578_v52, %v3490_v57 }
 0x62d   : > { %3613 = vst [vmem:[%s6302_s23 + $0xf0] sm:$0xff] %v3579_v11 }
 0x630   : > { %v3491_v27 = vpop.f32.mrf.mxu2 }
 0x631   : > { %v3492_v38 = vadd.f32 %v6296_v12, %v3491_v27 }
 0x632   : > { %v3580_v15 = vpop.f32.mrf.mxu3 }
 0x633   : > { %v3581_v26 = vadd.f32 %v3580_v15, %v3492_v38 }
 0x635   : > { %3614 = vst [vmem:[%s6302_s23 + $0xf8] sm:$0xff] %v3581_v26 }
 0x636   : > { %4625 = shalt.err (!%p4622_p8)
}
 0x637   : > { %s4669_s14 = smov 128   ;;  %s4670_s23 = smov 8  }
 0x638   : > { %4516 = dma.vmem_to_hbm [thread:$0]  (%p4759_p5), %s3629_s27, 4096, %s3631_s28, %s3616_s13, %s4669_s14, %s4669_s14, %s4670_s23  }
 0x639 PF: > { %p4528_p9 = scmp.ge.s32.totalorder %s4664_s12, 2  ;;  %s3645_s26 = sand.u32 1, %s4652_s30  }
 0x63a   : > { %s3646_s21 = scalar_lea.sflag [#allocation4], %s3645_s26 }
 0x63b   : > { %p4523_p10 = pnand %p4528_p9, %p4763_p6 }
 0x63d   : > { %p4524_p11 = pneg %p4523_p10 }
 0x63f   : > { %4647 = dma.done.wait (%p4524_p11), %s3646_s21, 4096  }
 0x640   : > { %4649 = vsyncadd (%p4524_p11), %s3646_s21, 4294963200  ;;  %p20_p12 = scmp.ge.s32.totalorder %s4746_s15, 4   ;;  %s6553_s30 = smov %s4656_s10 }
 0x641   : > { %s6554_s10 = smov %s4660_s11  ;;  %s6555_s11 = smov %s4757_s18 }
 0x642   : > { %s6556_s12 = smov %s4746_s15  ;;  %22 = sbr.rel (!%p20_p12) target bundleno = 4 (0x4), region = 96 }
 0x647   :  { %3652 = vsyncpa [#allocation3], 1 }
 0x648   :  { %3654 = vsyncpa [#allocation3 + $0x1], 1 }
 0x649   :  { %3655 = vsyncpa [#allocation4], 1 }
 0x64a   :  { %3657 = vsyncpa [#allocation4 + $0x1], 1 }

</bundles_post_ra>
